<compile_context>
chip_gen: v5e
topology: v5e:2x2
jax: 0.10.0
libtpu: 0.0.40
codegen_flags: <defaults>
</compile_context>

<pallas_src>
import numpy as np
import jax
import jax.numpy as jnp
from jax.experimental import pallas as pl
from jax.experimental.pallas import tpu as pltpu


def _round_up(x, m):
    return (x + m - 1) // m * m


# ----------------------------------------------------------------------------
# Pallas kernel: destination-tile gather as a one-hot selection matmul with a
# tiled contraction (source-chunk) axis.
# ----------------------------------------------------------------------------
def _coord_transform_kernel(idx_ref, src_ref, o_ref, acc_ref):
    """acc[j, :] += onehot(idx[j] falls in this source chunk) @ src_chunk.

    idx_ref : (TILE_M, 1)     int32 source row per destination row (-1 = none)
    src_ref : (TILE_K, C_P)   one source-row chunk (padded, lane-dense)
    o_ref   : (TILE_M, C_P)   aligned output tile (padded, lane-dense)
    acc_ref : (TILE_M, C_P)   f32 accumulator scratch (resident across k)
    """
    k = pl.program_id(1)

    @pl.when(k == 0)
    def _():
        acc_ref[...] = jnp.zeros_like(acc_ref)

    tile_m = idx_ref.shape[0]
    tile_k = src_ref.shape[0]
    lane_ids = jax.lax.broadcasted_iota(jnp.int32, (tile_m, tile_k), 1)
    local_idx = idx_ref[...] - k * tile_k            # (TILE_M, 1); -1 never matches
    onehot = (local_idx == lane_ids).astype(src_ref.dtype)  # (TILE_M, TILE_K)
    acc_ref[...] += jnp.dot(
        onehot,
        src_ref[...],
        preferred_element_type=jnp.float32,
        precision=jax.lax.Precision.HIGHEST,         # exact row selection
    )

    @pl.when(k == pl.num_programs(1) - 1)
    def _():
        o_ref[...] = acc_ref[...].astype(o_ref.dtype)


def coordinate_transform_rows(src_feat, src_of_dst, *, tile_m=256, tile_k=512):
    """Return aligned[(N_tgt, C)] with aligned[j] = src_feat[src_of_dst[j]] (or 0)."""
    n_src, c = src_feat.shape
    n_tgt = int(src_of_dst.shape[0])

    c_pad = _round_up(c, 128)                        # lane-dense loads/stores
    tile_k = min(tile_k, _round_up(n_src, 128))      # contraction chunk (mult of 128)
    n_src_pad = _round_up(n_src, tile_k)
    tile_m = min(tile_m, _round_up(n_tgt, 8))        # destination tile (mult of 8)
    n_tgt_pad = _round_up(n_tgt, tile_m)

    src_p = jnp.pad(src_feat, ((0, n_src_pad - n_src), (0, c_pad - c)))

    idx_np = np.full((n_tgt_pad, 1), -1, np.int32)   # pad rows -> zero output rows
    idx_np[:n_tgt, 0] = np.asarray(src_of_dst, np.int32)
    idx = jnp.asarray(idx_np)

    out = pl.pallas_call(
        _coord_transform_kernel,
        out_shape=jax.ShapeDtypeStruct((n_tgt_pad, c_pad), src_feat.dtype),
        grid_spec=pltpu.PrefetchScalarGridSpec(
            num_scalar_prefetch=0,
            grid=(n_tgt_pad // tile_m, n_src_pad // tile_k),
            in_specs=[
                pl.BlockSpec((tile_m, 1), lambda i, k: (i, 0)),       # dest->src table
                pl.BlockSpec((tile_k, c_pad), lambda i, k: (k, 0)),   # source chunk
            ],
            out_specs=pl.BlockSpec((tile_m, c_pad), lambda i, k: (i, 0)),
            scratch_shapes=[pltpu.VMEM((tile_m, c_pad), jnp.float32)],
        ),
        compiler_params=pltpu.CompilerParams(
            # destination tiles split across TCs; source chunks are the reduction
            dimension_semantics=("parallel", "arbitrary"),
        ),
    )(idx, src_p)
    return out[:n_tgt, :c]


# ----------------------------------------------------------------------------
# Minimal HashTree model (host-side index/coordinate bookkeeping).
# ----------------------------------------------------------------------------
class HashTree:
    ENCODER = 0
    DECODER = 1

    def __init__(self, coords, is_reflected=False):
        # coords: {branch: {depth: np.ndarray (N, 3) int32}}
        self._coords = coords
        self.is_reflected = is_reflected

    def get_coords(self, branch, depth):
        return self._coords[branch][depth]

    def get_coords_size(self, branch, depth):
        return int(self._coords[branch][depth].shape[0])

    def get_stride(self, branch, depth):
        return 1 << depth

    @staticmethod
    def get_range_kernel(r):
        assert r == 1
        return np.zeros((1, 3), np.int32)     # identity offset (1x1x1 kernel)

    def get_neighbours_data(self, src_coords, stride, depth, kernel, tgt_branch,
                            conv_based=True):
        # TODO(synk): the real HashTree neighbour query is a device-side hash
        # map; modeled host-side with a python dict over coordinate tuples.
        tgt = self._coords[tgt_branch][depth]
        lut = {tuple(c): i for i, c in enumerate(tgt.tolist())}
        e_idx, d_idx = [], []
        for off in kernel.tolist():
            shifted = src_coords + np.asarray(off, np.int32) * stride
            for i, c in enumerate(shifted.tolist()):
                j = lut.get(tuple(c))
                if j is not None:
                    e_idx.append(i)
                    d_idx.append(j)
        return (np.asarray(e_idx, np.int64), np.asarray(d_idx, np.int64), None, None)


# ----------------------------------------------------------------------------
# CoordinateTransform forward (matches the PyTorch module).
# ----------------------------------------------------------------------------
class CoordinateTransform:
    def __init__(self, src_branch, tgt_branch):
        self.src_branch = src_branch
        self.tgt_branch = tgt_branch

    def __call__(self, hash_tree, src_feat, feat_depth):
        assert src_feat.shape[0] == hash_tree.get_coords_size(self.src_branch, feat_depth)
        if (hash_tree.is_reflected
                and self.src_branch == HashTree.ENCODER
                and self.tgt_branch == HashTree.DECODER):
            return src_feat, feat_depth

        n_tgt = hash_tree.get_coords_size(self.tgt_branch, feat_depth)
        e_idx, d_idx, _, _ = hash_tree.get_neighbours_data(
            hash_tree.get_coords(self.src_branch, feat_depth),
            hash_tree.get_stride(self.src_branch, feat_depth),
            feat_depth,
            hash_tree.get_range_kernel(1),
            self.tgt_branch,
            conv_based=True,
        )
        # scatter -> gather: static per-destination source row (-1 = stays zero).
        src_of_dst = np.full((n_tgt,), -1, np.int32)
        src_of_dst[d_idx] = e_idx
        aligned = coordinate_transform_rows(src_feat, src_of_dst)
        return aligned, feat_depth


# ----------------------------------------------------------------------------
if __name__ == "__main__":
    R = 8           # dense coordinate universe 8^3 = 512 voxels
    C = 32          # feature channels
    N_ENC, N_DEC = 320, 384
    DEPTH = 0

    key = jax.random.PRNGKey(0)
    k_enc, k_dec, k_feat = jax.random.split(key, 3)

    all_coords = np.stack(
        np.meshgrid(np.arange(R), np.arange(R), np.arange(R), indexing="ij"), -1
    ).reshape(-1, 3).astype(np.int32)

    perm_e = np.asarray(jax.random.permutation(k_enc, all_coords.shape[0]))
    perm_d = np.asarray(jax.random.permutation(k_dec, all_coords.shape[0]))
    enc_coords = all_coords[perm_e[:N_ENC]]           # source-branch sparse coords
    dec_coords = all_coords[perm_d[:N_DEC]]           # target-branch sparse coords

    tree = HashTree(
        {HashTree.ENCODER: {DEPTH: enc_coords}, HashTree.DECODER: {DEPTH: dec_coords}},
        is_reflected=False,
    )
    src_feat = jax.random.normal(k_feat, (N_ENC, C), jnp.float32)

    ct = CoordinateTransform(HashTree.ENCODER, HashTree.DECODER)
    out, out_depth = ct(tree, src_feat, DEPTH)
    out = jax.block_until_ready(out)

    # Reference: the module's scatter semantics, computed in numpy.
    e_idx, d_idx, _, _ = tree.get_neighbours_data(
        enc_coords, tree.get_stride(HashTree.ENCODER, DEPTH), DEPTH,
        HashTree.get_range_kernel(1), HashTree.DECODER, conv_based=True)
    ref = np.zeros((N_DEC, C), np.float32)
    ref[d_idx] = np.asarray(src_feat)[e_idx]

    assert out.shape == (N_DEC, C) and out_depth == DEPTH
    assert len(e_idx) > 0                                       # non-trivial overlap
    assert np.allclose(np.asarray(out), ref, rtol=1e-5, atol=1e-5)

    # Exercise the tiled-contraction path (multiple source chunks per dest tile).
    src_of_dst = np.full((N_DEC,), -1, np.int32)
    src_of_dst[d_idx] = e_idx
    out_tiled = coordinate_transform_rows(src_feat, src_of_dst, tile_m=64, tile_k=128)
    out_tiled = jax.block_until_ready(out_tiled)
    assert np.allclose(np.asarray(out_tiled), ref, rtol=1e-5, atol=1e-5)

    # Reflected ENCODER->DECODER shortcut: features pass through untouched.
    tree_r = HashTree(
        {HashTree.ENCODER: {DEPTH: enc_coords}, HashTree.DECODER: {DEPTH: dec_coords}},
        is_reflected=True,
    )
    out_r, depth_r = ct(tree_r, src_feat, DEPTH)
    assert out_r is src_feat and depth_r == DEPTH

    print("KERNEL_OK")
</pallas_src>

<mosaic_0001>
module attributes {stable_mosaic.version = 11 : i64} {
  func.func @_coord_transform_kernel(%arg0: i32, %arg1: i32, %arg2: memref<256x1xi32, #tpu.memory_space<vmem>>, %arg3: memref<384x128xf32, #tpu.memory_space<vmem>>, %arg4: memref<256x128xf32, #tpu.memory_space<vmem>>, %arg5: memref<256x128xf32, #tpu.memory_space<vmem>>) attributes {dimension_semantics = [#tpu.dimension_semantics<parallel>, #tpu.dimension_semantics<arbitrary>], iteration_bounds = array<i64: 2, 1>, scalar_prefetch = 0 : i64, scratch_operands = 1 : i64, tpu.core_type = #tpu.core_type<tc>, window_params = [{transform_indices = @transform_0, window_bounds = array<i64: 256, 1>}, {transform_indices = @transform_1, window_bounds = array<i64: 384, 128>}, {transform_indices = @transform_2, window_bounds = array<i64: 256, 128>}]} {
    %c0_i32 = arith.constant 0 : i32
    %0 = arith.cmpi eq, %arg1, %c0_i32 : i32
    %1 = arith.extui %0 : i1 to i32
    %c0_i32_0 = arith.constant 0 : i32
    %2 = arith.cmpi ne, %1, %c0_i32_0 : i32
    scf.if %2 {
      %cst_10 = arith.constant 0.000000e+00 : f32
      %20 = vector.broadcast %cst_10 : f32 to vector<256x128xf32>
      %c0_11 = arith.constant 0 : index
      %c0_12 = arith.constant 0 : index
      %21 = vector.load %arg5[%c0_11, %c0_12] : memref<256x128xf32, #tpu.memory_space<vmem>>, vector<256x128xf32>
      tpu.vector_store %arg5[%c0_11, %c0_12], %20 {strides = array<i32>} : memref<256x128xf32, #tpu.memory_space<vmem>>, vector<256x128xf32>,
    } else {
    }
    %3 = tpu.iota {dimensions = array<i32: 1>} : vector<256x384xi32>
    %c0 = arith.constant 0 : index
    %c0_1 = arith.constant 0 : index
    %4 = vector.load %arg2[%c0, %c0_1] : memref<256x1xi32, #tpu.memory_space<vmem>>, vector<256x1xi32>
    %c384_i32 = arith.constant 384 : i32
    %5 = arith.muli %arg1, %c384_i32 : i32
    %6 = vector.broadcast %5 : i32 to vector<256x1xi32>
    %7 = arith.subi %4, %6 : vector<256x1xi32>
    %8 = vector.broadcast %7 : vector<256x1xi32> to vector<256x384xi32>
    %9 = arith.cmpi eq, %8, %3 : vector<256x384xi32>
    %10 = arith.extui %9 : vector<256x384xi1> to vector<256x384xi32>
    %11 = arith.sitofp %10 : vector<256x384xi32> to vector<256x384xf32>
    %c0_2 = arith.constant 0 : index
    %c0_3 = arith.constant 0 : index
    %12 = vector.load %arg5[%c0_2, %c0_3] : memref<256x128xf32, #tpu.memory_space<vmem>>, vector<256x128xf32>
    %c0_4 = arith.constant 0 : index
    %c0_5 = arith.constant 0 : index
    %13 = vector.load %arg3[%c0_4, %c0_5] : memref<384x128xf32, #tpu.memory_space<vmem>>, vector<384x128xf32>
    %cst = arith.constant dense<0.000000e+00> : vector<256x128xf32>
    %14 = tpu.matmul %11, %13, %cst {dimension_numbers = #tpu.dot_dimension_numbers<[1], [0], [0], [1], [0, 0, 1, 1], [], []>, precision = #tpu.contract_precision<fp32>} : vector<256x384xf32>, vector<384x128xf32>, vector<256x128xf32> -> vector<256x128xf32>
    %15 = arith.addf %12, %14 : vector<256x128xf32>
    %c0_6 = arith.constant 0 : index
    %c0_7 = arith.constant 0 : index
    %16 = vector.load %arg5[%c0_6, %c0_7] : memref<256x128xf32, #tpu.memory_space<vmem>>, vector<256x128xf32>
    tpu.vector_store %arg5[%c0_6, %c0_7], %15 {strides = array<i32>} : memref<256x128xf32, #tpu.memory_space<vmem>>, vector<256x128xf32>,
    %c0_i32_8 = arith.constant 0 : i32
    %17 = arith.cmpi eq, %arg1, %c0_i32_8 : i32
    %18 = arith.extui %17 : i1 to i32
    %c0_i32_9 = arith.constant 0 : i32
    %19 = arith.cmpi ne, %18, %c0_i32_9 : i32
    scf.if %19 {
      %c0_10 = arith.constant 0 : index
      %c0_11 = arith.constant 0 : index
      %20 = vector.load %arg5[%c0_10, %c0_11] : memref<256x128xf32, #tpu.memory_space<vmem>>, vector<256x128xf32>
      %c0_12 = arith.constant 0 : index
      %c0_13 = arith.constant 0 : index
      %21 = vector.load %arg4[%c0_12, %c0_13] : memref<256x128xf32, #tpu.memory_space<vmem>>, vector<256x128xf32>
      tpu.vector_store %arg4[%c0_12, %c0_13], %20 {strides = array<i32>} : memref<256x128xf32, #tpu.memory_space<vmem>>, vector<256x128xf32>,
    } else {
    }
    return
  }
  func.func @transform_0(%arg0: i32, %arg1: i32) -> (i32, i32) {
    %c0_i32 = arith.constant 0 : i32
    %c0_i32_0 = arith.constant 0 : i32
    return %arg0, %c0_i32 : i32, i32
  }
  func.func @transform_1(%arg0: i32, %arg1: i32) -> (i32, i32) {
    %c0_i32 = arith.constant 0 : i32
    %c0_i32_0 = arith.constant 0 : i32
    return %arg1, %c0_i32 : i32, i32
  }
  func.func @transform_2(%arg0: i32, %arg1: i32) -> (i32, i32) {
    %c0_i32 = arith.constant 0 : i32
    %c0_i32_0 = arith.constant 0 : i32
    return %arg0, %c0_i32 : i32, i32
  }
}

</mosaic_0001>

<bundles_post_ra>
// kernel: tpu_custom_call.1
= control target key start
LH: loop header
LB: loop body
LE: loop exit
PB: predicated region body
PF: predicated region fallthrough
CT: control target
= control target key end

     0   :  { %7 = vsyncpa [#allocation4], 0  ;;  %s9920_s0 = inlined_call_operand.vmem [shape: s32[512,1], index: 0, kind: input, shape index: {}]   ;;  %s9921_s1 = inlined_call_operand.vmem [shape: f32[384,128], index: 1, kind: input, shape index: {}]   ;;  %s9922_s2 = inlined_call_operand.hbm [shape: f32[512,128], index: 2, kind: output, shape index: {}]  }
   0x1   :  { %9 = vsyncpa [#allocation4 + $0x1], 0  ;;  %s5481_s9 = smov 0   ;;  %s5483_s10 = smov 0  }
   0x2   :  { %s5485_s11 = smov 0   ;;  %s5487_s12 = smov 0  }
   0x3   :  { %s5489_s13 = smov 0   ;;  %s5491_s14 = smov 0  }
   0x4 LB: > { %s4887_s15 = sadd.s32 4294967295, %s5459_s14   ;;  %s4888_s16 = sadd.s32 4294967294, %s5459_s14   ;;  %s5459_s14 = sphi %s5491_s14, %s15_s14   ;;  %s5455_s13 = sphi %s5489_s13, %s11017_s13   ;;  %s5451_s12 = sphi %s5487_s12, %s11016_s12   ;;  %s5447_s11 = sphi %s5485_s11, %s11015_s11   ;;  %s5443_s10 = sphi %s5483_s10, %s11014_s10   ;;  %s5439_s9 = sphi %s5481_s9, %s11013_s9  }
   0x5   : > { %s27_s17 = sadd.s32 1, %s5455_s13  ;;  %s86_s18 = sadd.s32 1, %s5447_s11 }
   0x6   : > { %p29_p0 = scmp.ge.s32.totalorder %s27_s17, 2  ;;  %p96_p1 = scmp.ne.s32.totalorder %s5447_s11, %s5443_s10 }
   0x7   : > { %p97_p2 = scmp.eq.s32.totalorder %s4887_s15, 1  ;;  %p102_p3 = scmp.ne.s32.totalorder %s5443_s10, %s5439_s9 }
   0x8   : > { %s11019_s17 = smov (%p29_p0, %s27_s17), 0  ;;  %p103_p5 = scmp.eq.s32.totalorder %s4888_s16, 1 }
   0x9   : > { %p5521_p4 = por %p97_p2, %p96_p1  ;;  %s83_s20 = ssub.s32 %s5455_s13, %s11019_s17 }
   0xa   : > { %p4892_p6 = scmp.ge.s32.totalorder %s5459_s14, 1  ;;  %p84_p7 = scmp.eq.s32.totalorder %s83_s20, 0 }
   0xb   : > { %p5528_p8 = por %p103_p5, %p102_p3  ;;  %p139_p9 = scmp.lt.s32.totalorder %s5459_s14, 3 }
   0xc   : > { %s5534_s22 = scalar_select %p84_p7, %s5447_s11, %s86_s18  }
   0xd   : > { %p140_p10 = pnand %p4892_p6, %p139_p9 }
   0xf   : > { %143 = sbr.rel (%p140_p10) target bundleno = 1442 (0x5a2), region = 28 }
  0x14   : > { %s4894_s23 = sshll.u32 %s5451_s12, 5  ;;  %v5461_v0 = vmov 0   ;;  %v716_v19 = vld [vmem:[%s9921_s1 + $0x78] sm:$0xff]  ;;  %v715_v23 = vld [vmem:[%s9921_s1 + $0x70] sm:$0xff]  ;;  %v714_v27 = vld [vmem:[%s9921_s1 + $0x68] sm:$0xff]  ;;  %s163_s7 = sand.u32 1, %s5443_s10  }
  0x15   : > { %5380 = vset.pattern.permute.xlu2 %v5461_v0  ;;  %5379 = vset.pattern.permute.xlu1 %v5461_v0  ;;  %p167_p11 = scmp.lt.s32.totalorder %s4894_s23, 63  ;;  %v5563_v20 = vand.u32 4294901760, %v716_v19  ;;  %v5574_v26 = vand.u32 4294901760, %v715_v23  ;;  %v5585_v30 = vand.u32 4294901760, %v714_v27  ;;  %v713_v31 = vld [vmem:[%s9921_s1 + $0x60] sm:$0xff]  ;;  %v712_v36 = vld [vmem:[%s9921_s1 + $0x58] sm:$0xff] }
  0x16   : > { %5378 = vset.pattern.permute.xlu0 %v5461_v0  ;;  %v5598_v35 = vand.u32 4294901760, %v713_v31  ;;  %v5615_v43 = vand.u32 4294901760, %v712_v36  ;;  %v711_v44 = vld [vmem:[%s9921_s1 + $0x50] sm:$0xff]  ;;  %v710_v51 = vld [vmem:[%s9921_s1 + $0x48] sm:$0xff]  ;;  %v709_v57 = vld [vmem:[%s9921_s1 + $0x40] sm:$0xff]  ;;  %s4893_s8 = sshll.u32 %s163_s7, 8 }
  0x17   : > { %s11021_s23 = smov (!%p167_p11, %s4894_s23), 63  ;;  %v5572_v25 = vsub.f32 %v716_v19, %v5563_v20  ;;  %750 = vmatpush.msra.mxu0 %v5563_v20  ;;  %5286 = vmatpush.msra.mxu2 %v5563_v20  ;;  %v5583_v29 = vsub.f32 %v715_v23, %v5574_v26  ;;  %v5596_v34 = vsub.f32 %v714_v27, %v5585_v30  ;;  %v5626_v49 = vand.u32 4294901760, %v711_v44  ;;  %v708_v63 = vld [vmem:[%s9921_s1 + $0x38] sm:$0xff]  ;;  %s9609_s15 = scalar_lea.vmem [#allocation3], %s4893_s8 }
  0x18   : > { %s4895_s24 = sshll.u32 %s11021_s23, 3  ;;  %v5610_v40 = vsub.f32 %v713_v31, %v5598_v35  ;;  %v5629_v50 = vsub.f32 %v712_v36, %v5615_v43  ;;  %v5642_v55 = vand.u32 4294901760, %v710_v51  ;;  %v5652_v61 = vand.u32 4294901760, %v709_v57  ;;  %s5285_s16 = sshll.u32 %s5451_s12, 8 }
  0x19   : > { %s5540_s27 = scalar_lea.vmem %s9920_s0, %s4895_s24  ;;  %v1040_v28 = vand.u32 4294901760, %v5572_v25  ;;  %752 = vmatpush.msra.mxu0 %v5574_v26  ;;  %v1046_v33 = vand.u32 4294901760, %v5583_v29  ;;  %5287 = vmatpush.msra.mxu2 %v5574_v26  ;;  %v1052_v39 = vand.u32 4294901760, %v5596_v34  ;;  %v5640_v54 = vsub.f32 %v711_v44, %v5626_v49  ;;  %s4798_s23 = scalar_lea.hbm %s9922_s2, %s5285_s16 }
  0x1a   : > { %v235_v1 = vld [vmem:[%s5540_s27 + $0x80] sm:$0xff]  ;;  %v220_v2 = vld [vmem:[%s5540_s27 + $0x8] sm:$0xff]  ;;  %v238_v5 = vld [vmem:[%s5540_s27 + $0x98] sm:$0xff]  ;;  %v1058_v48 = vand.u32 4294901760, %v5610_v40  ;;  %v1064_v56 = vand.u32 4294901760, %v5629_v50  ;;  %v5650_v60 = vsub.f32 %v710_v51, %v5642_v55  ;;  %s4799_s24 = sshll.u32 %s9609_s15, 4  ;;  %s4800_s24 = int_to_ptr.vmem [resolvable:$true] %s4799_s24 }
  0x1b   : > { %v219_v3 = vld [vmem:[%s5540_s27] sm:$0xff]  ;;  %334 = vperm.xlu0 %5378, %v235_v1   ;;  %289 = vperm.xlu2 %5380, %v220_v2   ;;  %v236_v4 = vld [vmem:[%s5540_s27 + $0x88] sm:$0xff]  ;;  %v237_v6 = vld [vmem:[%s5540_s27 + $0x90] sm:$0xff]  ;;  %v1041_v32 = vsub.f32 %v5572_v25, %v1040_v28  ;;  %v1047_v38 = vsub.f32 %v5583_v29, %v1046_v33  ;;  %v1053_v47 = vsub.f32 %v5596_v34, %v1052_v39  ;;  %v1070_v59 = vand.u32 4294901760, %v5640_v54  ;;  %s4787_s12 = scalar_lea.sflag [#allocation4], %s163_s7  ;;  %s5401_s30 = scalar_lea.hbm %s9922_s2, 512 }
  0x1c   : > { %286 = vperm.xlu1 %5379, %v219_v3   ;;  %v221_v7 = vld [vmem:[%s5540_s27 + $0x10] sm:$0xff]  ;;  %v222_v8 = vld [vmem:[%s5540_s27 + $0x18] sm:$0xff]  ;;  %v239_v9 = vld [vmem:[%s5540_s27 + $0xa0] sm:$0xff]  ;;  %754 = vmatpush.msra.mxu0 %v5585_v30  ;;  %v1059_v53 = vsub.f32 %v5610_v40, %v1058_v48  ;;  %v1065_v62 = vsub.f32 %v5629_v50, %v1064_v56  ;;  %v1076_v1 = vand.u32 4294901760, %v5650_v60  ;;  %v5667_v2 = vsub.f32 %v709_v57, %v5652_v61 }
  0x1d   : > { %v240_v10 = vld [vmem:[%s5540_s27 + $0xa8] sm:$0xff]  ;;  %v241_v11 = vld [vmem:[%s5540_s27 + $0xb0] sm:$0xff]  ;;  %v223_v12 = vld [vmem:[%s5540_s27 + $0x20] sm:$0xff]  ;;  %v1042_v37 = vand.u32 4294901760, %v1041_v32  ;;  %5288 = vmatpush.msra.mxu2 %v5585_v30  ;;  %v1048_v46 = vand.u32 4294901760, %v1047_v38  ;;  %v1054_v52 = vand.u32 4294901760, %v1053_v47  ;;  %v1071_v0 = vsub.f32 %v5640_v54, %v1070_v59 }
  0x1e   : > { %v224_v13 = vld [vmem:[%s5540_s27 + $0x28] sm:$0xff]  ;;  %v225_v14 = vld [vmem:[%s5540_s27 + $0x30] sm:$0xff]  ;;  %v242_v15 = vld [vmem:[%s5540_s27 + $0xb8] sm:$0xff]  ;;  %756 = vmatpush.msra.mxu0 %v5598_v35  ;;  %v1060_v58 = vand.u32 4294901760, %v1059_v53  ;;  %v5669_v3 = vand.u32 4294901760, %v708_v63 }
  0x1f   : > { %v243_v16 = vld [vmem:[%s5540_s27 + $0xc0] sm:$0xff]  ;;  %v244_v17 = vld [vmem:[%s5540_s27 + $0xc8] sm:$0xff]  ;;  %v226_v18 = vld [vmem:[%s5540_s27 + $0x38] sm:$0xff]  ;;  %1043 = vmatpush.msra.mxu1 %v1042_v37  ;;  %5302 = vmatpush.msra.mxu3 %v1042_v37 }
  0x20   : > { %v227_v21 = vld [vmem:[%s5540_s27 + $0x40] sm:$0xff]  ;;  %v228_v22 = vld [vmem:[%s5540_s27 + $0x48] sm:$0xff]  ;;  %v245_v24 = vld [vmem:[%s5540_s27 + $0xd0] sm:$0xff]  ;;  %5289 = vmatpush.msra.mxu2 %v5598_v35  ;;  %758 = vmatpush.msra.mxu0 %v5615_v43 }
  0x21   : > { %v246_v41 = vld [vmem:[%s5540_s27 + $0xd8] sm:$0xff]  ;;  %v247_v42 = vld [vmem:[%s5540_s27 + $0xe0] sm:$0xff]  ;;  %v229_v45 = vld [vmem:[%s5540_s27 + $0x50] sm:$0xff]  ;;  %1049 = vmatpush.msra.mxu1 %v1048_v46  ;;  %5303 = vmatpush.msra.mxu3 %v1048_v46 }
  0x22   : > { %5290 = vmatpush.msra.mxu2 %v5615_v43  ;;  %760 = vmatpush.msra.mxu0 %v5626_v49  ;;  %v704_v32 = vld [vmem:[%s9921_s1 + $0x18] sm:$0xff]  ;;  %v703_v46 = vld [vmem:[%s9921_s1 + $0x10] sm:$0xff]  ;;  %v232_v47 = vld [vmem:[%s5540_s27 + $0x68] sm:$0xff] }
  0x23   : > { %337 = vperm.xlu0 %5378, %v236_v4   ;;  %343 = vperm.xlu2 %5380, %v238_v5   ;;  %v230_v4 = vld [vmem:[%s5540_s27 + $0x58] sm:$0xff]  ;;  %v231_v5 = vld [vmem:[%s5540_s27 + $0x60] sm:$0xff]  ;;  %v5723_v38 = vand.u32 4294901760, %v704_v32  ;;  %v5743_v57 = vand.u32 4294901760, %v703_v46 }
  0x24   : > { %340 = vperm.xlu1 %5379, %v237_v6   ;;  %1055 = vmatpush.msra.mxu1 %v1054_v52  ;;  %v1066_v6 = vand.u32 4294901760, %v1065_v62  ;;  %v702_v62 = vld [vmem:[%s9921_s1 + $0x8] sm:$0xff] }
  0x25   : > { %5304 = vmatpush.msra.mxu3 %v1054_v52  ;;  %5291 = vmatpush.msra.mxu2 %v5626_v49  ;;  %v5741_v53 = vsub.f32 %v704_v32, %v5723_v38 }
  0x26   : > { %1061 = vmatpush.msra.mxu1 %v1060_v58  ;;  %762 = vmatpush.msra.mxu0 %v5642_v55 }
  0x27   : > { %5305 = vmatpush.msra.mxu3 %v1060_v58  ;;  %5292 = vmatpush.msra.mxu2 %v5642_v55 }
  0x28   : > { %1067 = vmatpush.msra.mxu1 %v1066_v6  ;;  %764 = vmatpush.msra.mxu0 %v5652_v61 }
  0x29   : > { %5306 = vmatpush.msra.mxu3 %v1066_v6  ;;  %5293 = vmatpush.msra.mxu2 %v5652_v61  ;;  %v5757_v6 = vand.u32 4294901760, %v702_v62 }
  0x2a   : > { %766 = vmatpush.msra.mxu0 %v5669_v3 }
  0x2b   : > { %292 = vperm.xlu0 %5378, %v221_v7   ;;  %295 = vperm.xlu2 %5380, %v222_v8   ;;  %v707_v7 = vld [vmem:[%s9921_s1 + $0x30] sm:$0xff]  ;;  %v248_v8 = vld [vmem:[%s5540_s27 + $0xe8] sm:$0xff] }
  0x2c   : > { %346 = vperm.xlu1 %5379, %v239_v9   ;;  %v1072_v9 = vand.u32 4294901760, %v1071_v0  ;;  %5294 = vmatpush.msra.mxu2 %v5669_v3  ;;  %v1112_v0 = vand.u32 4294901760, %v5741_v53 }
  0x2e   : > { %1073 = vmatpush.msra.mxu1 %v1072_v9  ;;  %5307 = vmatpush.msra.mxu3 %v1072_v9 }
  0x33   : > { %349 = vperm.xlu0 %5378, %v240_v10   ;;  %352 = vperm.xlu2 %5380, %v241_v11   ;;  %v1077_v10 = vsub.f32 %v5650_v60, %v1076_v1  ;;  %v1082_v11 = vand.u32 4294901760, %v5667_v2 }
  0x34   : > { %298 = vperm.xlu1 %5379, %v223_v12   ;;  %v5684_v12 = vsub.f32 %v708_v63, %v5669_v3 }
  0x3b   : > { %301 = vperm.xlu0 %5378, %v224_v13   ;;  %304 = vperm.xlu2 %5380, %v225_v14   ;;  %v5687_v13 = vand.u32 4294901760, %v707_v7  ;;  %v706_v14 = vld [vmem:[%s9921_s1 + $0x28] sm:$0xff] }
  0x3c   : > { %355 = vperm.xlu1 %5379, %v242_v15   ;;  %v1078_v15 = vand.u32 4294901760, %v1077_v10 }
  0x3d   : > { %v5700_v19 = vsub.f32 %v707_v7, %v5687_v13  ;;  %768 = vmatpush.msra.mxu0 %v5687_v13  ;;  %5295 = vmatpush.msra.mxu2 %v5687_v13  ;;  %v701_v7 = vld [vmem:[%s9921_s1] sm:$0xff] }
  0x3e   : > { %1079 = vmatpush.msra.mxu1 %v1078_v15  ;;  %5308 = vmatpush.msra.mxu3 %v1078_v15  ;;  %v5767_v10 = vand.u32 4294901760, %v701_v7  ;;  %v5770_v15 = vsub.f32 %v702_v62, %v5757_v6 }
  0x3f   : > { %v1094_v31 = vand.u32 4294901760, %v5700_v19 }
  0x40   : > { %v1124_v32 = vand.u32 4294901760, %v5770_v15 }
  0x43   : > { %358 = vperm.xlu0 %5378, %v243_v16   ;;  %361 = vperm.xlu2 %5380, %v244_v17   ;;  %v1083_v16 = vsub.f32 %v5667_v2, %v1082_v11  ;;  %v1088_v17 = vand.u32 4294901760, %v5684_v12 }
  0x44   : > { %307 = vperm.xlu1 %5379, %v226_v18   ;;  %v5697_v18 = vand.u32 4294901760, %v706_v14 }
  0x45   : > { %v1089_v23 = vsub.f32 %v5684_v12, %v1088_v17 }
  0x46   : > { %770 = vmatpush.msra.mxu0 %v5697_v18  ;;  %5296 = vmatpush.msra.mxu2 %v5697_v18 }
  0x47   : > { %v1090_v44 = vand.u32 4294901760, %v1089_v23 }
  0x4b   : > { %310 = vperm.xlu0 %5378, %v227_v21   ;;  %313 = vperm.xlu2 %5380, %v228_v22   ;;  %v705_v21 = vld [vmem:[%s9921_s1 + $0x20] sm:$0xff]  ;;  %v1084_v22 = vand.u32 4294901760, %v1083_v16 }
  0x4c   : > { %364 = vperm.xlu1 %5379, %v245_v24   ;;  %v5709_v24 = vsub.f32 %v706_v14, %v5697_v18  ;;  %v5711_v27 = vand.u32 4294901760, %v705_v21 }
  0x4d   : > { %1085 = vmatpush.msra.mxu1 %v1084_v22  ;;  %5309 = vmatpush.msra.mxu3 %v1084_v22  ;;  %v233_v22 = vld [vmem:[%s5540_s27 + $0x70] sm:$0xff] }
  0x4e   : > { %v1100_v36 = vand.u32 4294901760, %v5709_v24  ;;  %v5721_v37 = vsub.f32 %v705_v21, %v5711_v27  ;;  %772 = vmatpush.msra.mxu0 %v5711_v27  ;;  %v5777_v21 = vsub.f32 %v701_v7, %v5767_v10  ;;  %5297 = vmatpush.msra.mxu2 %v5711_v27 }
  0x4f   : > { %1091 = vmatpush.msra.mxu1 %v1090_v44  ;;  %5310 = vmatpush.msra.mxu3 %v1090_v44 }
  0x50   : > { %v1101_v51 = vsub.f32 %v5709_v24, %v1100_v36  ;;  %v1106_v52 = vand.u32 4294901760, %v5721_v37  ;;  %774 = vmatpush.msra.mxu0 %v5723_v38  ;;  %5298 = vmatpush.msra.mxu2 %v5723_v38 }
  0x52   : > { %v1107_v63 = vsub.f32 %v5721_v37, %v1106_v52  ;;  %776 = vmatpush.msra.mxu0 %v5743_v57  ;;  %5299 = vmatpush.msra.mxu2 %v5743_v57 }
  0x53   : > { %367 = vperm.xlu0 %5378, %v246_v41   ;;  %370 = vperm.xlu2 %5380, %v247_v42   ;;  %v249_v41 = vld [vmem:[%s5540_s27 + $0xf0] sm:$0xff]  ;;  %v250_v42 = vld [vmem:[%s5540_s27 + $0xf8] sm:$0xff] }
  0x54   : > { %316 = vperm.xlu1 %5379, %v229_v45   ;;  %v1095_v45 = vsub.f32 %v5700_v19, %v1094_v31  ;;  %v1108_v14 = vand.u32 4294901760, %v1107_v63  ;;  %778 = vmatpush.msra.mxu0 %v5757_v6 }
  0x55   : > { %5300 = vmatpush.msra.mxu2 %v5757_v6 }
  0x56   : > { %v1096_v58 = vand.u32 4294901760, %v1095_v45  ;;  %v1125_v45 = vsub.f32 %v5770_v15, %v1124_v32  ;;  %780 = vmatpush.msra.mxu0 %v5767_v10 }
  0x57   : > { %5301 = vmatpush.msra.mxu2 %v5767_v10 }
  0x58   : > { %1097 = vmatpush.msra.mxu1 %v1096_v58  ;;  %5311 = vmatpush.msra.mxu3 %v1096_v58 }
  0x59   : > { %1265 = vmatpush.msrb.mxu2 %v5572_v25  ;;  %1700 = vmatpush.msrb.mxu0 %v1040_v28 }
  0x5b   : > { %319 = vperm.xlu0 %5378, %v230_v4   ;;  %322 = vperm.xlu2 %5380, %v231_v5   ;;  %v5755_v4 = vsub.f32 %v703_v46, %v5743_v57  ;;  %v1102_v5 = vand.u32 4294901760, %v1101_v51 }
  0x5c   : > { %373 = vperm.xlu1 %5379, %v248_v8   ;;  %v1113_v8 = vsub.f32 %v5741_v53, %v1112_v0  ;;  %1268 = vmatpush.msrb.mxu2 %v5583_v29 }
  0x5d   : > { %v1118_v9 = vand.u32 4294901760, %v5755_v4  ;;  %1103 = vmatpush.msra.mxu1 %v1102_v5  ;;  %5312 = vmatpush.msra.mxu3 %v1102_v5 }
  0x5e   : > { %v1114_v23 = vand.u32 4294901760, %v1113_v8  ;;  %1704 = vmatpush.msrb.mxu0 %v1046_v33  ;;  %1271 = vmatpush.msrb.mxu2 %v5596_v34  ;;  %v9955_v34 = vmov 1.0  }
  0x5f   : > { %v1119_v16 = vsub.f32 %v5755_v4, %v1118_v9  ;;  %1109 = vmatpush.msra.mxu1 %v1108_v14  ;;  %5313 = vmatpush.msra.mxu3 %v1108_v14 }
  0x60   : > { %1708 = vmatpush.msrb.mxu0 %v1052_v39  ;;  %1274 = vmatpush.msrb.mxu2 %v5610_v40 }
  0x61   : > { %v1120_v44 = vand.u32 4294901760, %v1119_v16  ;;  %1115 = vmatpush.msra.mxu1 %v1114_v23  ;;  %5314 = vmatpush.msra.mxu3 %v1114_v23 }
  0x62   : > { %1712 = vmatpush.msrb.mxu0 %v1058_v48  ;;  %1277 = vmatpush.msrb.mxu2 %v5629_v50 }
  0x63   : > { %376 = vperm.xlu0 %5378, %v249_v41   ;;  %379 = vperm.xlu2 %5380, %v250_v42   ;;  %v234_v41 = vld [vmem:[%s5540_s27 + $0x78] sm:$0xff]  ;;  %v1130_v42 = vand.u32 4294901760, %v5777_v21  ;;  %s4801_s27 = sshll.u32 %s4798_s23, 4  ;;  %s4802_s27 = int_to_ptr.hbm [resolvable:$true] %s4801_s27 }
  0x64   : > { %325 = vperm.xlu1 %5379, %v232_v47   ;;  %v1126_v47 = vand.u32 4294901760, %v1125_v45  ;;  %1121 = vmatpush.msra.mxu1 %v1120_v44  ;;  %s5395_s25 = sshra.s32 %s4802_s27, 4  ;;  %s5396_s25 = int_to_ptr.hbm [resolvable:$true] %s5395_s25 }
  0x65   : > { %v1131_v46 = vsub.f32 %v5777_v21, %v1130_v42  ;;  %5315 = vmatpush.msra.mxu3 %v1120_v44  ;;  %1716 = vmatpush.msrb.mxu0 %v1064_v56  ;;  %s5397_s26 = scalar_lea.hbm %s5396_s25, 256  ;;  %p5402_p1 = scmp.lt.s32.totalorder %s5396_s25, %s9922_s2 }
  0x66   : > { %1127 = vmatpush.msra.mxu1 %v1126_v47  ;;  %1280 = vmatpush.msrb.mxu2 %v5640_v54  ;;  %p5398_p12 = scmp.ne.s32.totalorder %s5396_s25, %s5397_s26  ;;  %p5403_p2 = scmp.lt.s32.totalorder %s5401_s30, %s5397_s26 }
  0x67   : > { %v1132_v51 = vand.u32 4294901760, %v1131_v46  ;;  %5316 = vmatpush.msra.mxu3 %v1126_v47  ;;  %1720 = vmatpush.msrb.mxu0 %v1070_v59 }
  0x68   : > { %1283 = vmatpush.msrb.mxu2 %v5650_v60  ;;  %p5399_p13 = pnand %p5398_p12, %p5521_p4  ;;  %p5404_p3 = por %p5403_p2, %p5402_p1 }
  0x69   : > { %1133 = vmatpush.msra.mxu1 %v1132_v51  ;;  %5317 = vmatpush.msra.mxu3 %v1132_v51 }
  0x6a   : > { %1724 = vmatpush.msrb.mxu0 %v1076_v1  ;;  %1286 = vmatpush.msrb.mxu2 %v5667_v2  ;;  %p5400_p0 = pneg %p5399_p13 }
  0x6b   : > { %328 = vperm.xlu0 %5378, %v233_v22   ;;  %1473 = vmatpush.msrb.mxu3 %v5563_v20 }
  0x6c   : > { %331 = vperm.xlu1 %5379, %v234_v41   ;;  %1891 = vmatpush.msrb.mxu1 %v5563_v20  ;;  %v215_v20 = vlaneseq  ;;  %p5405_p5 = pnand %p5404_p3, %p5400_p0 }
  0x6d   : > { %1475 = vmatpush.msrb.mxu3 %v5574_v26  ;;  %1728 = vmatpush.msrb.mxu0 %v1082_v11 }
  0x6e   : > { %1893 = vmatpush.msrb.mxu1 %v5574_v26  ;;  %1289 = vmatpush.msrb.mxu2 %v5684_v12  ;;  %v5855_v26 = vand.u32 127, %v215_v20 }
  0x6f   : > { %1477 = vmatpush.msrb.mxu3 %v5585_v30  ;;  %1732 = vmatpush.msrb.mxu0 %v1088_v17 }
  0x70   : > { %1895 = vmatpush.msrb.mxu1 %v5585_v30  ;;  %1292 = vmatpush.msrb.mxu2 %v5700_v19  ;;  %10249 = vst [vmem:[#allocation7_spill] sm:$0xff] %v5855_v26  ;;  %v9962_v30 = vmov 0.0  }
  0x71   : > { %1479 = vmatpush.msrb.mxu3 %v5598_v35  ;;  %1736 = vmatpush.msrb.mxu0 %v1094_v31 }
  0x72   : > { %1897 = vmatpush.msrb.mxu1 %v5598_v35  ;;  %1295 = vmatpush.msrb.mxu2 %v5709_v24 }
  0x73   : > { %1481 = vmatpush.msrb.mxu3 %v5615_v43  ;;  %1740 = vmatpush.msrb.mxu0 %v1100_v36 }
  0x74   : > { %1899 = vmatpush.msrb.mxu1 %v5615_v43  ;;  %1298 = vmatpush.msrb.mxu2 %v5721_v37 }
  0x75   : > { %1483 = vmatpush.msrb.mxu3 %v5626_v49  ;;  %v5851_v25 = vpop.permute.xlu2 %289  ;;  %1744 = vmatpush.msrb.mxu0 %v1106_v52 }
  0x76   : > { %1901 = vmatpush.msrb.mxu1 %v5626_v49  ;;  %10248 = vst [vmem:[#allocation6_spill] sm:$0xff] %v5851_v25  ;;  %1301 = vmatpush.msrb.mxu2 %v5741_v53  ;;  %vm384_vm0 = vcmp.eq.s32.totalorder %v5851_v25, %v5855_v26 }
  0x77   : > { %1485 = vmatpush.msrb.mxu3 %v5642_v55  ;;  %1748 = vmatpush.msrb.mxu0 %v1112_v0  ;;  %v4899_v33 = vsel %vm384_vm0, 1.0, %v9962_v30 }
  0x78   : > { %1903 = vmatpush.msrb.mxu1 %v5642_v55  ;;  %1304 = vmatpush.msrb.mxu2 %v5755_v4  ;;  %v5908_v48 = vsub.f32 %v4899_v33, %v4899_v33 }
  0x79   : > { %1487 = vmatpush.msrb.mxu3 %v5652_v61  ;;  %1752 = vmatpush.msrb.mxu0 %v1118_v9 }
  0x7a   : > { %1905 = vmatpush.msrb.mxu1 %v5652_v61  ;;  %1307 = vmatpush.msrb.mxu2 %v5770_v15  ;;  %v9953_v60 = vand.u32 4294901760, %v5908_v48 }
  0x7b   : > { %1489 = vmatpush.msrb.mxu3 %v5669_v3  ;;  %1756 = vmatpush.msrb.mxu0 %v1124_v32 }
  0x7c   : > { %1907 = vmatpush.msrb.mxu1 %v5669_v3  ;;  %1310 = vmatpush.msrb.mxu2 %v5777_v21 }
  0x7d   : > { %1491 = vmatpush.msrb.mxu3 %v5687_v13  ;;  %v5912_v49 = vpop.permute.xlu2 %343  ;;  %1760 = vmatpush.msrb.mxu0 %v1130_v42 }
  0x7e   : > { %1909 = vmatpush.msrb.mxu1 %v5687_v13  ;;  %v792_v13 = vsub.f32 %v5908_v48, %v9953_v60  ;;  %vm9933_vm5 = vcmp.eq.s32.totalorder %v5912_v49, %v5855_v26 }
  0x7f   : > { %1493 = vmatpush.msrb.mxu3 %v5697_v18  ;;  %v4953_v53 = vsel %vm9933_vm5, 1.0, %v9962_v30 }
  0x80   : > { %1911 = vmatpush.msrb.mxu1 %v5697_v18  ;;  %v793_v31 = vand.u32 4294901760, %v792_v13  ;;  %v6003_v0 = vsub.f32 %v4953_v53, %v4953_v53 }
  0x81   : > { %1495 = vmatpush.msrb.mxu3 %v5711_v27 }
  0x82   : > { %1913 = vmatpush.msrb.mxu1 %v5711_v27 }
  0x83   : > { %1497 = vmatpush.msrb.mxu3 %v5723_v38 }
  0x84   : > { %1915 = vmatpush.msrb.mxu1 %v5723_v38 }
  0x85   : > { %1499 = vmatpush.msrb.mxu3 %v5743_v57  ;;  %v5961_v19 = vpop.permute.xlu2 %295 }
  0x86   : > { %1917 = vmatpush.msrb.mxu1 %v5743_v57  ;;  %10252 = vst [vmem:[#allocation10_spill] sm:$0xff] %v5961_v19  ;;  %vm390_vm6 = vcmp.eq.s32.totalorder %v5961_v19, %v5855_v26 }
  0x87   : > { %1501 = vmatpush.msrb.mxu3 %v5757_v6  ;;  %v4905_v58 = vsel %vm390_vm6, 1.0, %v9962_v30 }
  0x88   : > { %1919 = vmatpush.msrb.mxu1 %v5757_v6  ;;  %v6005_v4 = vsub.f32 %v4905_v58, %v4905_v58 }
  0x89   : > { %1503 = vmatpush.msrb.mxu3 %v5767_v10 }
  0x8a   : > { %1921 = vmatpush.msrb.mxu1 %v5767_v10  ;;  %v9931_v10 = vand.u32 4294901760, %v6003_v0  ;;  %v9947_v14 = vand.u32 4294901760, %v6005_v4 }
  0x8c   : > { %v936_v22 = vsub.f32 %v6003_v0, %v9931_v10  ;;  %v808_v32 = vsub.f32 %v6005_v4, %v9947_v14 }
  0x8d   : > { %v5869_v28 = vpop.permute.xlu0 %334  ;;  %v6036_v21 = vpop.permute.xlu2 %352 }
  0x8e   : > { %10250 = vst [vmem:[#allocation8_spill] sm:$0xff] %v5869_v28  ;;  %v5874_v29 = vpop.permute.xlu1 %286  ;;  %vm9960_vm1 = vcmp.eq.s32.totalorder %v5869_v28, %v5855_v26  ;;  %v937_v44 = vand.u32 4294901760, %v936_v22  ;;  %v809_v46 = vand.u32 4294901760, %v808_v32  ;;  %vm9923_vm12 = vcmp.eq.s32.totalorder %v6036_v21, %v5855_v26 }
  0x8f   : > { %10251 = vst [vmem:[#allocation9_spill] sm:$0xff] %v5874_v29  ;;  %vm381_vm2 = vcmp.eq.s32.totalorder %v5874_v29, %v5855_v26  ;;  %5008 = vmatmul.msk.f32.vlgmr.msra.gmra.mxu3 %vm9960_vm1, %v9955_v34  ;;  %v4944_v35 = vsel %vm9960_vm1, 1.0, %v9962_v30 }
  0x90   : > { %4992 = vmatmul.msk.f32.vlgmr.msra.gmra.mxu1 %vm381_vm2, %v9955_v34  ;;  %v4896_v39 = vsel %vm381_vm2, 1.0, %v9962_v30  ;;  %v5903_v40 = vsub.f32 %v4944_v35, %v4944_v35  ;;  %10257 = vst [vmem:[#allocation15_spill] sm:$0xff] %v6036_v21 }
  0x91   : > { %v5906_v43 = vsub.f32 %v4896_v39, %v4896_v39 }
  0x92   : > { %v9937_v50 = vand.u32 4294901760, %v5903_v40 }
  0x93   : > { %v9954_v54 = vand.u32 4294901760, %v5906_v43 }
  0x94   : > { %v912_v55 = vsub.f32 %v5903_v40, %v9937_v50 }
  0x95   : > { %v5925_v56 = vpop.permute.xlu0 %337  ;;  %v784_v59 = vsub.f32 %v5906_v43, %v9954_v54 }
  0x96   : > { %v5931_v61 = vpop.permute.xlu1 %340  ;;  %vm9950_vm3 = vcmp.eq.s32.totalorder %v5925_v56, %v5855_v26  ;;  %v913_v1 = vand.u32 4294901760, %v912_v55 }
  0x97   : > { %5009 = vmatmul.msk.f32.gmra.mxu3 %vm9950_vm3, %v9955_v34  ;;  %v785_v2 = vand.u32 4294901760, %v784_v59  ;;  %vm9941_vm4 = vcmp.eq.s32.totalorder %v5931_v61, %v5855_v26  ;;  %v4947_v3 = vsel %vm9950_vm3, 1.0, %v9962_v30 }
  0x98   : > { %4993 = vmatmul.msk.f32.gmra.mxu1 %vm384_vm0, %v9955_v34  ;;  %914 = vmatmul.f32.vlgmr.msra.gmra.mxu2 %v913_v1  ;;  %v5949_v11 = vsub.f32 %v4947_v3, %v4947_v3  ;;  %v4950_v12 = vsel %vm9941_vm4, 1.0, %v9962_v30  ;;  %v6084_v1 = vpop.permute.xlu2 %304 }
  0x99   : > { %786 = vmatmul.f32.vlgmr.msra.gmra.mxu0 %v785_v2  ;;  %v5959_v18 = vsub.f32 %v4950_v12, %v4950_v12  ;;  %10260 = vst [vmem:[#allocation18_spill] sm:$0xff] %v6084_v1  ;;  %vm399_vm13 = vcmp.eq.s32.totalorder %v6084_v1, %v5855_v26 }
  0x9a   : > { %v9936_v17 = vand.u32 4294901760, %v5949_v11 }
  0x9b   : > { %v9935_v38 = vand.u32 4294901760, %v5959_v18 }
  0x9c   : > { %v920_v24 = vsub.f32 %v5949_v11, %v9936_v17 }
  0x9d   : > { %v5968_v27 = vpop.permute.xlu0 %292  ;;  %v928_v63 = vsub.f32 %v5959_v18, %v9935_v38 }
  0x9e   : > { %10253 = vst [vmem:[#allocation11_spill] sm:$0xff] %v5968_v27  ;;  %v5972_v36 = vpop.permute.xlu1 %346  ;;  %vm387_vm7 = vcmp.eq.s32.totalorder %v5968_v27, %v5855_v26  ;;  %v921_v37 = vand.u32 4294901760, %v920_v24  ;;  %v4962_v24 = vsel %vm9923_vm12, 1.0, %v9962_v30 }
  0x9f   : > { %10254 = vst [vmem:[#allocation12_spill] sm:$0xff] %v5972_v36  ;;  %5010 = vmatmul.msk.f32.gmra.mxu3 %vm9941_vm4, %v9955_v34  ;;  %v4902_v52 = vsel %vm387_vm7, 1.0, %v9962_v30  ;;  %vm9926_vm8 = vcmp.eq.s32.totalorder %v5972_v36, %v5855_v26  ;;  %v929_v9 = vand.u32 4294901760, %v928_v63  ;;  %v6115_v58 = vsub.f32 %v4962_v24, %v4962_v24 }
  0xa0   : > { %4994 = vmatmul.msk.f32.gmra.mxu1 %vm387_vm7, %v9955_v34  ;;  %922 = vmatmul.f32.gmra.mxu2 %v921_v37  ;;  %v5993_v57 = vsub.f32 %v4902_v52, %v4902_v52  ;;  %v4956_v15 = vsel %vm9926_vm8, 1.0, %v9962_v30  ;;  %v4914_v37 = vsel %vm399_vm13, 1.0, %v9962_v30  ;;  %v6136_v32 = vpop.permute.xlu2 %361 }
  0xa1   : > { %794 = vmatmul.f32.gmra.mxu0 %v793_v31  ;;  %v6041_v23 = vsub.f32 %v4956_v15, %v4956_v15  ;;  %10263 = vst [vmem:[#allocation21_spill] sm:$0xff] %v6136_v32 }
  0xa2   : > { %v9948_v62 = vand.u32 4294901760, %v5993_v57  ;;  %v10302_v29 = vand.u32 4294901760, %v5993_v57 }
  0xa3   : > { %v9930_v45 = vand.u32 4294901760, %v6041_v23 }
  0xa4   : > { %v800_v5 = vsub.f32 %v5993_v57, %v9948_v62 }
  0xa5   : > { %v6012_v6 = vpop.permute.xlu0 %349  ;;  %v944_v35 = vsub.f32 %v6041_v23, %v9930_v45 }
  0xa6   : > { %10255 = vst [vmem:[#allocation13_spill] sm:$0xff] %v6012_v6  ;;  %v6014_v7 = vpop.permute.xlu1 %298  ;;  %v801_v8 = vand.u32 4294901760, %v800_v5  ;;  %vm9924_vm10 = vcmp.eq.s32.totalorder %v6012_v6, %v5855_v26  ;;  %v6120_v5 = vsub.f32 %v4914_v37, %v4914_v37 }
  0xa7   : > { %10256 = vst [vmem:[#allocation14_spill] sm:$0xff] %v6014_v7  ;;  %5011 = vmatmul.msk.f32.gmra.mxu3 %vm9933_vm5, %v9955_v34  ;;  %vm393_vm9 = vcmp.eq.s32.totalorder %v6014_v7, %v5855_v26  ;;  %v4959_v51 = vsel %vm9924_vm10, 1.0, %v9962_v30  ;;  %v945_v2 = vand.u32 4294901760, %v944_v35 }
  0xa8   : > { %4995 = vmatmul.msk.f32.gmra.mxu1 %vm390_vm6, %v9955_v34  ;;  %930 = vmatmul.f32.gmra.mxu2 %v929_v9  ;;  %v4908_v16 = vsel %vm393_vm9, 1.0, %v9962_v30  ;;  %v6077_v39 = vsub.f32 %v4959_v51, %v4959_v51  ;;  %v9928_v9 = vand.u32 4294901760, %v6115_v58  ;;  %v10314_v7 = vand.u32 4294901760, %v6120_v5 }
  0xa9   : > { %802 = vmatmul.f32.gmra.mxu0 %v801_v8  ;;  %v6046_v41 = vsub.f32 %v4908_v16, %v4908_v16  ;;  %v9943_v16 = vand.u32 4294901760, %v6120_v5 }
  0xaa   : > { %v9929_v3 = vand.u32 4294901760, %v6077_v39  ;;  %v960_v51 = vsub.f32 %v6115_v58, %v9928_v9 }
  0xab   : > { %v9946_v47 = vand.u32 4294901760, %v6046_v41  ;;  %v832_v35 = vsub.f32 %v6120_v5, %v9943_v16  ;;  %v10308_v27 = vand.u32 4294901760, %v6046_v41 }
  0xac   : > { %v952_v53 = vsub.f32 %v6077_v39, %v9929_v3 }
  0xad   : > { %v6050_v42 = vpop.permute.xlu0 %301  ;;  %v816_v55 = vsub.f32 %v6046_v41, %v9946_v47  ;;  %v833_v24 = vand.u32 4294901760, %v832_v35 }
  0xae   : > { %10258 = vst [vmem:[#allocation16_spill] sm:$0xff] %v6050_v42  ;;  %vm396_vm11 = vcmp.eq.s32.totalorder %v6050_v42, %v5855_v26  ;;  %v6064_v20 = vpop.permute.xlu1 %355  ;;  %v953_v8 = vand.u32 4294901760, %v952_v53 }
  0xaf   : > { %5012 = vmatmul.msk.f32.gmra.mxu3 %vm9926_vm8, %v9955_v34  ;;  %10259 = vst [vmem:[#allocation17_spill] sm:$0xff] %v6064_v20  ;;  %v4911_v33 = vsel %vm396_vm11, 1.0, %v9962_v30  ;;  %v817_v12 = vand.u32 4294901760, %v816_v55  ;;  %vm9925_vm14 = vcmp.eq.s32.totalorder %v6064_v20, %v5855_v26  ;;  %vm9940_vm8 = vcmp.eq.s32.totalorder %v6136_v32, %v5855_v26 }
  0xb0   : > { %4996 = vmatmul.msk.f32.gmra.mxu1 %vm393_vm9, %v9955_v34  ;;  %938 = vmatmul.f32.gmra.mxu2 %v937_v44  ;;  %v6082_v59 = vsub.f32 %v4911_v33, %v4911_v33  ;;  %v4965_v22 = vsel %vm9925_vm14, 1.0, %v9962_v30 }
  0xb1   : > { %810 = vmatmul.f32.gmra.mxu0 %v809_v46  ;;  %v6151_v33 = vsub.f32 %v4965_v22, %v4965_v22 }
  0xb2   : > { %v9945_v13 = vand.u32 4294901760, %v6082_v59 }
  0xb4   : > { %v824_v63 = vsub.f32 %v6082_v59, %v9945_v13 }
  0xb5   : > { %v6100_v31 = vpop.permute.xlu0 %358 }
  0xb6   : > { %10261 = vst [vmem:[#allocation19_spill] sm:$0xff] %v6100_v31  ;;  %v6110_v52 = vpop.permute.xlu1 %307  ;;  %v825_v15 = vand.u32 4294901760, %v824_v63 }
  0xb7   : > { %5013 = vmatmul.msk.f32.gmra.mxu3 %vm9924_vm10, %v9955_v34  ;;  %10262 = vst [vmem:[#allocation20_spill] sm:$0xff] %v6110_v52  ;;  %vm402_vm15 = vcmp.eq.s32.totalorder %v6110_v52, %v5855_v26 }
  0xb8   : > { %4997 = vmatmul.msk.f32.gmra.mxu1 %vm396_vm11, %v9955_v34  ;;  %946 = vmatmul.f32.gmra.mxu2 %v945_v2  ;;  %v4917_v44 = vsel %vm402_vm15, 1.0, %v9962_v30  ;;  %v961_v2 = vand.u32 4294901760, %v960_v51 }
  0xb9   : > { %818 = vmatmul.f32.gmra.mxu0 %v817_v12  ;;  %v6156_v55 = vsub.f32 %v4917_v44, %v4917_v44  ;;  %v9927_v12 = vand.u32 4294901760, %v6151_v33 }
  0xbb   : > { %v9939_v37 = vand.u32 4294901760, %v6156_v55  ;;  %v968_v22 = vsub.f32 %v6151_v33, %v9927_v12 }
  0xbd   : > { %v6146_v46 = vpop.permute.xlu0 %310  ;;  %v840_v51 = vsub.f32 %v6156_v55, %v9939_v37 }
  0xbe   : > { %10264 = vst [vmem:[#allocation22_spill] sm:$0xff] %v6146_v46  ;;  %vm405_vm10 = vcmp.eq.s32.totalorder %v6146_v46, %v5855_v26  ;;  %v6172_v63 = vpop.permute.xlu1 %364 }
  0xbf   : > { %5014 = vmatmul.msk.f32.gmra.mxu3 %vm9923_vm12, %v9955_v34  ;;  %vm9932_vm12 = vcmp.eq.s32.totalorder %v6100_v31, %v5855_v26  ;;  %10265 = vst [vmem:[#allocation23_spill] sm:$0xff] %v6172_v63  ;;  %vm9949_vm5 = vcmp.eq.s32.totalorder %v6172_v63, %v5855_v26 }
  0xc0   : > { %4998 = vmatmul.msk.f32.gmra.mxu1 %vm399_vm13, %v9955_v34  ;;  %954 = vmatmul.f32.gmra.mxu2 %v953_v8  ;;  %v4968_v53 = vsel %vm9932_vm12, 1.0, %v9962_v30  ;;  %v4920_v8 = vsel %vm405_vm10, 1.0, %v9962_v30 }
  0xc1   : > { %826 = vmatmul.f32.gmra.mxu0 %v825_v15  ;;  %v6182_v15 = vpop.permute.xlu2 %313  ;;  %v6187_v44 = vsub.f32 %v4968_v53, %v4968_v53  ;;  %v6192_v35 = vsub.f32 %v4920_v8, %v4920_v8  ;;  %v841_v53 = vand.u32 4294901760, %v840_v51 }
  0xc2   : > { %10266 = vst [vmem:[#allocation24_spill] sm:$0xff] %v6182_v15 }
  0xc3   : > { %10267 = vst [vmem:[#allocation25_spill] sm:$0xff] %v6187_v44  ;;  %v9938_v12 = vand.u32 4294901760, %v6192_v35  ;;  %v10320_v1 = vand.u32 4294901760, %v6192_v35 }
  0xc5   : > { %v6204_v9 = vpop.permute.xlu0 %367 }
  0xc6   : > { %10268 = vst [vmem:[#allocation26_spill] sm:$0xff] %v6204_v9  ;;  %v6218_v51 = vpop.permute.xlu1 %316  ;;  %vm9959_vm4 = vcmp.eq.s32.totalorder %v6204_v9, %v5855_v26 }
  0xc7   : > { %5015 = vmatmul.msk.f32.gmra.mxu3 %vm9925_vm14, %v9955_v34  ;;  %vm408_vm14 = vcmp.eq.s32.totalorder %v6182_v15, %v5855_v26  ;;  %10269 = vst [vmem:[#allocation27_spill] sm:$0xff] %v6218_v51 }
  0xc8   : > { %4999 = vmatmul.msk.f32.gmra.mxu1 %vm402_vm15, %v9955_v34  ;;  %962 = vmatmul.f32.gmra.mxu2 %v961_v2  ;;  %v969_v2 = vand.u32 4294901760, %v968_v22  ;;  %v4923_v8 = vsel %vm408_vm14, 1.0, %v9962_v30  ;;  %v4971_v22 = vsel %vm9940_vm8, 1.0, %v9962_v30 }
  0xc9   : > { %834 = vmatmul.f32.gmra.mxu0 %v833_v24  ;;  %v9934_v24 = vand.u32 4294901760, %v6187_v44  ;;  %v6226_v45 = vsub.f32 %v4923_v8, %v4923_v8  ;;  %v6228_v10 = vsub.f32 %v4971_v22, %v4971_v22  ;;  %v6240_v17 = vpop.permute.xlu2 %370  ;;  %v4974_v22 = vsel %vm9949_vm5, 1.0, %v9962_v30 }
  0xca   : > { %10271 = vst [vmem:[#allocation29_spill] sm:$0xff] %v6240_v17  ;;  %v6264_v37 = vsub.f32 %v4974_v22, %v4974_v22  ;;  %vm9973_vm3 = vcmp.eq.s32.totalorder %v6240_v17, %v5855_v26 }
  0xcb   : > { %v976_v3 = vsub.f32 %v6187_v44, %v9934_v24  ;;  %10270 = vst [vmem:[#allocation28_spill] sm:$0xff] %v6228_v10  ;;  %v9942_v38 = vand.u32 4294901760, %v6226_v45  ;;  %v9944_v8 = vand.u32 4294901760, %v6228_v10 }
  0xcc   : > { %10273 = vst [vmem:[#allocation31_spill] sm:$0xff] %v6264_v37 }
  0xcd   : > { %v856_v50 = vsub.f32 %v6226_v45, %v9942_v38 }
  0xcf   : > { %5016 = vmatmul.msk.f32.gmra.mxu3 %vm9932_vm12, %v9955_v34  ;;  %vm411_vm12 = vcmp.eq.s32.totalorder %v6218_v51, %v5855_v26 }
  0xd0   : > { %5000 = vmatmul.msk.f32.gmra.mxu1 %vm405_vm10, %v9955_v34  ;;  %970 = vmatmul.f32.gmra.mxu2 %v969_v2  ;;  %v848_v2 = vsub.f32 %v6192_v35, %v9938_v12 }
  0xd1   : > { %842 = vmatmul.f32.gmra.mxu0 %v841_v53  ;;  %v977_v53 = vand.u32 4294901760, %v976_v3  ;;  %v4926_v3 = vsel %vm411_vm12, 1.0, %v9962_v30 }
  0xd2   : > { %v849_v24 = vand.u32 4294901760, %v848_v2  ;;  %v6254_v2 = vpop.permute.xlu0 %319  ;;  %v6262_v12 = vsub.f32 %v4926_v3, %v4926_v3  ;;  %v9952_v3 = vand.u32 4294901760, %v6264_v37 }
  0xd3   : > { %10272 = vst [vmem:[#allocation30_spill] sm:$0xff] %v6254_v2 }
  0xd4   : > { %v9951_v16 = vand.u32 4294901760, %v6262_v12  ;;  %v992_v47 = vsub.f32 %v6264_v37, %v9952_v3  ;;  %v10325_v46 = vand.u32 4294901760, %v6262_v12 }
  0xd6   : > { %v864_v13 = vsub.f32 %v6262_v12, %v9951_v16 }
  0xd7   : > { %5017 = vmatmul.msk.f32.gmra.mxu3 %vm9940_vm8, %v9955_v34  ;;  %vm414_vm8 = vcmp.eq.s32.totalorder %v6254_v2, %v5855_v26 }
  0xd8   : > { %5001 = vmatmul.msk.f32.gmra.mxu1 %vm408_vm14, %v9955_v34  ;;  %978 = vmatmul.f32.gmra.mxu2 %v977_v53  ;;  %v984_v53 = vsub.f32 %v6228_v10, %v9944_v8  ;;  %v6276_v8 = vpop.permute.xlu1 %373  ;;  %v4929_v22 = vsel %vm414_vm8, 1.0, %v9962_v30 }
  0xd9   : > { %850 = vmatmul.f32.gmra.mxu0 %v849_v24  ;;  %v857_v24 = vand.u32 4294901760, %v856_v50  ;;  %10274 = vst [vmem:[#allocation32_spill] sm:$0xff] %v6276_v8  ;;  %v4977_v50 = vsel %vm9959_vm4, 1.0, %v9962_v30  ;;  %v6298_v14 = vsub.f32 %v4929_v22, %v4929_v22  ;;  %vm9986_vm1 = vcmp.eq.s32.totalorder %v6276_v8, %v5855_v26 }
  0xda   : > { %v985_v38 = vand.u32 4294901760, %v984_v53  ;;  %v6290_v53 = vpop.permute.xlu2 %322  ;;  %v6300_v62 = vsub.f32 %v4977_v50, %v4977_v50  ;;  %v6312_v3 = vpop.permute.xlu0 %376 }
  0xdb   : > { %10275 = vst [vmem:[#allocation33_spill] sm:$0xff] %v6290_v53  ;;  %v9961_v16 = vand.u32 4294901760, %v6298_v14 }
  0xdc   : > { %10276 = vst [vmem:[#allocation34_spill] sm:$0xff] %v6300_v62  ;;  %v9964_v22 = vand.u32 4294901760, %v6300_v62 }
  0xdd   : > { %10277 = vst [vmem:[#allocation35_spill] sm:$0xff] %v6312_v3  ;;  %v872_v60 = vsub.f32 %v6298_v14, %v9961_v16 }
  0xde   : > { %v1000_v54 = vsub.f32 %v6300_v62, %v9964_v22 }
  0xdf   : > { %5018 = vmatmul.msk.f32.gmra.mxu3 %vm9949_vm5, %v9955_v34  ;;  %vm9974_vm5 = vcmp.eq.s32.totalorder %v6290_v53, %v5855_v26 }
  0xe0   : > { %5002 = vmatmul.msk.f32.gmra.mxu1 %vm411_vm12, %v9955_v34  ;;  %986 = vmatmul.f32.gmra.mxu2 %v985_v38  ;;  %v865_v38 = vand.u32 4294901760, %v864_v13  ;;  %v4932_v50 = vsel %vm9974_vm5, 1.0, %v9962_v30  ;;  %v6326_v13 = vpop.permute.xlu1 %325  ;;  %v1001_v16 = vand.u32 4294901760, %v1000_v54 }
  0xe1   : > { %858 = vmatmul.f32.gmra.mxu0 %v857_v24  ;;  %v993_v24 = vand.u32 4294901760, %v992_v47  ;;  %v4980_v47 = vsel %vm9973_vm3, 1.0, %v9962_v30  ;;  %10278 = vst [vmem:[#allocation36_spill] sm:$0xff] %v6326_v13 }
  0xe2   : > { %v6336_v9 = vsub.f32 %v4980_v47, %v4980_v47  ;;  %v10281_v47 = vmov 0.0   ;;  %v6360_v54 = vpop.permute.xlu0 %328 }
  0xe3   : > { %10282 = vst [vmem:[#allocation38_spill] sm:$0xff] %v6360_v54 }
  0xe4   : > { %10279 = vst [vmem:[#allocation37_spill] sm:$0xff] %v6336_v9  ;;  %v10283_v17 = vand.u32 4294901760, %v6336_v9 }
  0xe6   : > { %v1008_v62 = vsub.f32 %v6336_v9, %v10283_v17 }
  0xe7   : > { %5019 = vmatmul.msk.f32.gmra.mxu3 %vm9959_vm4, %v9955_v34  ;;  %vm9987_vm4 = vcmp.eq.s32.totalorder %v6326_v13, %v5855_v26 }
  0xe8   : > { %5003 = vmatmul.msk.f32.gmra.mxu1 %vm414_vm8, %v9955_v34  ;;  %994 = vmatmul.f32.gmra.mxu2 %v993_v24  ;;  %v6334_v34 = vsub.f32 %v4932_v50, %v4932_v50  ;;  %v873_v24 = vand.u32 4294901760, %v872_v60  ;;  %v4935_v22 = vsel %vm9987_vm4, 1.0, %v10281_v47  ;;  %v4983_v60 = vsel %vm9986_vm1, 1.0, %v10281_v47  ;;  %v6399_v17 = vpop.permute.xlu1 %331 }
  0xe9   : > { %866 = vmatmul.f32.gmra.mxu0 %v865_v38  ;;  %v10280_v38 = vmov 1.0   ;;  %v6368_v63 = vsub.f32 %v4935_v22, %v4935_v22  ;;  %v6370_v37 = vsub.f32 %v4983_v60, %v4983_v60  ;;  %v6397_v60 = vpop.permute.xlu2 %379  ;;  %10286 = vst [vmem:[#allocation41_spill] sm:$0xff] %v6399_v17 }
  0xea   : > { %v9975_v30 = vand.u32 4294901760, %v6334_v34  ;;  %10285 = vst [vmem:[#allocation40_spill] sm:$0xff] %v6397_v60  ;;  %v10331_v51 = vand.u32 4294901760, %v6334_v34 }
  0xeb   : > { %10284 = vst [vmem:[#allocation39_spill] sm:$0xff] %v6370_v37  ;;  %v10288_v9 = vand.u32 4294901760, %v6368_v63  ;;  %v10289_v10 = vand.u32 4294901760, %v6370_v37 }
  0xec   : > { %v880_v50 = vsub.f32 %v6334_v34, %v9975_v30 }
  0xed   : > { %v888_v32 = vsub.f32 %v6368_v63, %v10288_v9 }
  0xef   : > { %5020 = vmatmul.msk.f32.gmra.mxu3 %vm9973_vm3, %v10280_v38  ;;  %vm423_vm3 = vcmp.eq.s32.totalorder %v6360_v54, %v5855_v26  ;;  %v10349_v54 = vand.u32 4294901760, %v5903_v40 }
  0xf0   : > { %5004 = vmatmul.msk.f32.gmra.mxu1 %vm9974_vm5, %v10280_v38  ;;  %1002 = vmatmul.f32.gmra.mxu2 %v1001_v16  ;;  %vm471_vm5 = vcmp.eq.s32.totalorder %v6312_v3, %v5855_v26  ;;  %v881_v16 = vand.u32 4294901760, %v880_v50  ;;  %v4938_v22 = vsel %vm423_vm3, 1.0, %v10281_v47 }
  0xf1   : > { %874 = vmatmul.f32.gmra.mxu0 %v873_v24  ;;  %v1009_v24 = vand.u32 4294901760, %v1008_v62  ;;  %v4986_v50 = vsel %vm471_vm5, 1.0, %v10281_v47  ;;  %v732_v62 = vld [vmem:[%s9921_s1 + $0xf8] sm:$0xff]  ;;  %v6403_v8 = vsub.f32 %v4938_v22, %v4938_v22 }
  0xf2   : > { %v6401_v30 = vand.u32 4294901760, %v732_v62 }
  0xf4   : > { %10287 = vst [vmem:[#allocation42_spill] sm:$0xff] %v6401_v30  ;;  %2052 = vmatpush.msra.mxu2 %v6401_v30  ;;  %v6415_v31 = vsub.f32 %v732_v62, %v6401_v30  ;;  %2775 = vmatpush.msra.mxu1 %v6401_v30  ;;  %v10293_v30 = vand.u32 4294901760, %v6403_v8 }
  0xf6   : > { %2567 = vmatpush.msra.mxu0 %v6415_v31 }
  0xf7   : > { %5021 = vmatmul.msk.f32.gmra.mxu3 %vm9986_vm1, %v10280_v38  ;;  %vm474_vm1 = vcmp.eq.s32.totalorder %v6397_v60, %v5855_v26 }
  0xf8   : > { %5005 = vmatmul.msk.f32.gmra.mxu1 %vm9987_vm4, %v10280_v38  ;;  %1010 = vmatmul.f32.gmra.mxu2 %v1009_v24  ;;  %v6411_v24 = vsub.f32 %v4986_v50, %v4986_v50  ;;  %vm426_vm4 = vcmp.eq.s32.totalorder %v6399_v17, %v5855_v26 }
  0xf9   : > { %882 = vmatmul.f32.gmra.mxu0 %v881_v16  ;;  %v1016_v16 = vsub.f32 %v6370_v37, %v10289_v10  ;;  %v889_v10 = vand.u32 4294901760, %v888_v32  ;;  %v4989_v37 = vsel %vm474_vm1, 1.0, %v10281_v47  ;;  %v4941_v9 = vsel %vm426_vm4, 1.0, %v10281_v47 }
  0xfa   : > { %10290 = vst [vmem:[#allocation43_spill] sm:$0xff] %v6411_v24  ;;  %v10291_v32 = vand.u32 4294901760, %v6415_v31  ;;  %v6445_v50 = vsub.f32 %v4989_v37, %v4989_v37  ;;  %v6447_v3 = vsub.f32 %v4941_v9, %v4941_v9  ;;  %v896_v47 = vsub.f32 %v6403_v8, %v10293_v30  ;;  %v731_v30 = vld [vmem:[%s9921_s1 + $0xf0] sm:$0xff] }
  0xfb   : > { %v1017_v22 = vand.u32 4294901760, %v1016_v16  ;;  %v10294_v44 = vand.u32 4294901760, %v6411_v24 }
  0xfc   : > { %v2343_v16 = vsub.f32 %v6415_v31, %v10291_v32  ;;  %10292 = vst [vmem:[#allocation44_spill] sm:$0xff] %v6445_v50  ;;  %v9998_v37 = vand.u32 4294901760, %v6447_v3  ;;  %v9999_v9 = vand.u32 4294901760, %v6445_v50 }
  0xfd   : > { %v1024_v20 = vsub.f32 %v6411_v24, %v10294_v44  ;;  %v6468_v44 = vand.u32 4294901760, %v731_v30 }
  0xfe   : > { %v2344_v62 = vand.u32 4294901760, %v2343_v16 }
  0xff   : > { %5022 = vmatmul.msk.f32.gmra.mxu3 %vm471_vm5, %v10280_v38  ;;  %10295 = vst [vmem:[#allocation45_spill] sm:$0xff] %v6468_v44  ;;  %2054 = vmatpush.msra.mxu2 %v6468_v44 }
 0x100   : > { %5006 = vmatmul.msk.f32.gmra.mxu1 %vm423_vm3, %v10280_v38  ;;  %1018 = vmatmul.f32.gmra.mxu2 %v1017_v22  ;;  %v1025_v22 = vand.u32 4294901760, %v1024_v20  ;;  %v904_v20 = vsub.f32 %v6447_v3, %v9998_v37 }
 0x101   : > { %890 = vmatmul.f32.gmra.mxu0 %v889_v10  ;;  %2345 = vmatpush.msra.mxu3 %v2344_v62  ;;  %v897_v10 = vand.u32 4294901760, %v896_v47  ;;  %v1032_v47 = vsub.f32 %v6445_v50, %v9999_v9  ;;  %v6478_v62 = vsub.f32 %v731_v30, %v6468_v44 }
 0x102   : > { %2777 = vmatpush.msra.mxu1 %v6468_v44 }
 0x103   : > { %10296 = vst [vmem:[#allocation46_spill] sm:$0xff] %v6478_v62  ;;  %v10006_v16 = vand.u32 4294901760, %v6478_v62  ;;  %2570 = vmatpush.msra.mxu0 %v6478_v62  ;;  %v1033_v37 = vand.u32 4294901760, %v1032_v47 }
 0x105   : > { %v2349_v30 = vsub.f32 %v6478_v62, %v10006_v16  ;;  %v10304_v62 = vand.u32 4294901760, %v6005_v4 }
 0x107   : > { %5023 = vmatmul.msk.f32.gmra.mxu3 %vm474_vm1, %v10280_v38  ;;  %v2350_v60 = vand.u32 4294901760, %v2349_v30 }
 0x108   : > { %5007 = vmatmul.msk.f32.gmra.mxu1 %vm426_vm4, %v10280_v38  ;;  %1026 = vmatmul.f32.gmra.mxu2 %v1025_v22  ;;  %v905_v22 = vand.u32 4294901760, %v904_v20  ;;  %v10298_v20 = vand.u32 4294901760, %v5908_v48 }
 0x109   : > { %898 = vmatmul.f32.gmra.mxu0 %v897_v10  ;;  %v10297_v10 = vand.u32 4294901760, %v5906_v43  ;;  %2351 = vmatpush.msra.mxu3 %v2350_v60  ;;  %v730_v60 = vld [vmem:[%s9921_s1 + $0xe8] sm:$0xff] }
 0x10a   : > { %v6512_v47 = vand.u32 4294901760, %v730_v60 }
 0x10c   : > { %10299 = vst [vmem:[#allocation47_spill] sm:$0xff] %v6512_v47  ;;  %2056 = vmatpush.msra.mxu2 %v6512_v47  ;;  %v6518_v30 = vsub.f32 %v730_v60, %v6512_v47  ;;  %2779 = vmatpush.msra.mxu1 %v6512_v47 }
 0x10d   : > { %v6481_v32 = vpop.f32.mrf.mxu1 }
 0x10e   : > { %10301 = vst [vmem:[#allocation49_spill] sm:$0xff] %v6518_v30  ;;  %v10012_v16 = vand.u32 4294901760, %v6518_v30  ;;  %2573 = vmatpush.msra.mxu0 %v6518_v30 }
 0x10f   : > { %1507 = vmatmul.f32.vlgmr.msrb.gmra.mxu3 %v10297_v10 }
 0x110   : > { %5056 = vmatmul.msk.f32.vlgmr.msrb.gmra.mxu1 %vm381_vm2, %v10280_v38  ;;  %1034 = vmatmul.f32.gmra.mxu2 %v1033_v37 }
 0x111   : > { %906 = vmatmul.f32.gmra.mxu0 %v905_v22 }
 0x112   : > { %v1200_v9 = vpop.f32.mrf.mxu3 }
 0x115   : > { %v6494_v50 = vpop.f32.mrf.mxu1 }
 0x116   : > { %v6496_v24 = vpop.f32.mrf.mxu0 }
 0x117   : > { %1513 = vmatmul.f32.gmra.mxu3 %v10298_v20 }
 0x118   : > { %5057 = vmatmul.msk.f32.gmra.mxu1 %vm384_vm0, %v10280_v38  ;;  %1313 = vmatmul.f32.vlgmr.msrb.gmra.mxu2 %v5906_v43 }
 0x119   : > { %5024 = vmatmul.msk.f32.vlgmr.msrb.gmra.mxu0 %vm381_vm2, %v10280_v38  ;;  %vm10335_vm2 = vcmp.eq.s32.totalorder %v6326_v13, %v5855_v26 }
 0x11a   : > { %v1204_v37 = vpop.f32.mrf.mxu3 }
 0x11b   : > { %v915_v10 = vpop.f32.mrf.mxu2 }
 0x11c   : > { %v6514_v22 = vadd.f32 %v1200_v9, %v915_v10  ;;  %v2355_v9 = vsub.f32 %v6518_v30, %v10012_v16  ;;  %v10310_v30 = vand.u32 4294901760, %v6082_v59 }
 0x11d   : > { %v6521_v43 = vpop.f32.mrf.mxu1 }
 0x11e   : > { %10300 = vst [vmem:[#allocation48_spill] sm:$0xff] %v6514_v22  ;;  %v6523_v20 = vpop.f32.mrf.mxu0  ;;  %v2356_v10 = vand.u32 4294901760, %v2355_v9 }
 0x11f   : > { %1519 = vmatmul.f32.gmra.mxu3 %v10302_v29 }
 0x120   : > { %5058 = vmatmul.msk.f32.gmra.mxu1 %vm387_vm7, %v10280_v38  ;;  %1318 = vmatmul.f32.gmra.mxu2 %v5908_v48  ;;  %v729_v48 = vld [vmem:[%s9921_s1 + $0xe0] sm:$0xff] }
 0x121   : > { %5025 = vmatmul.msk.f32.gmra.mxu0 %vm384_vm0, %v10280_v38  ;;  %2357 = vmatpush.msra.mxu3 %v2356_v10  ;;  %vm10332_vm0 = vcmp.eq.s32.totalorder %v6290_v53, %v5855_v26  ;;  %v10340_v53 = vand.u32 4294901760, %v6403_v8 }
 0x122   : > { %v1208_v60 = vpop.f32.mrf.mxu3 }
 0x123   : > { %v923_v22 = vpop.f32.mrf.mxu2 }
 0x124   : > { %v6541_v29 = vadd.f32 %v1204_v37, %v923_v22  ;;  %v6561_v22 = vand.u32 4294901760, %v729_v48 }
 0x125   : > { %v6543_v47 = vpop.f32.mrf.mxu1 }
 0x126   : > { %10303 = vst [vmem:[#allocation50_spill] sm:$0xff] %v6541_v29  ;;  %v6545_v44 = vpop.f32.mrf.mxu0  ;;  %2058 = vmatpush.msra.mxu2 %v6561_v22  ;;  %v6567_v10 = vsub.f32 %v729_v48, %v6561_v22  ;;  %2781 = vmatpush.msra.mxu1 %v6561_v22 }
 0x127   : > { %1525 = vmatmul.f32.gmra.mxu3 %v10304_v62  ;;  %10305 = vst [vmem:[#allocation51_spill] sm:$0xff] %v6561_v22 }
 0x128   : > { %5059 = vmatmul.msk.f32.gmra.mxu1 %vm390_vm6, %v10280_v38  ;;  %1323 = vmatmul.f32.gmra.mxu2 %v5993_v57  ;;  %10307 = vst [vmem:[#allocation53_spill] sm:$0xff] %v6567_v10  ;;  %v10019_v29 = vand.u32 4294901760, %v6567_v10 }
 0x129   : > { %5026 = vmatmul.msk.f32.gmra.mxu0 %vm387_vm7, %v10280_v38  ;;  %vm10341_vm7 = vmmov %vm10335_vm2 }
 0x12a   : > { %v1212_v37 = vpop.f32.mrf.mxu3  ;;  %2576 = vmatpush.msra.mxu0 %v6567_v10 }
 0x12b   : > { %v931_v62 = vpop.f32.mrf.mxu2 }
 0x12c   : > { %v6563_v9 = vadd.f32 %v1208_v60, %v931_v62  ;;  %v2361_v60 = vsub.f32 %v6567_v10, %v10019_v29  ;;  %v10316_v10 = vand.u32 4294901760, %v6156_v55 }
 0x12d   : > { %v6570_v57 = vpop.f32.mrf.mxu1 }
 0x12e   : > { %10306 = vst [vmem:[#allocation52_spill] sm:$0xff] %v6563_v9  ;;  %v6572_v16 = vpop.f32.mrf.mxu0  ;;  %v2362_v62 = vand.u32 4294901760, %v2361_v60 }
 0x12f   : > { %1531 = vmatmul.f32.gmra.mxu3 %v10308_v27 }
 0x130   : > { %5060 = vmatmul.msk.f32.gmra.mxu1 %vm393_vm9, %v10280_v38  ;;  %1328 = vmatmul.f32.gmra.mxu2 %v6005_v4  ;;  %v728_v4 = vld [vmem:[%s9921_s1 + $0xd8] sm:$0xff] }
 0x131   : > { %5027 = vmatmul.msk.f32.gmra.mxu0 %vm390_vm6, %v10280_v38  ;;  %2363 = vmatpush.msra.mxu3 %v2362_v62  ;;  %vm10336_vm6 = vmmov %vm10332_vm0 }
 0x132   : > { %v1216_v48 = vpop.f32.mrf.mxu3 }
 0x133   : > { %v939_v9 = vpop.f32.mrf.mxu2 }
 0x134   : > { %v6590_v27 = vadd.f32 %v1212_v37, %v939_v9  ;;  %v6610_v9 = vand.u32 4294901760, %v728_v4 }
 0x135   : > { %v6592_v25 = vpop.f32.mrf.mxu1 }
 0x136   : > { %10309 = vst [vmem:[#allocation54_spill] sm:$0xff] %v6590_v27  ;;  %v6594_v22 = vpop.f32.mrf.mxu0  ;;  %2060 = vmatpush.msra.mxu2 %v6610_v9  ;;  %v6616_v62 = vsub.f32 %v728_v4, %v6610_v9  ;;  %2783 = vmatpush.msra.mxu1 %v6610_v9 }
 0x137   : > { %1537 = vmatmul.f32.gmra.mxu3 %v10310_v30  ;;  %10311 = vst [vmem:[#allocation55_spill] sm:$0xff] %v6610_v9 }
 0x138   : > { %5061 = vmatmul.msk.f32.gmra.mxu1 %vm396_vm11, %v10280_v38  ;;  %1333 = vmatmul.f32.gmra.mxu2 %v6046_v41  ;;  %10313 = vst [vmem:[#allocation57_spill] sm:$0xff] %v6616_v62  ;;  %v10026_v27 = vand.u32 4294901760, %v6616_v62 }
 0x139   : > { %5028 = vmatmul.msk.f32.gmra.mxu0 %vm393_vm9, %v10280_v38  ;;  %vm10357_vm9 = vcmp.eq.s32.totalorder %v5931_v61, %v5855_v26 }
 0x13a   : > { %v1220_v37 = vpop.f32.mrf.mxu3  ;;  %2579 = vmatpush.msra.mxu0 %v6616_v62 }
 0x13b   : > { %v947_v30 = vpop.f32.mrf.mxu2 }
 0x13c   : > { %v6612_v60 = vadd.f32 %v1216_v48, %v947_v30  ;;  %v2367_v48 = vsub.f32 %v6616_v62, %v10026_v27  ;;  %v10322_v62 = vand.u32 4294901760, %v6226_v45 }
 0x13d   : > { %v6619_v41 = vpop.f32.mrf.mxu1 }
 0x13e   : > { %10312 = vst [vmem:[#allocation56_spill] sm:$0xff] %v6612_v60  ;;  %v6621_v29 = vpop.f32.mrf.mxu0  ;;  %v2368_v30 = vand.u32 4294901760, %v2367_v48 }
 0x13f   : > { %1543 = vmatmul.f32.gmra.mxu3 %v10314_v7 }
 0x140   : > { %5062 = vmatmul.msk.f32.gmra.mxu1 %vm399_vm13, %v10280_v38  ;;  %1338 = vmatmul.f32.gmra.mxu2 %v6082_v59  ;;  %v727_v59 = vld [vmem:[%s9921_s1 + $0xd0] sm:$0xff] }
 0x141   : > { %5029 = vmatmul.msk.f32.gmra.mxu0 %vm396_vm11, %v10280_v38  ;;  %2369 = vmatpush.msra.mxu3 %v2368_v30  ;;  %vm10360_vm11 = vcmp.eq.s32.totalorder %v5912_v49, %v5855_v26 }
 0x142   : > { %v1224_v4 = vpop.f32.mrf.mxu3 }
 0x143   : > { %v955_v60 = vpop.f32.mrf.mxu2 }
 0x144   : > { %v6639_v7 = vadd.f32 %v1220_v37, %v955_v60  ;;  %v6659_v60 = vand.u32 4294901760, %v727_v59 }
 0x145   : > { %v6641_v19 = vpop.f32.mrf.mxu1 }
 0x146   : > { %10315 = vst [vmem:[#allocation58_spill] sm:$0xff] %v6639_v7  ;;  %v6643_v9 = vpop.f32.mrf.mxu0  ;;  %2062 = vmatpush.msra.mxu2 %v6659_v60  ;;  %v6665_v30 = vsub.f32 %v727_v59, %v6659_v60  ;;  %2785 = vmatpush.msra.mxu1 %v6659_v60 }
 0x147   : > { %1549 = vmatmul.f32.gmra.mxu3 %v10316_v10  ;;  %10317 = vst [vmem:[#allocation59_spill] sm:$0xff] %v6659_v60 }
 0x148   : > { %5063 = vmatmul.msk.f32.gmra.mxu1 %vm402_vm15, %v10280_v38  ;;  %1343 = vmatmul.f32.gmra.mxu2 %v6120_v5  ;;  %10319 = vst [vmem:[#allocation61_spill] sm:$0xff] %v6665_v30  ;;  %v10033_v7 = vand.u32 4294901760, %v6665_v30 }
 0x149   : > { %5030 = vmatmul.msk.f32.gmra.mxu0 %vm399_vm13, %v10280_v38  ;;  %vm10363_vm13 = vcmp.eq.s32.totalorder %v5972_v36, %v5855_v26 }
 0x14a   : > { %v1228_v37 = vpop.f32.mrf.mxu3  ;;  %2582 = vmatpush.msra.mxu0 %v6665_v30 }
 0x14b   : > { %v963_v10 = vpop.f32.mrf.mxu2 }
 0x14c   : > { %v6661_v48 = vadd.f32 %v1224_v4, %v963_v10  ;;  %v2373_v4 = vsub.f32 %v6665_v30, %v10033_v7  ;;  %v10327_v30 = vand.u32 4294901760, %v6298_v14 }
 0x14d   : > { %v6668_v5 = vpop.f32.mrf.mxu1 }
 0x14e   : > { %10318 = vst [vmem:[#allocation60_spill] sm:$0xff] %v6661_v48  ;;  %v6670_v27 = vpop.f32.mrf.mxu0  ;;  %v2374_v10 = vand.u32 4294901760, %v2373_v4 }
 0x14f   : > { %1555 = vmatmul.f32.gmra.mxu3 %v10320_v1 }
 0x150   : > { %5064 = vmatmul.msk.f32.gmra.mxu1 %vm405_vm10, %v10280_v38  ;;  %1348 = vmatmul.f32.gmra.mxu2 %v6156_v55  ;;  %v726_v55 = vld [vmem:[%s9921_s1 + $0xc8] sm:$0xff] }
 0x151   : > { %5031 = vmatmul.msk.f32.gmra.mxu0 %vm402_vm15, %v10280_v38  ;;  %2375 = vmatpush.msra.mxu3 %v2374_v10  ;;  %vm10366_vm15 = vcmp.eq.s32.totalorder %v6012_v6, %v5855_v26 }
 0x152   : > { %v1232_v59 = vpop.f32.mrf.mxu3 }
 0x153   : > { %v971_v48 = vpop.f32.mrf.mxu2 }
 0x154   : > { %v6688_v1 = vadd.f32 %v1228_v37, %v971_v48  ;;  %v6708_v48 = vand.u32 4294901760, %v726_v55 }
 0x155   : > { %v6690_v42 = vpop.f32.mrf.mxu1 }
 0x156   : > { %10321 = vst [vmem:[#allocation62_spill] sm:$0xff] %v6688_v1  ;;  %v6692_v60 = vpop.f32.mrf.mxu0  ;;  %2064 = vmatpush.msra.mxu2 %v6708_v48  ;;  %v6714_v10 = vsub.f32 %v726_v55, %v6708_v48  ;;  %2787 = vmatpush.msra.mxu1 %v6708_v48 }
 0x157   : > { %1561 = vmatmul.f32.gmra.mxu3 %v10322_v62  ;;  %10323 = vst [vmem:[#allocation63_spill] sm:$0xff] %v6708_v48 }
 0x158   : > { %5065 = vmatmul.msk.f32.gmra.mxu1 %vm408_vm14, %v10280_v38  ;;  %1353 = vmatmul.f32.gmra.mxu2 %v6192_v35  ;;  %v10040_v1 = vand.u32 4294901760, %v6714_v10 }
 0x159   : > { %5032 = vmatmul.msk.f32.gmra.mxu0 %vm405_vm10, %v10280_v38 }
 0x15a   : > { %v1236_v37 = vpop.f32.mrf.mxu3  ;;  %2585 = vmatpush.msra.mxu0 %v6714_v10 }
 0x15b   : > { %v979_v62 = vpop.f32.mrf.mxu2 }
 0x15c   : > { %v6710_v4 = vadd.f32 %v1232_v59, %v979_v62  ;;  %v2379_v59 = vsub.f32 %v6714_v10, %v10040_v1 }
 0x15d   : > { %v6717_v35 = vpop.f32.mrf.mxu1 }
 0x15e   : > { %10324 = vst [vmem:[#allocation64_spill] sm:$0xff] %v6710_v4  ;;  %v6719_v7 = vpop.f32.mrf.mxu0  ;;  %v2380_v62 = vand.u32 4294901760, %v2379_v59 }
 0x15f   : > { %1567 = vmatmul.f32.gmra.mxu3 %v10325_v46 }
 0x160   : > { %5066 = vmatmul.msk.f32.gmra.mxu1 %vm411_vm12, %v10280_v38  ;;  %1358 = vmatmul.f32.gmra.mxu2 %v6226_v45  ;;  %v725_v45 = vld [vmem:[%s9921_s1 + $0xc0] sm:$0xff] }
 0x161   : > { %5033 = vmatmul.msk.f32.gmra.mxu0 %vm408_vm14, %v10280_v38  ;;  %2381 = vmatpush.msra.mxu3 %v2380_v62  ;;  %vm10364_vm14 = vmmov %vm10360_vm11 }
 0x162   : > { %v1240_v55 = vpop.f32.mrf.mxu3 }
 0x163   : > { %v987_v4 = vpop.f32.mrf.mxu2 }
 0x164   : > { %v6737_v46 = vadd.f32 %v1236_v37, %v987_v4  ;;  %v6757_v4 = vand.u32 4294901760, %v725_v45 }
 0x165   : > { %v6739_v52 = vpop.f32.mrf.mxu1 }
 0x166   : > { %10326 = vst [vmem:[#allocation65_spill] sm:$0xff] %v6737_v46  ;;  %v6741_v48 = vpop.f32.mrf.mxu0  ;;  %2066 = vmatpush.msra.mxu2 %v6757_v4  ;;  %v6761_v59 = vsub.f32 %v725_v45, %v6757_v4  ;;  %2789 = vmatpush.msra.mxu1 %v6757_v4 }
 0x167   : > { %1573 = vmatmul.f32.gmra.mxu3 %v10327_v30  ;;  %10328 = vst [vmem:[#allocation66_spill] sm:$0xff] %v6757_v4 }
 0x168   : > { %5067 = vmatmul.msk.f32.gmra.mxu1 %vm414_vm8, %v10280_v38  ;;  %1363 = vmatmul.f32.gmra.mxu2 %v6262_v12  ;;  %v10046_v46 = vand.u32 4294901760, %v6761_v59 }
 0x169   : > { %5034 = vmatmul.msk.f32.gmra.mxu0 %vm411_vm12, %v10280_v38  ;;  %vm10361_vm12 = vmmov %vm10357_vm9 }
 0x16a   : > { %v1244_v37 = vpop.f32.mrf.mxu3  ;;  %2588 = vmatpush.msra.mxu0 %v6761_v59 }
 0x16b   : > { %v995_v30 = vpop.f32.mrf.mxu2 }
 0x16c   : > { %v6764_v12 = vadd.f32 %v1240_v55, %v995_v30  ;;  %v2385_v55 = vsub.f32 %v6761_v59, %v10046_v46 }
 0x16d   : > { %v6766_v62 = vpop.f32.mrf.mxu1 }
 0x16e   : > { %10329 = vst [vmem:[#allocation67_spill] sm:$0xff] %v6764_v12  ;;  %v6768_v1 = vpop.f32.mrf.mxu0  ;;  %v2386_v30 = vand.u32 4294901760, %v2385_v55 }
 0x16f   : > { %10330 = vst [vmem:[#allocation68_spill] sm:$0xff] %v6766_v62  ;;  %1579 = vmatmul.f32.gmra.mxu3 %v10331_v51  ;;  %v10334_v62 = vand.u32 4294901760, %v6368_v63 }
 0x170   : > { %5068 = vmatmul.msk.f32.gmra.mxu1 %vm10332_vm0, %v10280_v38  ;;  %1368 = vmatmul.f32.gmra.mxu2 %v6298_v14  ;;  %v724_v14 = vld [vmem:[%s9921_s1 + $0xb8] sm:$0xff]  ;;  %vm10367_vm0 = vmmov %vm10363_vm13 }
 0x171   : > { %5035 = vmatmul.msk.f32.gmra.mxu0 %vm414_vm8, %v10280_v38  ;;  %2387 = vmatpush.msra.mxu3 %v2386_v30  ;;  %vm10353_vm8 = vcmp.eq.s32.totalorder %v5925_v56, %v5855_v26 }
 0x172   : > { %v1248_v45 = vpop.f32.mrf.mxu3  ;;  %vm10358_vm10 = vmmov %vm10353_vm8 }
 0x173   : > { %v1003_v12 = vpop.f32.mrf.mxu2 }
 0x174   : > { %v6786_v51 = vadd.f32 %v1244_v37, %v1003_v12  ;;  %v6806_v12 = vand.u32 4294901760, %v724_v14 }
 0x175   : > { %v6788_v15 = vpop.f32.mrf.mxu1 }
 0x176   : > { %10333 = vst [vmem:[#allocation69_spill] sm:$0xff] %v6786_v51  ;;  %v6790_v4 = vpop.f32.mrf.mxu0  ;;  %2068 = vmatpush.msra.mxu2 %v6806_v12  ;;  %v6810_v55 = vsub.f32 %v724_v14, %v6806_v12  ;;  %2791 = vmatpush.msra.mxu1 %v6806_v12 }
 0x177   : > { %1585 = vmatmul.f32.gmra.mxu3 %v10334_v62  ;;  %10337 = vst [vmem:[#allocation70_spill] sm:$0xff] %v6806_v12  ;;  %v10345_v12 = vand.u32 4294901760, %v6447_v3 }
 0x178   : > { %5069 = vmatmul.msk.f32.gmra.mxu1 %vm10335_vm2, %v10280_v38  ;;  %1373 = vmatmul.f32.gmra.mxu2 %v6334_v34  ;;  %v10052_v51 = vand.u32 4294901760, %v6810_v55  ;;  %vm10369_vm2 = vcmp.eq.s32.totalorder %v6036_v21, %v5855_v26 }
 0x179   : > { %5036 = vmatmul.msk.f32.gmra.mxu0 %vm10336_vm6, %v10280_v38  ;;  %vm10370_vm6 = vmmov %vm10366_vm15 }
 0x17a   : > { %v1252_v37 = vpop.f32.mrf.mxu3  ;;  %2591 = vmatpush.msra.mxu0 %v6810_v55 }
 0x17b   : > { %v1011_v62 = vpop.f32.mrf.mxu2 }
 0x17c   : > { %v6813_v34 = vadd.f32 %v1248_v45, %v1011_v62  ;;  %v2391_v45 = vsub.f32 %v6810_v55, %v10052_v51 }
 0x17d   : > { %v6815_v30 = vpop.f32.mrf.mxu1 }
 0x17e   : > { %10338 = vst [vmem:[#allocation71_spill] sm:$0xff] %v6813_v34  ;;  %v6817_v46 = vpop.f32.mrf.mxu0  ;;  %v2392_v62 = vand.u32 4294901760, %v2391_v45 }
 0x17f   : > { %10339 = vst [vmem:[#allocation72_spill] sm:$0xff] %v6815_v30  ;;  %1591 = vmatmul.f32.gmra.mxu3 %v10340_v53 }
 0x180   : > { %5070 = vmatmul.msk.f32.gmra.mxu1 %vm423_vm3, %v10280_v38  ;;  %1378 = vmatmul.f32.gmra.mxu2 %v6368_v63  ;;  %v723_v63 = vld [vmem:[%s9921_s1 + $0xb0] sm:$0xff] }
 0x181   : > { %5037 = vmatmul.msk.f32.gmra.mxu0 %vm10341_vm7, %v10280_v38  ;;  %2393 = vmatpush.msra.mxu3 %v2392_v62 }
 0x182   : > { %v1256_v14 = vpop.f32.mrf.mxu3 }
 0x183   : > { %v1019_v34 = vpop.f32.mrf.mxu2 }
 0x184   : > { %v6835_v53 = vadd.f32 %v1252_v37, %v1019_v34  ;;  %v6855_v34 = vand.u32 4294901760, %v723_v63 }
 0x185   : > { %v6837_v2 = vpop.f32.mrf.mxu1 }
 0x186   : > { %10342 = vst [vmem:[#allocation73_spill] sm:$0xff] %v6835_v53  ;;  %v6839_v30 = vpop.f32.mrf.mxu0  ;;  %2070 = vmatpush.msra.mxu2 %v6855_v34  ;;  %v6859_v45 = vsub.f32 %v723_v63, %v6855_v34  ;;  %2793 = vmatpush.msra.mxu1 %v6855_v34 }
 0x187   : > { %10343 = vst [vmem:[#allocation74_spill] sm:$0xff] %v6837_v2  ;;  %1597 = vmatmul.f32.gmra.mxu3 %v10345_v12 }
 0x188   : > { %10344 = vst [vmem:[#allocation75_spill] sm:$0xff] %v6839_v30  ;;  %5071 = vmatmul.msk.f32.gmra.mxu1 %vm426_vm4, %v10280_v38  ;;  %1383 = vmatmul.f32.gmra.mxu2 %v6403_v8  ;;  %v10057_v53 = vand.u32 4294901760, %v6859_v45  ;;  %v10356_v30 = vand.u32 4294901760, %v5959_v18 }
 0x189   : > { %5038 = vmatmul.msk.f32.gmra.mxu0 %vm423_vm3, %v10280_v38  ;;  %10346 = vst [vmem:[#allocation76_spill] sm:$0xff] %v6855_v34  ;;  %vm10350_vm3 = vcmp.eq.s32.totalorder %v5869_v28, %v5855_v26 }
 0x18a   : > { %v1260_v37 = vpop.f32.mrf.mxu3  ;;  %2594 = vmatpush.msra.mxu0 %v6859_v45 }
 0x18b   : > { %v1027_v12 = vpop.f32.mrf.mxu2 }
 0x18c   : > { %v6862_v8 = vadd.f32 %v1256_v14, %v1027_v12  ;;  %v2397_v14 = vsub.f32 %v6859_v45, %v10057_v53 }
 0x18d   : > { %v1924_v62 = vpop.f32.mrf.mxu1 }
 0x18e   : > { %10347 = vst [vmem:[#allocation77_spill] sm:$0xff] %v6862_v8  ;;  %v6864_v51 = vpop.f32.mrf.mxu0  ;;  %v2398_v12 = vand.u32 4294901760, %v2397_v14 }
 0x18f   : > { %10348 = vst [vmem:[#allocation78_spill] sm:$0xff] %v6864_v51  ;;  %1603 = vmatmul.f32.gmra.mxu3 %v10349_v54  ;;  %v10352_v51 = vand.u32 4294901760, %v5949_v11 }
 0x190   : > { %5072 = vmatmul.msk.f32.gmra.mxu1 %vm10350_vm3, %v10280_v38  ;;  %1388 = vmatmul.f32.gmra.mxu2 %v6447_v3  ;;  %v722_v3 = vld [vmem:[%s9921_s1 + $0xa8] sm:$0xff] }
 0x191   : > { %5039 = vmatmul.msk.f32.gmra.mxu0 %vm426_vm4, %v10280_v38  ;;  %2399 = vmatpush.msra.mxu3 %v2398_v12  ;;  %vm10354_vm4 = vmmov %vm10350_vm3 }
 0x192   : > { %v1508_v63 = vpop.f32.mrf.mxu3  ;;  %vm10374_vm3 = vmmov %vm10369_vm2 }
 0x193   : > { %v1035_v8 = vpop.f32.mrf.mxu2 }
 0x194   : > { %v6882_v54 = vadd.f32 %v1260_v37, %v1035_v8  ;;  %v6898_v8 = vand.u32 4294901760, %v722_v3 }
 0x195   : > { %v1928_v13 = vpop.f32.mrf.mxu1 }
 0x196   : > { %10351 = vst [vmem:[#allocation79_spill] sm:$0xff] %v6882_v54  ;;  %v1763_v2 = vpop.f32.mrf.mxu0  ;;  %2072 = vmatpush.msra.mxu2 %v6898_v8  ;;  %2795 = vmatpush.msra.mxu1 %v6898_v8 }
 0x197   : > { %1609 = vmatmul.f32.gmra.mxu3 %v10352_v51  ;;  %10355 = vst [vmem:[#allocation80_spill] sm:$0xff] %v6898_v8  ;;  %v1137_v51 = vadd.f32 %v6481_v32, %v6496_v24 }
 0x198   : > { %5073 = vmatmul.msk.f32.gmra.mxu1 %vm10353_vm8, %v10280_v38  ;;  %1393 = vmatmul.f32.gmra.mxu2 %v5903_v40  ;;  %v6904_v40 = vsub.f32 %v722_v3, %v6898_v8 }
 0x199   : > { %5040 = vmatmul.msk.f32.gmra.mxu0 %vm10354_vm4, %v10280_v38 }
 0x19a   : > { %v1514_v37 = vpop.f32.mrf.mxu3  ;;  %v10063_v28 = vand.u32 4294901760, %v6904_v40  ;;  %2597 = vmatpush.msra.mxu0 %v6904_v40 }
 0x19b   : > { %v1314_v14 = vpop.f32.mrf.mxu2 }
 0x19c   : > { %v1315_v12 = vadd.f32 %v1314_v14, %v1137_v51  ;;  %v2403_v24 = vsub.f32 %v6904_v40, %v10063_v28 }
 0x19d   : > { %v1932_v53 = vpop.f32.mrf.mxu1 }
 0x19e   : > { %v1767_v54 = vpop.f32.mrf.mxu0  ;;  %v1509_v17 = vadd.f32 %v1508_v63, %v1315_v12  ;;  %v2404_v3 = vand.u32 4294901760, %v2403_v24 }
 0x19f   : > { %1615 = vmatmul.f32.gmra.mxu3 %v10356_v30  ;;  %v1141_v30 = vadd.f32 %v6494_v50, %v6523_v20 }
 0x1a0   : > { %5074 = vmatmul.msk.f32.gmra.mxu1 %vm10357_vm9, %v10280_v38  ;;  %1398 = vmatmul.f32.gmra.mxu2 %v5949_v11  ;;  %v1764_v32 = vadd.f32 %v1763_v2, %v1509_v17  ;;  %v10359_v11 = vand.u32 4294901760, %v6003_v0  ;;  %v721_v2 = vld [vmem:[%s9921_s1 + $0xa0] sm:$0xff] }
 0x1a1   : > { %5041 = vmatmul.msk.f32.gmra.mxu0 %vm10358_vm10, %v10280_v38  ;;  %2405 = vmatpush.msra.mxu3 %v2404_v3  ;;  %v6941_v20 = vand.u32 4294901760, %v721_v2 }
 0x1a2   : > { %v1520_v63 = vpop.f32.mrf.mxu3  ;;  %v6925_v51 = vadd.f32 %v1924_v62, %v1764_v32  ;;  %v1145_v62 = vadd.f32 %v6521_v43, %v6545_v44  ;;  %v10362_v44 = vand.u32 4294901760, %v6041_v23 }
 0x1a3   : > { %v1319_v14 = vpop.f32.mrf.mxu2  ;;  %2074 = vmatpush.msra.mxu2 %v6941_v20  ;;  %2797 = vmatpush.msra.mxu1 %v6941_v20 }
 0x1a4   : > { %v1320_v12 = vadd.f32 %v1319_v14, %v1141_v30 }
 0x1a5   : > { %v1936_v8 = vpop.f32.mrf.mxu1 }
 0x1a6   : > { %v1771_v28 = vpop.f32.mrf.mxu0  ;;  %v1515_v34 = vadd.f32 %v1514_v37, %v1320_v12  ;;  %v1149_v12 = vadd.f32 %v6543_v47, %v6572_v16 }
 0x1a7   : > { %1621 = vmatmul.f32.gmra.mxu3 %v10359_v11 }
 0x1a8   : > { %5075 = vmatmul.msk.f32.gmra.mxu1 %vm10360_vm11, %v10280_v38  ;;  %1403 = vmatmul.f32.gmra.mxu2 %v5959_v18  ;;  %v1768_v17 = vadd.f32 %v1767_v54, %v1515_v34  ;;  %v6949_v18 = vsub.f32 %v721_v2, %v6941_v20 }
 0x1a9   : > { %5042 = vmatmul.msk.f32.gmra.mxu0 %vm10361_vm12, %v10280_v38 }
 0x1aa   : > { %v1526_v50 = vpop.f32.mrf.mxu3  ;;  %v6945_v37 = vadd.f32 %v1928_v13, %v1768_v17  ;;  %v10068_v34 = vand.u32 4294901760, %v6949_v18  ;;  %2600 = vmatpush.msra.mxu0 %v6949_v18 }
 0x1ab   : > { %v1324_v24 = vpop.f32.mrf.mxu2 }
 0x1ac   : > { %v1325_v32 = vadd.f32 %v1324_v24, %v1145_v62  ;;  %v2409_v13 = vsub.f32 %v6949_v18, %v10068_v34  ;;  %v10392_v34 = vld [vmem:[#allocation34_spill] sm:$0xff] }
 0x1ad   : > { %v1940_v3 = vpop.f32.mrf.mxu1 }
 0x1ae   : > { %v1775_v30 = vpop.f32.mrf.mxu0  ;;  %v1521_v54 = vadd.f32 %v1520_v63, %v1325_v32  ;;  %v2410_v14 = vand.u32 4294901760, %v2409_v13 }
 0x1af   : > { %1627 = vmatmul.f32.gmra.mxu3 %v10362_v44 }
 0x1b0   : > { %5076 = vmatmul.msk.f32.gmra.mxu1 %vm10363_vm13, %v10280_v38  ;;  %1408 = vmatmul.f32.gmra.mxu2 %v6003_v0  ;;  %v1772_v43 = vadd.f32 %v1771_v28, %v1521_v54  ;;  %v10365_v0 = vand.u32 4294901760, %v6077_v39  ;;  %v720_v28 = vld [vmem:[%s9921_s1 + $0x98] sm:$0xff] }
 0x1b1   : > { %5043 = vmatmul.msk.f32.gmra.mxu0 %vm10364_vm14, %v10280_v38  ;;  %2411 = vmatpush.msra.mxu3 %v2410_v14 }
 0x1b2   : > { %v1532_v63 = vpop.f32.mrf.mxu3  ;;  %v6970_v11 = vadd.f32 %v1932_v53, %v1772_v43  ;;  %v6986_v53 = vand.u32 4294901760, %v720_v28 }
 0x1b3   : > { %v1329_v2 = vpop.f32.mrf.mxu2 }
 0x1b4   : > { %v1330_v17 = vadd.f32 %v1329_v2, %v1149_v12  ;;  %2076 = vmatpush.msra.mxu2 %v6986_v53  ;;  %2799 = vmatpush.msra.mxu1 %v6986_v53 }
 0x1b5   : > { %v1944_v62 = vpop.f32.mrf.mxu1 }
 0x1b6   : > { %v1779_v24 = vpop.f32.mrf.mxu0  ;;  %v1527_v32 = vadd.f32 %v1526_v50, %v1330_v17  ;;  %v1153_v50 = vadd.f32 %v6570_v57, %v6594_v22  ;;  %v10368_v22 = vand.u32 4294901760, %v6115_v58  ;;  %v1157_v17 = vadd.f32 %v6592_v25, %v6621_v29  ;;  %v719_v25 = vld [vmem:[%s9921_s1 + $0x90] sm:$0xff] }
 0x1b7   : > { %1633 = vmatmul.f32.gmra.mxu3 %v10365_v0 }
 0x1b8   : > { %5077 = vmatmul.msk.f32.gmra.mxu1 %vm10366_vm15, %v10280_v38  ;;  %1413 = vmatmul.f32.gmra.mxu2 %v6041_v23  ;;  %v1776_v16 = vadd.f32 %v1775_v30, %v1527_v32  ;;  %v6994_v23 = vsub.f32 %v720_v28, %v6986_v53 }
 0x1b9   : > { %5044 = vmatmul.msk.f32.gmra.mxu0 %vm10367_vm0, %v10280_v38 }
 0x1ba   : > { %v1538_v47 = vpop.f32.mrf.mxu3  ;;  %v6990_v54 = vadd.f32 %v1936_v8, %v1776_v16  ;;  %v10067_v30 = vand.u32 4294901760, %v6994_v23  ;;  %2603 = vmatpush.msra.mxu0 %v6994_v23 }
 0x1bb   : > { %v1334_v44 = vpop.f32.mrf.mxu2 }
 0x1bc   : > { %v1335_v13 = vadd.f32 %v1334_v44, %v1153_v50  ;;  %v2415_v57 = vsub.f32 %v6994_v23, %v10067_v30  ;;  %v10371_v44 = vand.u32 4294901760, %v6151_v33 }
 0x1bd   : > { %v1948_v43 = vpop.f32.mrf.mxu1 }
 0x1be   : > { %v1783_v14 = vpop.f32.mrf.mxu0  ;;  %v1533_v12 = vadd.f32 %v1532_v63, %v1335_v13  ;;  %v2416_v2 = vand.u32 4294901760, %v2415_v57  ;;  %v10372_v13 = vld [vmem:[#allocation17_spill] sm:$0xff] }
 0x1bf   : > { %1639 = vmatmul.f32.gmra.mxu3 %v10368_v22  ;;  %vm10373_vm7 = vcmp.eq.s32.totalorder %v10372_v13, %v5855_v26 }
 0x1c0   : > { %5078 = vmatmul.msk.f32.gmra.mxu1 %vm10369_vm2, %v10280_v38  ;;  %1418 = vmatmul.f32.gmra.mxu2 %v6077_v39  ;;  %v1780_v8 = vadd.f32 %v1779_v24, %v1533_v12  ;;  %v7033_v24 = vand.u32 4294901760, %v719_v25  ;;  %vm10379_vm4 = vmmov %vm10373_vm7 }
 0x1c1   : > { %5045 = vmatmul.msk.f32.gmra.mxu0 %vm10370_vm6, %v10280_v38  ;;  %2417 = vmatpush.msra.mxu3 %v2416_v2 }
 0x1c2   : > { %v1544_v63 = vpop.f32.mrf.mxu3  ;;  %v7015_v32 = vadd.f32 %v1940_v3, %v1780_v8  ;;  %2078 = vmatpush.msra.mxu2 %v7033_v24  ;;  %2801 = vmatpush.msra.mxu1 %v7033_v24 }
 0x1c3   : > { %v1339_v0 = vpop.f32.mrf.mxu2 }
 0x1c4   : > { %v1340_v28 = vadd.f32 %v1339_v0, %v1157_v17 }
 0x1c5   : > { %v7017_v16 = vpop.f32.mrf.mxu1 }
 0x1c6   : > { %v1787_v50 = vpop.f32.mrf.mxu0  ;;  %v1539_v39 = vadd.f32 %v1538_v47, %v1340_v28  ;;  %v1161_v47 = vadd.f32 %v6619_v41, %v6643_v9  ;;  %v10375_v9 = vld [vmem:[#allocation25_spill] sm:$0xff] }
 0x1c7   : > { %1645 = vmatmul.f32.gmra.mxu3 %v10371_v44  ;;  %v10376_v41 = vand.u32 4294901760, %v10375_v9 }
 0x1c8   : > { %5079 = vmatmul.msk.f32.gmra.mxu1 %vm10373_vm7, %v10280_v38  ;;  %1423 = vmatmul.f32.gmra.mxu2 %v6115_v58  ;;  %v1784_v29 = vadd.f32 %v1783_v14, %v1539_v39  ;;  %v7041_v58 = vsub.f32 %v719_v25, %v7033_v24  ;;  %v1165_v39 = vadd.f32 %v6641_v19, %v6670_v27  ;;  %v718_v19 = vld [vmem:[%s9921_s1 + $0x88] sm:$0xff] }
 0x1c9   : > { %5046 = vmatmul.msk.f32.gmra.mxu0 %vm10374_vm3, %v10280_v38 }
 0x1ca   : > { %v1550_v3 = vpop.f32.mrf.mxu3  ;;  %v7037_v12 = vadd.f32 %v1944_v62, %v1784_v29  ;;  %v10065_v2 = vand.u32 4294901760, %v7041_v58  ;;  %2606 = vmatpush.msra.mxu0 %v7041_v58  ;;  %v10377_v62 = vld [vmem:[#allocation19_spill] sm:$0xff] }
 0x1cb   : > { %v1344_v22 = vpop.f32.mrf.mxu2  ;;  %vm10378_vm8 = vcmp.eq.s32.totalorder %v10377_v62, %v5855_v26 }
 0x1cc   : > { %v1345_v57 = vadd.f32 %v1344_v22, %v1161_v47  ;;  %v2421_v0 = vsub.f32 %v7041_v58, %v10065_v2  ;;  %v10382_v2 = vld [vmem:[#allocation21_spill] sm:$0xff]  ;;  %vm10384_vm10 = vmmov %vm10378_vm8 }
 0x1cd   : > { %v7044_v8 = vpop.f32.mrf.mxu1  ;;  %vm10383_vm9 = vcmp.eq.s32.totalorder %v10382_v2, %v5855_v26 }
 0x1ce   : > { %v1791_v14 = vpop.f32.mrf.mxu0  ;;  %v1545_v17 = vadd.f32 %v1544_v63, %v1345_v57  ;;  %v2422_v28 = vand.u32 4294901760, %v2421_v0  ;;  %v10380_v57 = vld [vmem:[#allocation28_spill] sm:$0xff]  ;;  %vm10390_vm12 = vmmov %vm10383_vm9 }
 0x1cf   : > { %1651 = vmatmul.f32.gmra.mxu3 %v10376_v41 }
 0x1d0   : > { %5080 = vmatmul.msk.f32.gmra.mxu1 %vm10378_vm8, %v10280_v38  ;;  %1428 = vmatmul.f32.gmra.mxu2 %v6151_v33  ;;  %v10381_v33 = vand.u32 4294901760, %v10380_v57  ;;  %v1788_v41 = vadd.f32 %v1787_v50, %v1545_v17  ;;  %v7084_v50 = vand.u32 4294901760, %v718_v19  ;;  %v1169_v17 = vadd.f32 %v6668_v5, %v6692_v60 }
 0x1d1   : > { %5047 = vmatmul.msk.f32.gmra.mxu0 %vm10379_vm4, %v10280_v38  ;;  %2423 = vmatpush.msra.mxu3 %v2422_v28 }
 0x1d2   : > { %v1556_v63 = vpop.f32.mrf.mxu3  ;;  %v7082_v27 = vadd.f32 %v1948_v43, %v1788_v41  ;;  %2080 = vmatpush.msra.mxu2 %v7084_v50  ;;  %2803 = vmatpush.msra.mxu1 %v7084_v50  ;;  %v10388_v41 = vld [vmem:[#allocation23_spill] sm:$0xff] }
 0x1d3   : > { %v1349_v44 = vpop.f32.mrf.mxu2  ;;  %vm10389_vm11 = vcmp.eq.s32.totalorder %v10388_v41, %v5855_v26 }
 0x1d4   : > { %v1350_v25 = vadd.f32 %v1349_v44, %v1165_v39  ;;  %10385 = vst [vmem:[#allocation25_spill] sm:$0xff] %v7082_v27  ;;  %vm10396_vm14 = vmmov %vm10389_vm11 }
 0x1d5   : > { %v7064_v29 = vpop.f32.mrf.mxu1 }
 0x1d6   : > { %v7066_v47 = vpop.f32.mrf.mxu0  ;;  %v1551_v22 = vadd.f32 %v1550_v3, %v1350_v25 }
 0x1d7   : > { %1657 = vmatmul.f32.gmra.mxu3 %v10381_v33  ;;  %v10386_v33 = vld [vmem:[#allocation31_spill] sm:$0xff] }
 0x1d8   : > { %5081 = vmatmul.msk.f32.gmra.mxu1 %vm10383_vm9, %v10280_v38  ;;  %1433 = vmatmul.f32.gmra.mxu2 %v10375_v9  ;;  %v7090_v9 = vsub.f32 %v718_v19, %v7084_v50  ;;  %v10387_v60 = vand.u32 4294901760, %v10386_v33  ;;  %v1792_v5 = vadd.f32 %v1791_v14, %v1551_v22 }
 0x1d9   : > { %5048 = vmatmul.msk.f32.gmra.mxu0 %vm10384_vm10, %v10280_v38 }
 0x1da   : > { %v1562_v3 = vpop.f32.mrf.mxu3  ;;  %v10066_v43 = vand.u32 4294901760, %v7090_v9  ;;  %2609 = vmatpush.msra.mxu0 %v7090_v9 }
 0x1db   : > { %v1354_v0 = vpop.f32.mrf.mxu2 }
 0x1dc   : > { %v1355_v28 = vadd.f32 %v1354_v0, %v1169_v17  ;;  %v2427_v19 = vsub.f32 %v7090_v9, %v10066_v43  ;;  %v1173_v17 = vadd.f32 %v6690_v42, %v6719_v7 }
 0x1dd   : > { %v7093_v39 = vpop.f32.mrf.mxu1 }
 0x1de   : > { %v7095_v44 = vpop.f32.mrf.mxu0  ;;  %v1557_v25 = vadd.f32 %v1556_v63, %v1355_v28  ;;  %v7114_v63 = vadd.f32 %v7017_v16, %v1792_v5  ;;  %v2428_v22 = vand.u32 4294901760, %v2427_v19  ;;  %v10393_v16 = vand.u32 4294901760, %v10392_v34  ;;  %v10394_v19 = vld [vmem:[#allocation26_spill] sm:$0xff] }
 0x1df   : > { %1663 = vmatmul.f32.gmra.mxu3 %v10387_v60  ;;  %vm10395_vm13 = vcmp.eq.s32.totalorder %v10394_v19, %v5855_v26 }
 0x1e0   : > { %5082 = vmatmul.msk.f32.gmra.mxu1 %vm10389_vm11, %v10280_v38  ;;  %1438 = vmatmul.f32.gmra.mxu2 %v10380_v57  ;;  %10391 = vst [vmem:[#allocation28_spill] sm:$0xff] %v7114_v63  ;;  %v717_v57 = vld [vmem:[%s9921_s1 + $0x80] sm:$0xff]  ;;  %vm10406_vm0 = vmmov %vm10395_vm13 }
 0x1e1   : > { %5049 = vmatmul.msk.f32.gmra.mxu0 %vm10390_vm12, %v10280_v38  ;;  %2429 = vmatpush.msra.mxu3 %v2428_v22  ;;  %v7127_v5 = vand.u32 4294901760, %v717_v57 }
 0x1e2   : > { %v1568_v14 = vpop.f32.mrf.mxu3 }
 0x1e3   : > { %v1359_v0 = vpop.f32.mrf.mxu2  ;;  %v7139_v42 = vsub.f32 %v717_v57, %v7127_v5  ;;  %2082 = vmatpush.msra.mxu2 %v7127_v5  ;;  %2805 = vmatpush.msra.mxu1 %v7127_v5 }
 0x1e4   : > { %v1360_v28 = vadd.f32 %v1359_v0, %v1173_v17 }
 0x1e5   : > { %v7118_v60 = vpop.f32.mrf.mxu1  ;;  %v10071_v22 = vand.u32 4294901760, %v7139_v42  ;;  %2612 = vmatpush.msra.mxu0 %v7139_v42 }
 0x1e6   : > { %v7120_v43 = vpop.f32.mrf.mxu0  ;;  %v1563_v30 = vadd.f32 %v1562_v3, %v1360_v28  ;;  %v1177_v3 = vadd.f32 %v6717_v35, %v6741_v48  ;;  %v10400_v35 = vld [vmem:[#allocation37_spill] sm:$0xff] }
 0x1e7   : > { %1669 = vmatmul.f32.gmra.mxu3 %v10393_v16  ;;  %v2433_v57 = vsub.f32 %v7139_v42, %v10071_v22  ;;  %v10398_v16 = vld [vmem:[#allocation46_spill] sm:$0xff]  ;;  %v10401_v27 = vand.u32 4294901760, %v10400_v35 }
 0x1e8   : > { %5083 = vmatmul.msk.f32.gmra.mxu1 %vm10395_vm13, %v10280_v38  ;;  %1443 = vmatmul.f32.gmra.mxu2 %v10386_v33  ;;  %v10397_v33 = vand.u32 4294901760, %v6415_v31  ;;  %v10399_v63 = vand.u32 4294901760, %v10398_v16  ;;  %v10402_v31 = vld [vmem:[#allocation49_spill] sm:$0xff] }
 0x1e9   : > { %5050 = vmatmul.msk.f32.gmra.mxu0 %vm10396_vm14, %v10280_v38  ;;  %v2434_v2 = vand.u32 4294901760, %v2433_v57  ;;  %v10409_v57 = vld [vmem:[#allocation42_spill] sm:$0xff] }
 0x1ea   : > { %v1574_v7 = vpop.f32.mrf.mxu3  ;;  %3002 = vmatpush.msrb.mxu2 %v10397_v33  ;;  %v10403_v33 = vand.u32 4294901760, %v10402_v31  ;;  %v10410_v31 = vld [vmem:[#allocation57_spill] sm:$0xff] }
 0x1eb   : > { %v1364_v17 = vpop.f32.mrf.mxu2  ;;  %2435 = vmatpush.msra.mxu3 %v2434_v2 }
 0x1ec   : > { %v1365_v0 = vadd.f32 %v1364_v17, %v1177_v3  ;;  %3006 = vmatpush.msrb.mxu2 %v10399_v63  ;;  %v10404_v3 = vld [vmem:[#allocation29_spill] sm:$0xff]  ;;  %v1796_v63 = vadd.f32 %v7066_v47, %v1557_v25 }
 0x1ed   : > { %v7149_v28 = vpop.f32.mrf.mxu1  ;;  %vm10405_vm15 = vcmp.eq.s32.totalorder %v10404_v3, %v5855_v26  ;;  %3193 = vmatpush.msrb.mxu3 %v10409_v57  ;;  %v10412_v47 = vld [vmem:[#allocation45_spill] sm:$0xff]  ;;  %v10421_v57 = vld [vmem:[#allocation51_spill] sm:$0xff] }
 0x1ee   : > { %v7156_v41 = vpop.f32.mrf.mxu0  ;;  %v1569_v48 = vadd.f32 %v1568_v14, %v1365_v0  ;;  %3010 = vmatpush.msrb.mxu2 %v10403_v33  ;;  %v1181_v0 = vadd.f32 %v6739_v52, %v6768_v1  ;;  %v7178_v16 = vadd.f32 %v7044_v8, %v1796_v63  ;;  %v10411_v33 = vand.u32 4294901760, %v10410_v31  ;;  %v10413_v25 = vld [vmem:[#allocation61_spill] sm:$0xff]  ;;  %v10415_v1 = vld [vmem:[#allocation39_spill] sm:$0xff]  ;;  %v10417_v8 = vld [vmem:[#allocation32_spill] sm:$0xff] }
 0x1ef   : > { %1675 = vmatmul.f32.gmra.mxu3 %v10401_v27  ;;  %v10407_v27 = vld [vmem:[#allocation53_spill] sm:$0xff]  ;;  %vm10418_vm2 = vcmp.eq.s32.totalorder %v10417_v8, %v5855_v26  ;;  %v10419_v63 = vld [vmem:[#allocation47_spill] sm:$0xff]  ;;  %vm10420_vm6 = vmmov %vm10405_vm15 }
 0x1f0   : > { %5084 = vmatmul.msk.f32.gmra.mxu1 %vm10405_vm15, %v10280_v38  ;;  %1448 = vmatmul.f32.gmra.mxu2 %v10392_v34  ;;  %v10408_v17 = vand.u32 4294901760, %v10407_v27  ;;  %v10414_v27 = vand.u32 4294901760, %v10413_v25  ;;  %vm10432_vm7 = vmmov %vm10418_vm2 }
 0x1f1   : > { %5051 = vmatmul.msk.f32.gmra.mxu0 %vm10406_vm0, %v10280_v38  ;;  %3195 = vmatpush.msrb.mxu3 %v10412_v47  ;;  %v10424_v47 = vld [vmem:[#allocation55_spill] sm:$0xff] }
 0x1f2   : > { %v1580_v14 = vpop.f32.mrf.mxu3  ;;  %3014 = vmatpush.msrb.mxu2 %v10408_v17  ;;  %v10416_v17 = vand.u32 4294901760, %v10415_v1 }
 0x1f3   : > { %v1369_v34 = vpop.f32.mrf.mxu2  ;;  %3197 = vmatpush.msrb.mxu3 %v10419_v63 }
 0x1f4   : > { %3018 = vmatpush.msrb.mxu2 %v10411_v33  ;;  %v1370_v22 = vadd.f32 %v1369_v34, %v1181_v0  ;;  %v10423_v34 = vld [vmem:[#allocation68_spill] sm:$0xff] }
 0x1f5   : > { %v7182_v19 = vpop.f32.mrf.mxu1  ;;  %3199 = vmatpush.msrb.mxu3 %v10421_v57  ;;  %v1185_v31 = vadd.f32 %v10423_v34, %v6790_v4  ;;  %v10434_v34 = vand.u32 4294901760, %v6859_v45 }
 0x1f6   : > { %v7185_v2 = vpop.f32.mrf.mxu0  ;;  %3022 = vmatpush.msrb.mxu2 %v10414_v27  ;;  %v1575_v52 = vadd.f32 %v1574_v7, %v1370_v22  ;;  %v10422_v7 = vand.u32 4294901760, %v6714_v10  ;;  %v1800_v22 = vadd.f32 %v7095_v44, %v1563_v30  ;;  %v10426_v10 = vld [vmem:[#allocation59_spill] sm:$0xff]  ;;  %v10427_v30 = vand.u32 4294901760, %v6810_v55 }
 0x1f7   : > { %1681 = vmatmul.f32.gmra.mxu3 %v10416_v17  ;;  %v10428_v44 = vld [vmem:[#allocation43_spill] sm:$0xff]  ;;  %v7235_v55 = vadd.s32 128, %v5855_v26  ;;  %v10476_v26 = vld [vmem:[#allocation20_spill] sm:$0xff] }
 0x1f8   : > { %5085 = vmatmul.msk.f32.gmra.mxu1 %vm10418_vm2, %v10280_v38  ;;  %1453 = vmatmul.f32.gmra.mxu2 %v10400_v35  ;;  %v10425_v35 = vand.u32 4294901760, %v6761_v59  ;;  %v7211_v25 = vadd.f32 %v7064_v29, %v1800_v22  ;;  %v10429_v57 = vand.u32 4294901760, %v10428_v44  ;;  %v10431_v29 = vld [vmem:[#allocation63_spill] sm:$0xff]  ;;  %v10433_v22 = vld [vmem:[#allocation66_spill] sm:$0xff] }
 0x1f9   : > { %5052 = vmatmul.msk.f32.gmra.mxu0 %vm10420_vm6, %v10280_v38  ;;  %3026 = vmatpush.msrb.mxu2 %v10422_v7  ;;  %v748_v7 = vld [vmem:[%s9921_s1 + $0x178] sm:$0xff]  ;;  %vm403_vm11 = vcmp.eq.s32.totalorder %v10476_v26, %v7235_v55 }
 0x1fa   : > { %v1586_v0 = vpop.f32.mrf.mxu3  ;;  %3201 = vmatpush.msrb.mxu3 %v10424_v47  ;;  %v10436_v47 = vld [vmem:[#allocation9_spill] sm:$0xff] }
 0x1fb   : > { %v1374_v33 = vpop.f32.mrf.mxu2  ;;  %3030 = vmatpush.msrb.mxu2 %v10425_v35  ;;  %vm382_vm3 = vcmp.eq.s32.totalorder %v10436_v47, %v7235_v55 }
 0x1fc   : > { %v1375_v27 = vadd.f32 %v1374_v33, %v1185_v31  ;;  %3203 = vmatpush.msrb.mxu3 %v10426_v10  ;;  %v1189_v31 = vadd.f32 %v6788_v15, %v6817_v46  ;;  %v7246_v33 = vand.u32 4294901760, %v748_v7  ;;  %v10438_v10 = vand.u32 4294901760, %v6904_v40 }
 0x1fd   : > { %v7213_v17 = vpop.f32.mrf.mxu1  ;;  %3034 = vmatpush.msrb.mxu2 %v10427_v30  ;;  %v10442_v40 = vmov 0.0  }
 0x1fe   : > { %v7215_v63 = vpop.f32.mrf.mxu0  ;;  %v7220_v4 = vadd.f32 %v1580_v14, %v1375_v27  ;;  %3205 = vmatpush.msrb.mxu3 %v10431_v29  ;;  %10435 = vst [vmem:[#allocation31_spill] sm:$0xff] %v7246_v33  ;;  %v10437_v27 = vld [vmem:[#allocation70_spill] sm:$0xff]  ;;  %3354 = vmatpush.msrb.mxu0 %v7246_v33  ;;  %v7260_v15 = vsub.f32 %v748_v7, %v7246_v33 }
 0x1ff   : > { %1687 = vmatmul.f32.gmra.mxu3 %v10429_v57  ;;  %3038 = vmatpush.msrb.mxu2 %v10434_v34 }
 0x200   : > { %5086 = vmatmul.msk.f32.gmra.mxu1 %vm471_vm5, %v10280_v38  ;;  %1458 = vmatmul.f32.gmra.mxu2 %v10415_v1  ;;  %v1804_v1 = vadd.f32 %v7120_v43, %v1569_v48  ;;  %10439 = vst [vmem:[#allocation34_spill] sm:$0xff] %v7260_v15  ;;  %v10440_v43 = vld [vmem:[#allocation76_spill] sm:$0xff]  ;;  %v10441_v48 = vand.u32 4294901760, %v6949_v18  ;;  %v10074_v7 = vand.u32 4294901760, %v7260_v15 }
 0x201   : > { %5053 = vmatmul.msk.f32.gmra.mxu0 %vm10432_vm7, %v10280_v38  ;;  %3207 = vmatpush.msrb.mxu3 %v10433_v22  ;;  %v10443_v22 = vld [vmem:[#allocation44_spill] sm:$0xff] }
 0x202   : > { %v1592_v14 = vpop.f32.mrf.mxu3  ;;  %3042 = vmatpush.msrb.mxu2 %v10438_v10  ;;  %v7254_v30 = vadd.f32 %v7093_v39, %v1804_v1  ;;  %v4897_v39 = vsel %vm382_vm3, 1.0, %v10442_v40  ;;  %v10444_v34 = vand.u32 4294901760, %v10443_v22  ;;  %v3645_v18 = vsub.f32 %v7260_v15, %v10074_v7 }
 0x203   : > { %v1379_v35 = vpop.f32.mrf.mxu2  ;;  %3209 = vmatpush.msrb.mxu3 %v10437_v27  ;;  %v10447_v27 = vand.u32 4294901760, %v6994_v23  ;;  %v1808_v10 = vadd.f32 %v7156_v41, %v1575_v52 }
 0x204   : > { %v1380_v45 = vadd.f32 %v1379_v35, %v1189_v31  ;;  %3046 = vmatpush.msrb.mxu2 %v10441_v48  ;;  %v10446_v31 = vld [vmem:[#allocation80_spill] sm:$0xff]  ;;  %v3646_v48 = vand.u32 4294901760, %v3645_v18  ;;  %v10453_v18 = vand.u32 4294901760, %v7090_v9 }
 0x205   : > { %v7256_v57 = vpop.f32.mrf.mxu1  ;;  %3211 = vmatpush.msrb.mxu3 %v10440_v43  ;;  %v747_v9 = vld [vmem:[%s9921_s1 + $0x170] sm:$0xff] }
 0x206   : > { %v7262_v46 = vpop.f32.mrf.mxu0  ;;  %v7271_v29 = vadd.f32 %v1586_v0, %v1380_v45  ;;  %v2084_v0 = vsub.f32 %v4897_v39, %v4897_v39  ;;  %3050 = vmatpush.msrb.mxu2 %v10447_v27  ;;  %v10448_v45 = vld [vmem:[#allocation75_spill] sm:$0xff]  ;;  %v10451_v39 = vand.u32 4294901760, %v7041_v58  ;;  %3647 = vmatpush.msrb.mxu1 %v3646_v48 }
 0x207   : > { %1693 = vmatmul.f32.gmra.mxu3 %v10444_v34 }
 0x208   : > { %5087 = vmatmul.msk.f32.gmra.mxu1 %vm474_vm1, %v10280_v38  ;;  %3213 = vmatpush.msrb.mxu3 %v10446_v31  ;;  %v10450_v31 = vld [vmem:[#allocation6_spill] sm:$0xff]  ;;  %v2085_v52 = vand.u32 4294901760, %v2084_v0 }
 0x209   : > { %1463 = vmatmul.f32.gmra.mxu2 %v10428_v44  ;;  %5054 = vmatmul.msk.f32.gmra.mxu0 %vm471_vm5, %v10280_v38  ;;  %v10449_v44 = vld [vmem:[#allocation72_spill] sm:$0xff]  ;;  %vm385_vm5 = vcmp.eq.s32.totalorder %v10450_v31, %v7235_v55 }
 0x20a   : > { %v1598_v35 = vpop.f32.mrf.mxu3  ;;  %3215 = vmatpush.msrb.mxu3 %v6941_v20  ;;  %v1193_v43 = vadd.f32 %v10449_v44, %v10448_v45  ;;  %3054 = vmatpush.msrb.mxu2 %v10451_v39  ;;  %v7301_v20 = vadd.f32 %v7118_v60, %v1808_v10  ;;  %v1812_v60 = vadd.f32 %v7185_v2, %v7220_v4 }
 0x20b   : > { %v1384_v34 = vpop.f32.mrf.mxu2  ;;  %v2086_v44 = vsub.f32 %v2084_v0, %v2085_v52 }
 0x20c   : > { %3217 = vmatpush.msrb.mxu3 %v6986_v53  ;;  %10452 = vst [vmem:[#allocation46_spill] sm:$0xff] %v7301_v20  ;;  %v1385_v23 = vadd.f32 %v1384_v34, %v1193_v43  ;;  %3058 = vmatpush.msrb.mxu2 %v10453_v18  ;;  %v4900_v53 = vsel %vm385_vm5, 1.0, %v10442_v40  ;;  %v7334_v43 = vand.u32 4294901760, %v747_v9  ;;  %v10458_v34 = vld [vmem:[#allocation11_spill] sm:$0xff]  ;;  %v7340_v39 = vadd.f32 %v7149_v28, %v1812_v60 }
 0x20d   : > { %v7303_v27 = vpop.f32.mrf.mxu1  ;;  %v2092_v58 = vsub.f32 %v4900_v53, %v4900_v53 }
 0x20e   : > { %v7305_v41 = vpop.f32.mrf.mxu0  ;;  %3219 = vmatpush.msrb.mxu3 %v7033_v24  ;;  %v1593_v45 = vadd.f32 %v1592_v14, %v1385_v23  ;;  %v10454_v14 = vand.u32 4294901760, %v7139_v42  ;;  %10457 = vst [vmem:[#allocation37_spill] sm:$0xff] %v7334_v43  ;;  %3356 = vmatpush.msrb.mxu0 %v7334_v43  ;;  %v7357_v18 = vsub.f32 %v747_v9, %v7334_v43  ;;  %v10461_v9 = vld [vmem:[#allocation10_spill] sm:$0xff] }
 0x20f   : > { %5088 = vmatmul.msk.f32.vlgmr.msra.gmra.mxu3 %vm382_vm3, %v10280_v38  ;;  %10459 = vst [vmem:[#allocation49_spill] sm:$0xff] %v7340_v39  ;;  %v2093_v4 = vand.u32 4294901760, %v2092_v58  ;;  %vm391_vm8 = vcmp.eq.s32.totalorder %v10461_v9, %v7235_v55  ;;  %v10480_v39 = vld [vmem:[#allocation58_spill] sm:$0xff] }
 0x210   : > { %2809 = vmatmul.f32.vlgmr.msra.gmra.mxu1 %v2085_v52  ;;  %3221 = vmatpush.msrb.mxu3 %v7084_v50  ;;  %v10455_v50 = vld [vmem:[#allocation78_spill] sm:$0xff]  ;;  %v2087_v52 = vand.u32 4294901760, %v2086_v44  ;;  %10460 = vst [vmem:[#allocation53_spill] sm:$0xff] %v7357_v18  ;;  %v10073_v53 = vand.u32 4294901760, %v7357_v18  ;;  %v10463_v44 = vld [vmem:[#allocation48_spill] sm:$0xff] }
 0x211   : > { %1468 = vmatmul.f32.gmra.mxu2 %v10443_v22  ;;  %5055 = vmatmul.msk.f32.gmra.mxu0 %vm474_vm1, %v10280_v38  ;;  %v10456_v22 = vld [vmem:[#allocation74_spill] sm:$0xff]  ;;  %vm388_vm1 = vcmp.eq.s32.totalorder %v10458_v34, %v7235_v55 }
 0x212   : > { %v1604_v24 = vpop.f32.mrf.mxu3  ;;  %3062 = vmatpush.msrb.mxu2 %v10454_v14  ;;  %3223 = vmatpush.msrb.mxu3 %v7127_v5  ;;  %v1197_v10 = vadd.f32 %v10456_v22, %v10455_v50  ;;  %v4903_v28 = vsel %vm388_vm1, 1.0, %v10442_v40  ;;  %v1816_v14 = vadd.f32 %v7215_v63, %v7271_v29  ;;  %v2094_v50 = vsub.f32 %v2092_v58, %v2093_v4 }
 0x213   : > { %v1389_v48 = vpop.f32.mrf.mxu2  ;;  %v2100_v60 = vsub.f32 %v4903_v28, %v4903_v28  ;;  %v3651_v22 = vsub.f32 %v7357_v18, %v10073_v53  ;;  %v10465_v53 = vld [vmem:[#allocation14_spill] sm:$0xff] }
 0x214   : > { %4077 = vmatpush.msra.mxu3 %v7246_v33  ;;  %v1390_v2 = vadd.f32 %v1389_v48, %v1197_v10  ;;  %v2095_v28 = vand.u32 4294901760, %v2094_v50  ;;  %vm394_vm4 = vcmp.eq.s32.totalorder %v10465_v53, %v7235_v55  ;;  %v10474_v53 = vld [vmem:[#allocation54_spill] sm:$0xff] }
 0x215   : > { %v7342_v42 = vpop.f32.mrf.mxu1  ;;  %v3652_v63 = vand.u32 4294901760, %v3651_v22 }
 0x216   : > { %4079 = vmatpush.msra.mxu3 %v7334_v43  ;;  %v7346_v5 = vpop.f32.mrf.mxu0  ;;  %v1599_v23 = vadd.f32 %v1598_v35, %v1390_v2 }
 0x217   : > { %5089 = vmatmul.msk.f32.gmra.mxu3 %vm385_vm5, %v10280_v38  ;;  %3653 = vmatpush.msrb.mxu1 %v3652_v63 }
 0x218   : > { %2815 = vmatmul.f32.gmra.mxu1 %v2093_v4  ;;  %v2101_v4 = vand.u32 4294901760, %v2100_v60 }
 0x219   : > { %2088 = vmatmul.f32.vlgmr.msra.gmra.mxu2 %v2087_v52  ;;  %2615 = vmatmul.f32.vlgmr.msra.gmra.mxu0 %v2084_v0  ;;  %v7369_v0 = vadd.f32 %v7182_v19, %v1816_v14  ;;  %v4906_v19 = vsel %vm391_vm8, 1.0, %v10442_v40 }
 0x21a   : > { %v1610_v35 = vpop.f32.mrf.mxu3  ;;  %3869 = vmatpush.msra.mxu2 %v7260_v15  ;;  %v2108_v22 = vsub.f32 %v4906_v19, %v4906_v19 }
 0x21b   : > { %v1394_v10 = vpop.f32.mrf.mxu2  ;;  %10462 = vst [vmem:[#allocation42_spill] sm:$0xff] %v7369_v0 }
 0x21c   : > { %3872 = vmatpush.msra.mxu2 %v7357_v18  ;;  %v1395_v48 = vadd.f32 %v1394_v10, %v10463_v44  ;;  %v1820_v10 = vadd.f32 %v7262_v46, %v1593_v45  ;;  %v2102_v44 = vsub.f32 %v2100_v60, %v2101_v4  ;;  %v2109_v46 = vand.u32 4294901760, %v2108_v22 }
 0x21d   : > { %v7373_v2 = vpop.f32.mrf.mxu1 }
 0x21e   : > { %v7375_v29 = vpop.f32.mrf.mxu0  ;;  %v7377_v52 = vadd.f32 %v1604_v24, %v1395_v48  ;;  %v746_v24 = vld [vmem:[%s9921_s1 + $0x168] sm:$0xff]  ;;  %v7396_v63 = vadd.f32 %v7213_v17, %v1820_v10  ;;  %v2103_v17 = vand.u32 4294901760, %v2102_v44  ;;  %v2110_v44 = vsub.f32 %v2108_v22, %v2109_v46 }
 0x21f   : > { %5090 = vmatmul.msk.f32.gmra.mxu3 %vm388_vm1, %v10280_v38  ;;  %v7391_v48 = vand.u32 4294901760, %v746_v24 }
 0x220   : > { %2821 = vmatmul.f32.gmra.mxu1 %v2101_v4  ;;  %10466 = vst [vmem:[#allocation45_spill] sm:$0xff] %v7396_v63  ;;  %v4909_v4 = vsel %vm394_vm4, 1.0, %v10442_v40 }
 0x221   : > { %2096 = vmatmul.f32.gmra.mxu2 %v2095_v28  ;;  %2620 = vmatmul.f32.gmra.mxu0 %v2092_v58  ;;  %10464 = vst [vmem:[#allocation57_spill] sm:$0xff] %v7391_v48  ;;  %v10467_v28 = vld [vmem:[#allocation50_spill] sm:$0xff]  ;;  %v7416_v10 = vsub.f32 %v746_v24, %v7391_v48  ;;  %v10469_v24 = vld [vmem:[#allocation16_spill] sm:$0xff] }
 0x222   : > { %v1616_v14 = vpop.f32.mrf.mxu3  ;;  %3358 = vmatpush.msrb.mxu0 %v7391_v48  ;;  %4081 = vmatpush.msra.mxu3 %v7391_v48  ;;  %vm397_vm9 = vcmp.eq.s32.totalorder %v10469_v24, %v7235_v55 }
 0x223   : > { %v1399_v50 = vpop.f32.mrf.mxu2  ;;  %10468 = vst [vmem:[#allocation61_spill] sm:$0xff] %v7416_v10  ;;  %3875 = vmatpush.msra.mxu2 %v7416_v10 }
 0x224   : > { %v1400_v58 = vadd.f32 %v1399_v50, %v10467_v28  ;;  %v2116_v28 = vsub.f32 %v4909_v4, %v4909_v4 }
 0x225   : > { %v7399_v7 = vpop.f32.mrf.mxu1 }
 0x226   : > { %v7403_v19 = vpop.f32.mrf.mxu0  ;;  %v7405_v45 = vadd.f32 %v1610_v35, %v1400_v58  ;;  %v10078_v35 = vand.u32 4294901760, %v7416_v10  ;;  %v1824_v58 = vadd.f32 %v7305_v41, %v1599_v23  ;;  %v2117_v23 = vand.u32 4294901760, %v2116_v28 }
 0x227   : > { %5091 = vmatmul.msk.f32.gmra.mxu3 %vm391_vm8, %v10280_v38 }
 0x228   : > { %2827 = vmatmul.f32.gmra.mxu1 %v2109_v46  ;;  %v3657_v9 = vsub.f32 %v7416_v10, %v10078_v35  ;;  %v2111_v35 = vand.u32 4294901760, %v2110_v44  ;;  %v10473_v44 = vld [vmem:[#allocation18_spill] sm:$0xff] }
 0x229   : > { %2104 = vmatmul.f32.gmra.mxu2 %v2103_v17  ;;  %2625 = vmatmul.f32.gmra.mxu0 %v2100_v60  ;;  %v7427_v17 = vadd.f32 %v7256_v57, %v1824_v58  ;;  %v10471_v60 = vld [vmem:[#allocation52_spill] sm:$0xff]  ;;  %v4912_v57 = vsel %vm397_vm9, 1.0, %v10442_v40  ;;  %vm400_vm10 = vcmp.eq.s32.totalorder %v10473_v44, %v7235_v55 }
 0x22a   : > { %v1622_v50 = vpop.f32.mrf.mxu3  ;;  %v3658_v4 = vand.u32 4294901760, %v3657_v9  ;;  %v2124_v9 = vsub.f32 %v4912_v57, %v4912_v57 }
 0x22b   : > { %v1404_v34 = vpop.f32.mrf.mxu2  ;;  %10470 = vst [vmem:[#allocation39_spill] sm:$0xff] %v7427_v17 }
 0x22c   : > { %v1405_v31 = vadd.f32 %v1404_v34, %v10471_v60  ;;  %3659 = vmatpush.msrb.mxu1 %v3658_v4 }
 0x22d   : > { %v7430_v63 = vpop.f32.mrf.mxu1 }
 0x22e   : > { %v7432_v41 = vpop.f32.mrf.mxu0  ;;  %v7434_v46 = vadd.f32 %v1616_v14, %v1405_v31  ;;  %v745_v31 = vld [vmem:[%s9921_s1 + $0x160] sm:$0xff]  ;;  %v2118_v14 = vsub.f32 %v2116_v28, %v2117_v23 }
 0x22f   : > { %5092 = vmatmul.msk.f32.gmra.mxu3 %vm394_vm4, %v10280_v38  ;;  %v7447_v58 = vand.u32 4294901760, %v745_v31 }
 0x230   : > { %2833 = vmatmul.f32.gmra.mxu1 %v2117_v23  ;;  %v2119_v23 = vand.u32 4294901760, %v2118_v14 }
 0x231   : > { %2112 = vmatmul.f32.gmra.mxu2 %v2111_v35  ;;  %2630 = vmatmul.f32.gmra.mxu0 %v2108_v22  ;;  %10472 = vst [vmem:[#allocation47_spill] sm:$0xff] %v7447_v58  ;;  %v2125_v35 = vand.u32 4294901760, %v2124_v9  ;;  %v7469_v57 = vsub.f32 %v745_v31, %v7447_v58  ;;  %v10477_v31 = vld [vmem:[#allocation56_spill] sm:$0xff] }
 0x232   : > { %v1628_v34 = vpop.f32.mrf.mxu3  ;;  %3360 = vmatpush.msrb.mxu0 %v7447_v58  ;;  %4083 = vmatpush.msra.mxu3 %v7447_v58 }
 0x233   : > { %v1409_v60 = vpop.f32.mrf.mxu2  ;;  %10475 = vst [vmem:[#allocation51_spill] sm:$0xff] %v7469_v57  ;;  %3878 = vmatpush.msra.mxu2 %v7469_v57  ;;  %v2126_v24 = vsub.f32 %v2124_v9, %v2125_v35 }
 0x234   : > { %v1410_v17 = vadd.f32 %v1409_v60, %v10474_v53  ;;  %v4915_v53 = vsel %vm400_vm10, 1.0, %v10442_v40 }
 0x235   : > { %v7452_v0 = vpop.f32.mrf.mxu1  ;;  %v2132_v60 = vsub.f32 %v4915_v53, %v4915_v53 }
 0x236   : > { %v7456_v22 = vpop.f32.mrf.mxu0  ;;  %v7458_v4 = vadd.f32 %v1622_v50, %v1410_v17  ;;  %v10086_v50 = vand.u32 4294901760, %v7469_v57 }
 0x237   : > { %5093 = vmatmul.msk.f32.gmra.mxu3 %vm397_vm9, %v10280_v38  ;;  %v2133_v43 = vand.u32 4294901760, %v2132_v60 }
 0x238   : > { %2839 = vmatmul.f32.gmra.mxu1 %v2125_v35  ;;  %v3663_v14 = vsub.f32 %v7469_v57, %v10086_v50  ;;  %v2127_v35 = vand.u32 4294901760, %v2126_v24  ;;  %v4918_v50 = vsel %vm403_vm11, 1.0, %v10442_v40  ;;  %v10479_v24 = vld [vmem:[#allocation22_spill] sm:$0xff]  ;;  %v1828_v57 = vadd.f32 %v7346_v5, %v7377_v52 }
 0x239   : > { %2120 = vmatmul.f32.gmra.mxu2 %v2119_v23  ;;  %2635 = vmatmul.f32.gmra.mxu0 %v2116_v28  ;;  %vm406_vm12 = vcmp.eq.s32.totalorder %v10479_v24, %v7235_v55 }
 0x23a   : > { %v1634_v17 = vpop.f32.mrf.mxu3  ;;  %v3664_v28 = vand.u32 4294901760, %v3663_v14  ;;  %v2140_v14 = vsub.f32 %v4918_v50, %v4918_v50 }
 0x23b   : > { %v1414_v47 = vpop.f32.mrf.mxu2 }
 0x23c   : > { %v1415_v58 = vadd.f32 %v1414_v47, %v10477_v31  ;;  %3665 = vmatpush.msrb.mxu1 %v3664_v28  ;;  %v2141_v50 = vand.u32 4294901760, %v2140_v14 }
 0x23d   : > { %v7479_v48 = vpop.f32.mrf.mxu1 }
 0x23e   : > { %v7481_v23 = vpop.f32.mrf.mxu0  ;;  %v7483_v53 = vadd.f32 %v1628_v34, %v1415_v58  ;;  %v744_v34 = vld [vmem:[%s9921_s1 + $0x158] sm:$0xff]  ;;  %v2134_v58 = vsub.f32 %v2132_v60, %v2133_v43  ;;  %v2142_v26 = vsub.f32 %v2140_v14, %v2141_v50 }
 0x23f   : > { %5094 = vmatmul.msk.f32.gmra.mxu3 %vm400_vm10, %v10280_v38  ;;  %v7496_v31 = vand.u32 4294901760, %v744_v34 }
 0x240   : > { %2845 = vmatmul.f32.gmra.mxu1 %v2133_v43  ;;  %v2135_v43 = vand.u32 4294901760, %v2134_v58  ;;  %v2143_v5 = vand.u32 4294901760, %v2142_v26  ;;  %v1832_v26 = vadd.f32 %v7375_v29, %v7405_v45 }
 0x241   : > { %2128 = vmatmul.f32.gmra.mxu2 %v2127_v35  ;;  %2640 = vmatmul.f32.gmra.mxu0 %v2124_v9  ;;  %10478 = vst [vmem:[#allocation68_spill] sm:$0xff] %v7496_v31 }
 0x242   : > { %v1640_v47 = vpop.f32.mrf.mxu3  ;;  %3362 = vmatpush.msrb.mxu0 %v7496_v31  ;;  %4085 = vmatpush.msra.mxu3 %v7496_v31 }
 0x243   : > { %v1419_v44 = vpop.f32.mrf.mxu2 }
 0x244   : > { %v1420_v1 = vadd.f32 %v1419_v44, %v10480_v39  ;;  %v4921_v39 = vsel %vm406_vm12, 1.0, %v10442_v40  ;;  %v7518_v44 = vsub.f32 %v744_v34, %v7496_v31  ;;  %v10482_v34 = vld [vmem:[#allocation24_spill] sm:$0xff] }
 0x245   : > { %v7501_v33 = vpop.f32.mrf.mxu1  ;;  %v2148_v35 = vsub.f32 %v4921_v39, %v4921_v39  ;;  %vm409_vm13 = vcmp.eq.s32.totalorder %v10482_v34, %v7235_v55  ;;  %v7533_v39 = vadd.f32 %v7303_v27, %v1828_v57  ;;  %v743_v57 = vld [vmem:[%s9921_s1 + $0x150] sm:$0xff]  ;;  %v10490_v34 = vld [vmem:[#allocation30_spill] sm:$0xff] }
 0x246   : > { %v7505_v9 = vpop.f32.mrf.mxu0  ;;  %v7507_v28 = vadd.f32 %v1634_v17, %v1420_v1  ;;  %10481 = vst [vmem:[#allocation55_spill] sm:$0xff] %v7518_v44  ;;  %v10096_v1 = vand.u32 4294901760, %v7518_v44  ;;  %3881 = vmatpush.msra.mxu2 %v7518_v44  ;;  %v4924_v52 = vsel %vm409_vm13, 1.0, %v10442_v40  ;;  %vm415_vm15 = vcmp.eq.s32.totalorder %v10490_v34, %v7235_v55 }
 0x247   : > { %5095 = vmatmul.msk.f32.gmra.mxu3 %vm403_vm11, %v10280_v38  ;;  %10484 = vst [vmem:[#allocation59_spill] sm:$0xff] %v7533_v39  ;;  %v2149_v20 = vand.u32 4294901760, %v2148_v35 }
 0x248   : > { %2851 = vmatmul.f32.gmra.mxu1 %v2141_v50  ;;  %v3669_v58 = vsub.f32 %v7518_v44, %v10096_v1 }
 0x249   : > { %2136 = vmatmul.f32.gmra.mxu2 %v2135_v43  ;;  %2645 = vmatmul.f32.gmra.mxu0 %v2132_v60  ;;  %v10483_v43 = vld [vmem:[#allocation60_spill] sm:$0xff] }
 0x24a   : > { %v1646_v17 = vpop.f32.mrf.mxu3  ;;  %v3670_v18 = vand.u32 4294901760, %v3669_v58  ;;  %v7550_v58 = vand.u32 4294901760, %v743_v57 }
 0x24b   : > { %v1424_v10 = vpop.f32.mrf.mxu2 }
 0x24c   : > { %v1425_v60 = vadd.f32 %v1424_v10, %v10483_v43  ;;  %3671 = vmatpush.msrb.mxu1 %v3670_v18  ;;  %v2156_v10 = vsub.f32 %v4924_v52, %v4924_v52  ;;  %10485 = vst [vmem:[#allocation43_spill] sm:$0xff] %v7550_v58  ;;  %v10487_v18 = vld [vmem:[#allocation62_spill] sm:$0xff]  ;;  %3364 = vmatpush.msrb.mxu0 %v7550_v58 }
 0x24d   : > { %v7530_v31 = vpop.f32.mrf.mxu1  ;;  %4087 = vmatpush.msra.mxu3 %v7550_v58 }
 0x24e   : > { %v7535_v50 = vpop.f32.mrf.mxu0  ;;  %v7537_v59 = vadd.f32 %v1640_v47, %v1425_v60  ;;  %v2150_v47 = vsub.f32 %v2148_v35, %v2149_v20  ;;  %v10486_v60 = vld [vmem:[#allocation27_spill] sm:$0xff]  ;;  %v2157_v52 = vand.u32 4294901760, %v2156_v10 }
 0x24f   : > { %5096 = vmatmul.msk.f32.gmra.mxu3 %vm406_vm12, %v10280_v38  ;;  %vm412_vm14 = vcmp.eq.s32.totalorder %v10486_v60, %v7235_v55 }
 0x250   : > { %2857 = vmatmul.f32.gmra.mxu1 %v2149_v20  ;;  %v2151_v29 = vand.u32 4294901760, %v2150_v47  ;;  %v4927_v45 = vsel %vm412_vm14, 1.0, %v10442_v40 }
 0x251   : > { %2144 = vmatmul.f32.gmra.mxu2 %v2143_v5  ;;  %2650 = vmatmul.f32.gmra.mxu0 %v2140_v14  ;;  %v7561_v14 = vadd.f32 %v7342_v42, %v1832_v26  ;;  %v7577_v42 = vsub.f32 %v743_v57, %v7550_v58  ;;  %v2164_v26 = vsub.f32 %v4927_v45, %v4927_v45  ;;  %v10491_v57 = vld [vmem:[#allocation64_spill] sm:$0xff] }
 0x252   : > { %v1652_v27 = vpop.f32.mrf.mxu3 }
 0x253   : > { %v1429_v43 = vpop.f32.mrf.mxu2  ;;  %10488 = vst [vmem:[#allocation63_spill] sm:$0xff] %v7561_v14  ;;  %3884 = vmatpush.msra.mxu2 %v7577_v42  ;;  %v2165_v58 = vand.u32 4294901760, %v2164_v26 }
 0x254   : > { %v1430_v1 = vadd.f32 %v1429_v43, %v10487_v18  ;;  %10489 = vst [vmem:[#allocation66_spill] sm:$0xff] %v7577_v42  ;;  %v2158_v43 = vsub.f32 %v2156_v10, %v2157_v52 }
 0x255   : > { %v7557_v5 = vpop.f32.mrf.mxu1 }
 0x256   : > { %v7564_v20 = vpop.f32.mrf.mxu0  ;;  %v7566_v24 = vadd.f32 %v1646_v17, %v1430_v1  ;;  %v10100_v1 = vand.u32 4294901760, %v7577_v42 }
 0x257   : > { %5097 = vmatmul.msk.f32.gmra.mxu3 %vm409_vm13, %v10280_v38 }
 0x258   : > { %2863 = vmatmul.f32.gmra.mxu1 %v2157_v52  ;;  %v3675_v47 = vsub.f32 %v7577_v42, %v10100_v1  ;;  %v2159_v1 = vand.u32 4294901760, %v2158_v43  ;;  %v10493_v43 = vld [vmem:[#allocation33_spill] sm:$0xff] }
 0x259   : > { %2152 = vmatmul.f32.gmra.mxu2 %v2151_v29  ;;  %2655 = vmatmul.f32.gmra.mxu0 %v2148_v35  ;;  %v1836_v29 = vadd.f32 %v7403_v19, %v7434_v46  ;;  %vm418_vm0 = vcmp.eq.s32.totalorder %v10493_v43, %v7235_v55 }
 0x25a   : > { %v1658_v17 = vpop.f32.mrf.mxu3  ;;  %v3676_v35 = vand.u32 4294901760, %v3675_v47 }
 0x25b   : > { %v1434_v18 = vpop.f32.mrf.mxu2  ;;  %v7604_v47 = vadd.f32 %v7373_v2, %v1836_v29  ;;  %v4933_v29 = vsel %vm418_vm0, 1.0, %v10442_v40 }
 0x25c   : > { %v1435_v14 = vadd.f32 %v1434_v18, %v10491_v57  ;;  %v4930_v18 = vsel %vm415_vm15, 1.0, %v10442_v40  ;;  %3677 = vmatpush.msrb.mxu1 %v3676_v35  ;;  %v10495_v35 = vld [vmem:[#allocation65_spill] sm:$0xff] }
 0x25d   : > { %v7587_v39 = vpop.f32.mrf.mxu1  ;;  %10492 = vst [vmem:[#allocation70_spill] sm:$0xff] %v7604_v47  ;;  %v2172_v46 = vsub.f32 %v4930_v18, %v4930_v18 }
 0x25e   : > { %v7591_v45 = vpop.f32.mrf.mxu0  ;;  %v7593_v52 = vadd.f32 %v1652_v27, %v1435_v14  ;;  %v742_v27 = vld [vmem:[%s9921_s1 + $0x148] sm:$0xff]  ;;  %v2166_v14 = vsub.f32 %v2164_v26, %v2165_v58 }
 0x25f   : > { %5098 = vmatmul.msk.f32.gmra.mxu3 %vm412_vm14, %v10280_v38  ;;  %v7611_v57 = vand.u32 4294901760, %v742_v27 }
 0x260   : > { %2869 = vmatmul.f32.gmra.mxu1 %v2165_v58  ;;  %v2173_v58 = vand.u32 4294901760, %v2172_v46 }
 0x261   : > { %2160 = vmatmul.f32.gmra.mxu2 %v2159_v1  ;;  %2660 = vmatmul.f32.gmra.mxu0 %v2156_v10  ;;  %10494 = vst [vmem:[#allocation76_spill] sm:$0xff] %v7611_v57  ;;  %v1840_v10 = vadd.f32 %v7432_v41, %v7458_v4  ;;  %v7633_v41 = vsub.f32 %v742_v27, %v7611_v57  ;;  %v10498_v27 = vld [vmem:[#allocation36_spill] sm:$0xff] }
 0x262   : > { %v1664_v19 = vpop.f32.mrf.mxu3  ;;  %3366 = vmatpush.msrb.mxu0 %v7611_v57  ;;  %4089 = vmatpush.msra.mxu3 %v7611_v57  ;;  %vm421_vm2 = vcmp.eq.s32.totalorder %v10498_v27, %v7235_v55 }
 0x263   : > { %v1439_v60 = vpop.f32.mrf.mxu2  ;;  %10496 = vst [vmem:[#allocation44_spill] sm:$0xff] %v7633_v41  ;;  %v7636_v4 = vadd.f32 %v7399_v7, %v1840_v10  ;;  %3887 = vmatpush.msra.mxu2 %v7633_v41  ;;  %v10499_v7 = vld [vmem:[#allocation67_spill] sm:$0xff] }
 0x264   : > { %v1440_v42 = vadd.f32 %v1439_v60, %v10495_v35  ;;  %v2167_v60 = vand.u32 4294901760, %v2166_v14  ;;  %v10105_v35 = vand.u32 4294901760, %v7633_v41 }
 0x265   : > { %v7614_v2 = vpop.f32.mrf.mxu1  ;;  %10497 = vst [vmem:[#allocation80_spill] sm:$0xff] %v7636_v4 }
 0x266   : > { %v7620_v1 = vpop.f32.mrf.mxu0  ;;  %v7626_v18 = vadd.f32 %v1658_v17, %v1440_v42  ;;  %v2180_v42 = vsub.f32 %v4933_v29, %v4933_v29  ;;  %v2174_v17 = vsub.f32 %v2172_v46, %v2173_v58  ;;  %v3681_v14 = vsub.f32 %v7633_v41, %v10105_v35 }
 0x267   : > { %5099 = vmatmul.msk.f32.gmra.mxu3 %vm415_vm15, %v10280_v38 }
 0x268   : > { %2875 = vmatmul.f32.gmra.mxu1 %v2173_v58  ;;  %v2181_v57 = vand.u32 4294901760, %v2180_v42  ;;  %v2175_v35 = vand.u32 4294901760, %v2174_v17 }
 0x269   : > { %2168 = vmatmul.f32.gmra.mxu2 %v2167_v60  ;;  %2665 = vmatmul.f32.gmra.mxu0 %v2164_v26  ;;  %v3682_v26 = vand.u32 4294901760, %v3681_v14  ;;  %v1844_v60 = vadd.f32 %v7456_v22, %v7483_v53 }
 0x26a   : > { %v1670_v47 = vpop.f32.mrf.mxu3 }
 0x26b   : > { %v1444_v34 = vpop.f32.mrf.mxu2  ;;  %3683 = vmatpush.msrb.mxu1 %v3682_v26  ;;  %v7663_v14 = vadd.f32 %v7430_v63, %v1844_v60  ;;  %v10503_v26 = vld [vmem:[#allocation69_spill] sm:$0xff] }
 0x26c   : > { %v1445_v10 = vadd.f32 %v1444_v34, %v10499_v7  ;;  %v4936_v34 = vsel %vm421_vm2, 1.0, %v10442_v40  ;;  %v2182_v7 = vsub.f32 %v2180_v42, %v2181_v57 }
 0x26d   : > { %v7646_v4 = vpop.f32.mrf.mxu1  ;;  %10500 = vst [vmem:[#allocation75_spill] sm:$0xff] %v7663_v14  ;;  %v2188_v53 = vsub.f32 %v4936_v34, %v4936_v34 }
 0x26e   : > { %v7650_v29 = vpop.f32.mrf.mxu0  ;;  %v7652_v58 = vadd.f32 %v1664_v19, %v1445_v10  ;;  %v741_v19 = vld [vmem:[%s9921_s1 + $0x140] sm:$0xff] }
 0x26f   : > { %5100 = vmatmul.msk.f32.gmra.mxu3 %vm418_vm0, %v10280_v38  ;;  %v7668_v17 = vand.u32 4294901760, %v741_v19  ;;  %v10502_v10 = vld [vmem:[#allocation38_spill] sm:$0xff] }
 0x270   : > { %2881 = vmatmul.f32.gmra.mxu1 %v2181_v57  ;;  %vm10114_vm6 = vcmp.eq.s32.totalorder %v10502_v10, %v7235_v55  ;;  %v10507_v10 = vld [vmem:[#allocation8_spill] sm:$0xff] }
 0x271   : > { %2176 = vmatmul.f32.gmra.mxu2 %v2175_v35  ;;  %2670 = vmatmul.f32.gmra.mxu0 %v2172_v46  ;;  %10501 = vst [vmem:[#allocation72_spill] sm:$0xff] %v7668_v17  ;;  %v2189_v35 = vand.u32 4294901760, %v2188_v53  ;;  %v4939_v57 = vsel %vm10114_vm6, 1.0, %v10442_v40  ;;  %v7690_v34 = vsub.f32 %v741_v19, %v7668_v17  ;;  %v10504_v19 = vld [vmem:[#allocation41_spill] sm:$0xff] }
 0x272   : > { %v1676_v22 = vpop.f32.mrf.mxu3  ;;  %3368 = vmatpush.msrb.mxu0 %v7668_v17  ;;  %4091 = vmatpush.msra.mxu3 %v7668_v17  ;;  %v2196_v14 = vsub.f32 %v4939_v57, %v4939_v57  ;;  %vm10116_vm7 = vcmp.eq.s32.totalorder %v10504_v19, %v7235_v55 }
 0x273   : > { %v1449_v43 = vpop.f32.mrf.mxu2  ;;  %3890 = vmatpush.msra.mxu2 %v7690_v34 }
 0x274   : > { %v1450_v41 = vadd.f32 %v1449_v43, %v10503_v26  ;;  %v2183_v43 = vand.u32 4294901760, %v2182_v7  ;;  %v10112_v26 = vand.u32 4294901760, %v7690_v34 }
 0x275   : > { %v7673_v63 = vpop.f32.mrf.mxu1 }
 0x276   : > { %v7677_v46 = vpop.f32.mrf.mxu0  ;;  %v7683_v60 = vadd.f32 %v1670_v47, %v1450_v41  ;;  %v1848_v47 = vadd.f32 %v7481_v23, %v7507_v28  ;;  %v2190_v41 = vsub.f32 %v2188_v53, %v2189_v35  ;;  %v3687_v7 = vsub.f32 %v7690_v34, %v10112_v26 }
 0x277   : > { %5101 = vmatmul.msk.f32.gmra.mxu3 %vm421_vm2, %v10280_v38  ;;  %v2197_v28 = vand.u32 4294901760, %v2196_v14 }
 0x278   : > { %2887 = vmatmul.f32.gmra.mxu1 %v2189_v35  ;;  %v3688_v15 = vand.u32 4294901760, %v3687_v7  ;;  %v4942_v35 = vsel %vm10116_vm7, 1.0, %v10442_v40  ;;  %v740_v7 = vld [vmem:[%s9921_s1 + $0x138] sm:$0xff] }
 0x279   : > { %2184 = vmatmul.f32.gmra.mxu2 %v2183_v43  ;;  %2675 = vmatmul.f32.gmra.mxu0 %v2180_v42  ;;  %v7702_v42 = vadd.f32 %v7452_v0, %v1848_v47  ;;  %v10506_v43 = vld [vmem:[#allocation71_spill] sm:$0xff]  ;;  %v2191_v0 = vand.u32 4294901760, %v2190_v41 }
 0x27a   : > { %v1682_v44 = vpop.f32.mrf.mxu3  ;;  %3689 = vmatpush.msrb.mxu1 %v3688_v15 }
 0x27b   : > { %v1454_v27 = vpop.f32.mrf.mxu2  ;;  %10505 = vst [vmem:[#allocation78_spill] sm:$0xff] %v7702_v42 }
 0x27c   : > { %v1455_v57 = vadd.f32 %v1454_v27, %v10506_v43  ;;  %v2204_v27 = vsub.f32 %v4942_v35, %v4942_v35  ;;  %v2198_v43 = vsub.f32 %v2196_v14, %v2197_v28 }
 0x27d   : > { %v7705_v17 = vpop.f32.mrf.mxu1 }
 0x27e   : > { %v7707_v23 = vpop.f32.mrf.mxu0  ;;  %v7713_v26 = vadd.f32 %v1676_v22, %v1455_v57  ;;  %v1852_v22 = vadd.f32 %v7505_v9, %v7537_v59  ;;  %v7724_v57 = vand.u32 4294901760, %v740_v7  ;;  %v2205_v59 = vand.u32 4294901760, %v2204_v27 }
 0x27f   : > { %5102 = vmatmul.msk.f32.gmra.mxu3 %vm10114_vm6, %v10280_v38  ;;  %vm10118_vm6 = vcmp.eq.s32.totalorder %v10507_v10, %v7235_v55 }
 0x280   : > { %2893 = vmatmul.f32.gmra.mxu1 %v2197_v28  ;;  %v7729_v15 = vadd.f32 %v7479_v48, %v1852_v22  ;;  %3370 = vmatpush.msrb.mxu0 %v7724_v57  ;;  %v2199_v48 = vand.u32 4294901760, %v2198_v43  ;;  %v7749_v28 = vsub.f32 %v740_v7, %v7724_v57  ;;  %v2206_v43 = vsub.f32 %v2204_v27, %v2205_v59  ;;  %v10511_v7 = vld [vmem:[#allocation77_spill] sm:$0xff] }
 0x281   : > { %2192 = vmatmul.f32.gmra.mxu2 %v2191_v0  ;;  %2680 = vmatmul.f32.gmra.mxu0 %v2188_v53  ;;  %v10509_v53 = vld [vmem:[#allocation73_spill] sm:$0xff] }
 0x282   : > { %v1688_v47 = vpop.f32.mrf.mxu3  ;;  %10508 = vst [vmem:[#allocation74_spill] sm:$0xff] %v7729_v15  ;;  %4093 = vmatpush.msra.mxu3 %v7724_v57  ;;  %3893 = vmatpush.msra.mxu2 %v7749_v28 }
 0x283   : > { %v1459_v42 = vpop.f32.mrf.mxu2 }
 0x284   : > { %v1460_v41 = vadd.f32 %v1459_v42, %v10509_v53  ;;  %v4945_v42 = vsel %vm10118_vm6, 1.0, %v10442_v40 }
 0x285   : > { %v7732_v35 = vpop.f32.mrf.mxu1  ;;  %v2212_v53 = vsub.f32 %v4945_v42, %v4945_v42 }
 0x286   : > { %10510 = vst [vmem:[#allocation48_spill] sm:$0xff] %v7732_v35  ;;  %v7736_v0 = vpop.f32.mrf.mxu0  ;;  %v7738_v9 = vadd.f32 %v1682_v44, %v1460_v41  ;;  %v10117_v44 = vand.u32 4294901760, %v7749_v28  ;;  %v1856_v41 = vadd.f32 %v7535_v50, %v7566_v24 }
 0x287   : > { %5103 = vmatmul.msk.f32.gmra.mxu3 %vm10116_vm7, %v10280_v38  ;;  %vm10119_vm7 = vcmp.eq.s32.totalorder %v5925_v56, %v7235_v55  ;;  %v2213_v50 = vand.u32 4294901760, %v2212_v53 }
 0x288   : > { %2899 = vmatmul.f32.gmra.mxu1 %v2205_v59  ;;  %v3693_v35 = vsub.f32 %v7749_v28, %v10117_v44  ;;  %v2207_v44 = vand.u32 4294901760, %v2206_v43 }
 0x289   : > { %2200 = vmatmul.f32.gmra.mxu2 %v2199_v48  ;;  %2685 = vmatmul.f32.gmra.mxu0 %v2196_v14  ;;  %v7761_v14 = vadd.f32 %v7501_v33, %v1856_v41  ;;  %v4948_v33 = vsel %vm10119_vm7, 1.0, %v10442_v40  ;;  %v1860_v41 = vadd.f32 %v7564_v20, %v7593_v52 }
 0x28a   : > { %v1694_v22 = vpop.f32.mrf.mxu3  ;;  %v3694_v15 = vand.u32 4294901760, %v3693_v35  ;;  %v2220_v35 = vsub.f32 %v4948_v33, %v4948_v33 }
 0x28c   : > { %v1464_v19 = vpop.f32.mrf.mxu2  ;;  %3695 = vmatpush.msrb.mxu1 %v3694_v15  ;;  %v7788_v15 = vadd.f32 %v7530_v31, %v1860_v41  ;;  %v2221_v20 = vand.u32 4294901760, %v2220_v35 }
 0x28d   : > { %v1465_v48 = vadd.f32 %v1464_v19, %v10511_v7  ;;  %v7764_v42 = vpop.f32.mrf.mxu1  ;;  %v2214_v7 = vsub.f32 %v2212_v53, %v2213_v50 }
 0x28e   : > { %10512 = vst [vmem:[#allocation50_spill] sm:$0xff] %v7764_v42  ;;  %v7766_v24 = vpop.f32.mrf.mxu0 }
 0x28f   : > { %v7768_v59 = vadd.f32 %v1688_v47, %v1465_v48  ;;  %5104 = vmatmul.msk.f32.gmra.mxu3 %vm10118_vm6, %v10280_v38  ;;  %v739_v47 = vld [vmem:[%s9921_s1 + $0x130] sm:$0xff]  ;;  %vm10121_vm6 = vcmp.eq.s32.totalorder %v5931_v61, %v7235_v55  ;;  %v2215_v31 = vand.u32 4294901760, %v2214_v7  ;;  %v2222_v7 = vsub.f32 %v2220_v35, %v2221_v20 }
 0x290   : > { %2905 = vmatmul.f32.gmra.mxu1 %v2213_v50  ;;  %v7783_v43 = vand.u32 4294901760, %v739_v47  ;;  %v4951_v50 = vsel %vm10121_vm6, 1.0, %v10442_v40 }
 0x291   : > { %2208 = vmatmul.f32.gmra.mxu2 %v2207_v44  ;;  %2690 = vmatmul.f32.gmra.mxu0 %v2204_v27  ;;  %v10513_v27 = vld [vmem:[#allocation79_spill] sm:$0xff] }
 0x292   : > { %v2438_v19 = vpop.f32.mrf.mxu3  ;;  %3372 = vmatpush.msrb.mxu0 %v7783_v43  ;;  %4095 = vmatpush.msra.mxu3 %v7783_v43  ;;  %v7808_v41 = vsub.f32 %v739_v47, %v7783_v43 }
 0x294   : > { %v1469_v48 = vpop.f32.mrf.mxu2  ;;  %3896 = vmatpush.msra.mxu2 %v7808_v41 }
 0x295   : > { %v1470_v44 = vadd.f32 %v1469_v48, %v10513_v27  ;;  %v7791_v33 = vpop.f32.mrf.mxu1  ;;  %v2228_v27 = vsub.f32 %v4951_v50, %v4951_v50 }
 0x296   : > { %10514 = vst [vmem:[#allocation52_spill] sm:$0xff] %v7791_v33  ;;  %v7795_v42 = vpop.f32.mrf.mxu0 }
 0x297   : > { %10515 = vst [vmem:[#allocation54_spill] sm:$0xff] %v7795_v42  ;;  %v7797_v52 = vadd.f32 %v1694_v22, %v1470_v44  ;;  %5105 = vmatmul.msk.f32.gmra.mxu3 %vm10119_vm7, %v10280_v38  ;;  %v10120_v22 = vand.u32 4294901760, %v7808_v41  ;;  %v1864_v44 = vadd.f32 %v7591_v45, %v7626_v18  ;;  %vm10122_vm7 = vcmp.eq.s32.totalorder %v5912_v49, %v7235_v55 }
 0x298   : > { %2911 = vmatmul.f32.gmra.mxu1 %v2221_v20  ;;  %v2229_v18 = vand.u32 4294901760, %v2228_v27 }
 0x299   : > { %2216 = vmatmul.f32.gmra.mxu2 %v2215_v31  ;;  %2695 = vmatmul.f32.gmra.mxu0 %v2212_v53  ;;  %v3699_v33 = vsub.f32 %v7808_v41, %v10120_v22  ;;  %v7820_v53 = vadd.f32 %v7557_v5, %v1864_v44  ;;  %v2223_v22 = vand.u32 4294901760, %v2222_v7  ;;  %v4954_v5 = vsel %vm10122_vm7, 1.0, %v10442_v40 }
 0x29a   : > { %v2442_v48 = vpop.f32.mrf.mxu3  ;;  %v2230_v44 = vsub.f32 %v2228_v27, %v2229_v18 }
 0x29b   : > { %v3700_v50 = vand.u32 4294901760, %v3699_v33  ;;  %v1868_v33 = vadd.f32 %v7620_v1, %v7652_v58 }
 0x29c   : > { %v2089_v42 = vpop.f32.mrf.mxu2 }
 0x29d   : > { %v2090_v47 = vadd.f32 %v2089_v42, %v6925_v51  ;;  %v7823_v31 = vpop.f32.mrf.mxu1  ;;  %3701 = vmatpush.msrb.mxu1 %v3700_v50  ;;  %v2236_v42 = vsub.f32 %v4954_v5, %v4954_v5  ;;  %v7847_v50 = vadd.f32 %v7587_v39, %v1868_v33  ;;  %v2231_v39 = vand.u32 4294901760, %v2230_v44 }
 0x29e   : > { %10516 = vst [vmem:[#allocation56_spill] sm:$0xff] %v7823_v31  ;;  %v7825_v45 = vpop.f32.mrf.mxu0 }
 0x29f   : > { %v7827_v20 = vadd.f32 %v2438_v19, %v2090_v47  ;;  %5106 = vmatmul.msk.f32.gmra.mxu3 %vm10121_vm6, %v10280_v38  ;;  %v738_v19 = vld [vmem:[%s9921_s1 + $0x128] sm:$0xff]  ;;  %vm10124_vm6 = vcmp.eq.s32.totalorder %v5972_v36, %v7235_v55  ;;  %v2237_v1 = vand.u32 4294901760, %v2236_v42 }
 0x2a0   : > { %2917 = vmatmul.f32.gmra.mxu1 %v2229_v18  ;;  %v7842_v7 = vand.u32 4294901760, %v738_v19 }
 0x2a1   : > { %2224 = vmatmul.f32.gmra.mxu2 %v2223_v22  ;;  %2700 = vmatmul.f32.gmra.mxu0 %v2220_v35  ;;  %v2238_v44 = vsub.f32 %v2236_v42, %v2237_v1 }
 0x2a2   : > { %v2446_v51 = vpop.f32.mrf.mxu3  ;;  %3374 = vmatpush.msrb.mxu0 %v7842_v7  ;;  %4097 = vmatpush.msra.mxu3 %v7842_v7  ;;  %v7867_v18 = vsub.f32 %v738_v19, %v7842_v7 }
 0x2a4   : > { %v2097_v47 = vpop.f32.mrf.mxu2  ;;  %3899 = vmatpush.msra.mxu2 %v7867_v18 }
 0x2a5   : > { %v2098_v35 = vadd.f32 %v2097_v47, %v6945_v37  ;;  %v7850_v22 = vpop.f32.mrf.mxu1  ;;  %v4957_v37 = vsel %vm10124_vm6, 1.0, %v10442_v40 }
 0x2a6   : > { %10517 = vst [vmem:[#allocation58_spill] sm:$0xff] %v7850_v22  ;;  %v7854_v5 = vpop.f32.mrf.mxu0  ;;  %v2244_v47 = vsub.f32 %v4957_v37, %v4957_v37 }
 0x2a7   : > { %v7856_v58 = vadd.f32 %v2442_v48, %v2098_v35  ;;  %5107 = vmatmul.msk.f32.gmra.mxu3 %vm10122_vm7, %v10280_v38  ;;  %v10123_v48 = vand.u32 4294901760, %v7867_v18  ;;  %v1872_v35 = vadd.f32 %v7650_v29, %v7683_v60  ;;  %vm10125_vm7 = vcmp.eq.s32.totalorder %v6012_v6, %v7235_v55 }
 0x2a8   : > { %2923 = vmatmul.f32.gmra.mxu1 %v2237_v1  ;;  %v2245_v60 = vand.u32 4294901760, %v2244_v47 }
 0x2a9   : > { %2232 = vmatmul.f32.gmra.mxu2 %v2231_v39  ;;  %2705 = vmatmul.f32.gmra.mxu0 %v2228_v27  ;;  %v3705_v22 = vsub.f32 %v7867_v18, %v10123_v48  ;;  %v7879_v27 = vadd.f32 %v7614_v2, %v1872_v35  ;;  %v2239_v48 = vand.u32 4294901760, %v2238_v44  ;;  %v4960_v2 = vsel %vm10125_vm7, 1.0, %v10442_v40 }
 0x2aa   : > { %v2450_v33 = vpop.f32.mrf.mxu3  ;;  %v2246_v35 = vsub.f32 %v2244_v47, %v2245_v60 }
 0x2ab   : > { %v3706_v37 = vand.u32 4294901760, %v3705_v22  ;;  %v1876_v22 = vadd.f32 %v7677_v46, %v7713_v26 }
 0x2ac   : > { %v2105_v31 = vpop.f32.mrf.mxu2 }
 0x2ad   : > { %v2106_v19 = vadd.f32 %v2105_v31, %v6970_v11  ;;  %v7882_v39 = vpop.f32.mrf.mxu1  ;;  %3707 = vmatpush.msrb.mxu1 %v3706_v37  ;;  %v2252_v31 = vsub.f32 %v4960_v2, %v4960_v2  ;;  %v7906_v37 = vadd.f32 %v7646_v4, %v1876_v22  ;;  %v2247_v4 = vand.u32 4294901760, %v2246_v35 }
 0x2ae   : > { %10518 = vst [vmem:[#allocation60_spill] sm:$0xff] %v7882_v39  ;;  %v7884_v29 = vpop.f32.mrf.mxu0 }
 0x2af   : > { %v7886_v1 = vadd.f32 %v2446_v51, %v2106_v19  ;;  %5108 = vmatmul.msk.f32.gmra.mxu3 %vm10124_vm6, %v10280_v38  ;;  %v737_v51 = vld [vmem:[%s9921_s1 + $0x120] sm:$0xff]  ;;  %vm10127_vm6 = vcmp.eq.s32.totalorder %v6036_v21, %v7235_v55  ;;  %v2253_v46 = vand.u32 4294901760, %v2252_v31 }
 0x2b0   : > { %2929 = vmatmul.f32.gmra.mxu1 %v2245_v60  ;;  %v7901_v44 = vand.u32 4294901760, %v737_v51 }
 0x2b1   : > { %2240 = vmatmul.f32.gmra.mxu2 %v2239_v48  ;;  %2710 = vmatmul.f32.gmra.mxu0 %v2236_v42  ;;  %v2254_v35 = vsub.f32 %v2252_v31, %v2253_v46 }
 0x2b2   : > { %v2454_v11 = vpop.f32.mrf.mxu3  ;;  %3376 = vmatpush.msrb.mxu0 %v7901_v44  ;;  %4099 = vmatpush.msra.mxu3 %v7901_v44  ;;  %v7926_v60 = vsub.f32 %v737_v51, %v7901_v44 }
 0x2b4   : > { %v2113_v19 = vpop.f32.mrf.mxu2  ;;  %3902 = vmatpush.msra.mxu2 %v7926_v60 }
 0x2b5   : > { %v2114_v42 = vadd.f32 %v2113_v19, %v6990_v54  ;;  %v7909_v48 = vpop.f32.mrf.mxu1  ;;  %v4963_v54 = vsel %vm10127_vm6, 1.0, %v10442_v40 }
 0x2b6   : > { %10519 = vst [vmem:[#allocation62_spill] sm:$0xff] %v7909_v48  ;;  %v7913_v2 = vpop.f32.mrf.mxu0  ;;  %v2260_v19 = vsub.f32 %v4963_v54, %v4963_v54 }
 0x2b7   : > { %10520 = vst [vmem:[#allocation64_spill] sm:$0xff] %v7913_v2  ;;  %v7915_v26 = vadd.f32 %v2450_v33, %v2114_v42  ;;  %5109 = vmatmul.msk.f32.gmra.mxu3 %vm10125_vm7, %v10280_v38  ;;  %v10126_v33 = vand.u32 4294901760, %v7926_v60  ;;  %v1880_v42 = vadd.f32 %v7707_v23, %v7738_v9  ;;  %vm10128_vm7 = vcmp.eq.s32.totalorder %v10372_v13, %v7235_v55 }
 0x2b8   : > { %2935 = vmatmul.f32.gmra.mxu1 %v2253_v46  ;;  %v2261_v9 = vand.u32 4294901760, %v2260_v19 }
 0x2b9   : > { %2248 = vmatmul.f32.gmra.mxu2 %v2247_v4  ;;  %2715 = vmatmul.f32.gmra.mxu0 %v2244_v47  ;;  %v3711_v48 = vsub.f32 %v7926_v60, %v10126_v33  ;;  %v7938_v47 = vadd.f32 %v7673_v63, %v1880_v42  ;;  %v2255_v33 = vand.u32 4294901760, %v2254_v35  ;;  %v4966_v63 = vsel %vm10128_vm7, 1.0, %v10442_v40 }
 0x2ba   : > { %v2458_v22 = vpop.f32.mrf.mxu3  ;;  %v2262_v42 = vsub.f32 %v2260_v19, %v2261_v9 }
 0x2bb   : > { %v3712_v54 = vand.u32 4294901760, %v3711_v48  ;;  %v1884_v48 = vadd.f32 %v7736_v0, %v7768_v59 }
 0x2bc   : > { %v2121_v39 = vpop.f32.mrf.mxu2 }
 0x2bd   : > { %v2122_v51 = vadd.f32 %v2121_v39, %v7015_v32  ;;  %v7941_v4 = vpop.f32.mrf.mxu1  ;;  %3713 = vmatpush.msrb.mxu1 %v3712_v54  ;;  %v2268_v39 = vsub.f32 %v4966_v63, %v4966_v63  ;;  %v7965_v54 = vadd.f32 %v7705_v17, %v1884_v48  ;;  %v2263_v17 = vand.u32 4294901760, %v2262_v42 }
 0x2be   : > { %10521 = vst [vmem:[#allocation65_spill] sm:$0xff] %v7941_v4  ;;  %v7943_v23 = vpop.f32.mrf.mxu0  ;;  %v10527_v4 = vld [vmem:[#allocation21_spill] sm:$0xff] }
 0x2bf   : > { %10522 = vst [vmem:[#allocation67_spill] sm:$0xff] %v7943_v23  ;;  %v7945_v46 = vadd.f32 %v2454_v11, %v2122_v51  ;;  %5110 = vmatmul.msk.f32.gmra.mxu3 %vm10127_vm6, %v10280_v38  ;;  %v736_v11 = vld [vmem:[%s9921_s1 + $0x118] sm:$0xff]  ;;  %vm10130_vm6 = vcmp.eq.s32.totalorder %v10377_v62, %v7235_v55  ;;  %v2269_v0 = vand.u32 4294901760, %v2268_v39 }
 0x2c0   : > { %2941 = vmatmul.f32.gmra.mxu1 %v2261_v9  ;;  %v7960_v35 = vand.u32 4294901760, %v736_v11 }
 0x2c1   : > { %10523 = vst [vmem:[#allocation69_spill] sm:$0xff] %v7945_v46  ;;  %2256 = vmatmul.f32.gmra.mxu2 %v2255_v33  ;;  %2720 = vmatmul.f32.gmra.mxu0 %v2252_v31  ;;  %v10562_v46 = vld [vmem:[#allocation55_spill] sm:$0xff] }
 0x2c2   : > { %v2462_v32 = vpop.f32.mrf.mxu3  ;;  %3378 = vmatpush.msrb.mxu0 %v7960_v35  ;;  %4101 = vmatpush.msra.mxu3 %v7960_v35  ;;  %v7985_v9 = vsub.f32 %v736_v11, %v7960_v35  ;;  %v10528_v11 = vld [vmem:[#allocation25_spill] sm:$0xff] }
 0x2c4   : > { %v2129_v51 = vpop.f32.mrf.mxu2  ;;  %3905 = vmatpush.msra.mxu2 %v7985_v9 }
 0x2c5   : > { %v2130_v31 = vadd.f32 %v2129_v51, %v7037_v12  ;;  %v7968_v33 = vpop.f32.mrf.mxu1  ;;  %v4969_v12 = vsel %vm10130_vm6, 1.0, %v10442_v40 }
 0x2c6   : > { %10524 = vst [vmem:[#allocation71_spill] sm:$0xff] %v7968_v33  ;;  %v7972_v63 = vpop.f32.mrf.mxu0  ;;  %v2276_v51 = vsub.f32 %v4969_v12, %v4969_v12 }
 0x2c7   : > { %10525 = vst [vmem:[#allocation73_spill] sm:$0xff] %v7972_v63  ;;  %v7974_v59 = vadd.f32 %v2458_v22, %v2130_v31  ;;  %5111 = vmatmul.msk.f32.gmra.mxu3 %vm10128_vm7, %v10280_v38  ;;  %v10129_v22 = vand.u32 4294901760, %v7985_v9  ;;  %v2270_v31 = vsub.f32 %v2268_v39, %v2269_v0  ;;  %vm10132_vm7 = vcmp.eq.s32.totalorder %v10527_v4, %v7235_v55 }
 0x2c8   : > { %2947 = vmatmul.f32.gmra.mxu1 %v2269_v0 }
 0x2c9   : > { %10526 = vst [vmem:[#allocation77_spill] sm:$0xff] %v7974_v59  ;;  %2264 = vmatmul.f32.gmra.mxu2 %v2263_v17  ;;  %2725 = vmatmul.f32.gmra.mxu0 %v2260_v19  ;;  %v3717_v42 = vsub.f32 %v7985_v9, %v10129_v22  ;;  %v2277_v59 = vand.u32 4294901760, %v2276_v51  ;;  %v2271_v0 = vand.u32 4294901760, %v2270_v31  ;;  %v4972_v22 = vsel %vm10132_vm7, 1.0, %v10442_v40  ;;  %v10532_v31 = vld [vmem:[#allocation23_spill] sm:$0xff] }
 0x2ca   : > { %v2466_v48 = vpop.f32.mrf.mxu3 }
 0x2cb   : > { %v3718_v19 = vand.u32 4294901760, %v3717_v42  ;;  %v2284_v42 = vsub.f32 %v4972_v22, %v4972_v22 }
 0x2cc   : > { %v2137_v33 = vpop.f32.mrf.mxu2 }
 0x2cd   : > { %v2138_v63 = vadd.f32 %v2137_v33, %v10528_v11  ;;  %v7995_v23 = vpop.f32.mrf.mxu1  ;;  %3719 = vmatpush.msrb.mxu1 %v3718_v19  ;;  %v2285_v22 = vand.u32 4294901760, %v2284_v42 }
 0x2ce   : > { %10529 = vst [vmem:[#allocation79_spill] sm:$0xff] %v7995_v23  ;;  %v7997_v17 = vpop.f32.mrf.mxu0 }
 0x2cf   : > { %10530 = vst [vmem:[#allocation25_spill] sm:$0xff] %v7997_v17  ;;  %v7999_v12 = vadd.f32 %v2462_v32, %v2138_v63  ;;  %5112 = vmatmul.msk.f32.gmra.mxu3 %vm10130_vm6, %v10280_v38  ;;  %v735_v32 = vld [vmem:[%s9921_s1 + $0x110] sm:$0xff]  ;;  %v2278_v63 = vsub.f32 %v2276_v51, %v2277_v59  ;;  %vm10136_vm6 = vcmp.eq.s32.totalorder %v10532_v31, %v7235_v55 }
 0x2d0   : > { %2953 = vmatmul.f32.gmra.mxu1 %v2277_v59  ;;  %v8012_v11 = vand.u32 4294901760, %v735_v32  ;;  %v10533_v17 = vld [vmem:[#allocation28_spill] sm:$0xff] }
 0x2d1   : > { %10531 = vst [vmem:[#allocation81_spill] sm:$0xff] %v7999_v12  ;;  %2272 = vmatmul.f32.gmra.mxu2 %v2271_v0  ;;  %2730 = vmatmul.f32.gmra.mxu0 %v2268_v39  ;;  %v2279_v59 = vand.u32 4294901760, %v2278_v63 }
 0x2d2   : > { %v2470_v33 = vpop.f32.mrf.mxu3  ;;  %3380 = vmatpush.msrb.mxu0 %v8012_v11  ;;  %4103 = vmatpush.msra.mxu3 %v8012_v11 }
 0x2d4   : > { %v2145_v23 = vpop.f32.mrf.mxu2 }
 0x2d5   : > { %v2146_v12 = vadd.f32 %v2145_v23, %v10533_v17  ;;  %v8017_v62 = vpop.f32.mrf.mxu1  ;;  %v4975_v23 = vsel %vm10136_vm6, 1.0, %v10442_v40  ;;  %v8034_v17 = vsub.f32 %v735_v32, %v8012_v11 }
 0x2d6   : > { %10534 = vst [vmem:[#allocation28_spill] sm:$0xff] %v8017_v62  ;;  %v8021_v39 = vpop.f32.mrf.mxu0  ;;  %v2292_v0 = vsub.f32 %v4975_v23, %v4975_v23  ;;  %v2286_v62 = vsub.f32 %v2284_v42, %v2285_v22 }
 0x2d7   : > { %10535 = vst [vmem:[#allocation82_spill] sm:$0xff] %v8021_v39  ;;  %v8023_v19 = vadd.f32 %v2466_v48, %v2146_v12  ;;  %5113 = vmatmul.msk.f32.gmra.mxu3 %vm10132_vm7, %v10280_v38  ;;  %v10135_v48 = vand.u32 4294901760, %v8034_v17  ;;  %3908 = vmatpush.msra.mxu2 %v8034_v17 }
 0x2d8   : > { %2959 = vmatmul.f32.gmra.mxu1 %v2285_v22  ;;  %v2293_v13 = vand.u32 4294901760, %v2292_v0  ;;  %v2287_v22 = vand.u32 4294901760, %v2286_v62 }
 0x2d9   : > { %10536 = vst [vmem:[#allocation83_spill] sm:$0xff] %v8023_v19  ;;  %2280 = vmatmul.f32.gmra.mxu2 %v2279_v59  ;;  %2735 = vmatmul.f32.gmra.mxu0 %v2276_v51  ;;  %v3723_v63 = vsub.f32 %v8034_v17, %v10135_v48  ;;  %v10537_v19 = vld [vmem:[#allocation26_spill] sm:$0xff] }
 0x2da   : > { %v2474_v12 = vpop.f32.mrf.mxu3  ;;  %vm10137_vm7 = vcmp.eq.s32.totalorder %v10537_v19, %v7235_v55 }
 0x2db   : > { %v3724_v51 = vand.u32 4294901760, %v3723_v63  ;;  %v4978_v48 = vsel %vm10137_vm7, 1.0, %v10442_v40  ;;  %v2294_v63 = vsub.f32 %v2292_v0, %v2293_v13 }
 0x2dc   : > { %v2153_v39 = vpop.f32.mrf.mxu2 }
 0x2dd   : > { %v2154_v32 = vadd.f32 %v2153_v39, %v7178_v16  ;;  %v8044_v4 = vpop.f32.mrf.mxu1  ;;  %3725 = vmatpush.msrb.mxu1 %v3724_v51  ;;  %v2300_v39 = vsub.f32 %v4978_v48, %v4978_v48 }
 0x2de   : > { %10538 = vst [vmem:[#allocation84_spill] sm:$0xff] %v8044_v4  ;;  %v8046_v59 = vpop.f32.mrf.mxu0 }
 0x2df   : > { %10539 = vst [vmem:[#allocation85_spill] sm:$0xff] %v8046_v59  ;;  %v8048_v23 = vadd.f32 %v2470_v33, %v2154_v32  ;;  %5114 = vmatmul.msk.f32.gmra.mxu3 %vm10136_vm6, %v10280_v38  ;;  %v734_v33 = vld [vmem:[%s9921_s1 + $0x108] sm:$0xff]  ;;  %vm10140_vm6 = vcmp.eq.s32.totalorder %v10404_v3, %v7235_v55  ;;  %v2301_v48 = vand.u32 4294901760, %v2300_v39  ;;  %v10552_v3 = vld [vmem:[#allocation53_spill] sm:$0xff] }
 0x2e0   : > { %2965 = vmatmul.f32.gmra.mxu1 %v2293_v13  ;;  %v8061_v32 = vand.u32 4294901760, %v734_v33  ;;  %v2295_v13 = vand.u32 4294901760, %v2294_v63 }
 0x2e1   : > { %10540 = vst [vmem:[#allocation86_spill] sm:$0xff] %v8048_v23  ;;  %2288 = vmatmul.f32.gmra.mxu2 %v2287_v22  ;;  %2740 = vmatmul.f32.gmra.mxu0 %v2284_v42  ;;  %v10553_v23 = vand.u32 4294901760, %v10552_v3 }
 0x2e2   : > { %v2478_v16 = vpop.f32.mrf.mxu3  ;;  %3382 = vmatpush.msrb.mxu0 %v8061_v32  ;;  %4105 = vmatpush.msra.mxu3 %v8061_v32 }
 0x2e4   : > { %v2161_v4 = vpop.f32.mrf.mxu2 }
 0x2e5   : > { %v2162_v62 = vadd.f32 %v2161_v4, %v7211_v25  ;;  %v8066_v59 = vpop.f32.mrf.mxu1  ;;  %v4981_v25 = vsel %vm10140_vm6, 1.0, %v10442_v40  ;;  %v8083_v4 = vsub.f32 %v734_v33, %v8061_v32 }
 0x2e6   : > { %10541 = vst [vmem:[#allocation87_spill] sm:$0xff] %v8066_v59  ;;  %v8070_v42 = vpop.f32.mrf.mxu0  ;;  %v2302_v59 = vsub.f32 %v2300_v39, %v2301_v48 }
 0x2e7   : > { %10542 = vst [vmem:[#allocation88_spill] sm:$0xff] %v8070_v42  ;;  %v8072_v51 = vadd.f32 %v2474_v12, %v2162_v62  ;;  %5115 = vmatmul.msk.f32.gmra.mxu3 %vm10137_vm7, %v10280_v38  ;;  %v10139_v12 = vand.u32 4294901760, %v8083_v4  ;;  %v2308_v62 = vsub.f32 %v4981_v25, %v4981_v25  ;;  %3911 = vmatpush.msra.mxu2 %v8083_v4 }
 0x2e8   : > { %2971 = vmatmul.f32.gmra.mxu1 %v2301_v48  ;;  %vm10145_vm7 = vcmp.eq.s32.totalorder %v10417_v8, %v7235_v55  ;;  %v2303_v48 = vand.u32 4294901760, %v2302_v59  ;;  %v10561_v8 = vld [vmem:[#allocation40_spill] sm:$0xff] }
 0x2e9   : > { %10543 = vst [vmem:[#allocation89_spill] sm:$0xff] %v8072_v51  ;;  %2296 = vmatmul.f32.gmra.mxu2 %v2295_v13  ;;  %2745 = vmatmul.f32.gmra.mxu0 %v2292_v0  ;;  %v3729_v63 = vsub.f32 %v8083_v4, %v10139_v12  ;;  %v2309_v19 = vand.u32 4294901760, %v2308_v62  ;;  %v4984_v12 = vsel %vm10145_vm7, 1.0, %v10442_v40 }
 0x2ea   : > { %v2482_v22 = vpop.f32.mrf.mxu3 }
 0x2eb   : > { %v3730_v0 = vand.u32 4294901760, %v3729_v63  ;;  %v2316_v63 = vsub.f32 %v4984_v12, %v4984_v12  ;;  %v2310_v59 = vsub.f32 %v2308_v62, %v2309_v19 }
 0x2ec   : > { %v2169_v42 = vpop.f32.mrf.mxu2 }
 0x2ed   : > { %v2170_v33 = vadd.f32 %v2169_v42, %v7254_v30  ;;  %v8093_v51 = vpop.f32.mrf.mxu1  ;;  %3731 = vmatpush.msrb.mxu1 %v3730_v0  ;;  %v733_v30 = vld [vmem:[%s9921_s1 + $0x100] sm:$0xff] }
 0x2ee   : > { %10544 = vst [vmem:[#allocation90_spill] sm:$0xff] %v8093_v51  ;;  %v8095_v13 = vpop.f32.mrf.mxu0  ;;  %v8110_v42 = vand.u32 4294901760, %v733_v30  ;;  %v10547_v0 = vld [vmem:[#allocation34_spill] sm:$0xff] }
 0x2ef   : > { %10545 = vst [vmem:[#allocation91_spill] sm:$0xff] %v8095_v13  ;;  %v8097_v25 = vadd.f32 %v2478_v16, %v2170_v33  ;;  %5116 = vmatmul.msk.f32.gmra.mxu3 %vm10140_vm6, %v10280_v38  ;;  %v10548_v51 = vand.u32 4294901760, %v10547_v0 }
 0x2f0   : > { %2977 = vmatmul.f32.gmra.mxu1 %v2309_v19  ;;  %v8113_v33 = vsub.f32 %v733_v30, %v8110_v42  ;;  %3384 = vmatpush.msrb.mxu0 %v8110_v42  ;;  %v2317_v19 = vand.u32 4294901760, %v2316_v63 }
 0x2f1   : > { %10546 = vst [vmem:[#allocation92_spill] sm:$0xff] %v8097_v25  ;;  %2304 = vmatmul.f32.gmra.mxu2 %v2303_v48  ;;  %2750 = vmatmul.f32.gmra.mxu0 %v2300_v39  ;;  %v10549_v25 = vld [vmem:[#allocation35_spill] sm:$0xff]  ;;  %v10550_v39 = vld [vmem:[#allocation46_spill] sm:$0xff] }
 0x2f2   : > { %v2486_v16 = vpop.f32.mrf.mxu3  ;;  %4107 = vmatpush.msra.mxu3 %v8110_v42  ;;  %4304 = vmatpush.msra.mxu0 %v10548_v51  ;;  %vm10146_vm6 = vcmp.eq.s32.totalorder %v10549_v25, %v7235_v55  ;;  %v10143_v48 = vand.u32 4294901760, %v8113_v33 }
 0x2f3   : > { %3914 = vmatpush.msra.mxu2 %v8113_v33  ;;  %v4987_v3 = vsel %vm10146_vm6, 1.0, %v10442_v40 }
 0x2f4   : > { %v2177_v13 = vpop.f32.mrf.mxu2  ;;  %4308 = vmatpush.msra.mxu0 %v10553_v23  ;;  %v3735_v51 = vsub.f32 %v8113_v33, %v10143_v48  ;;  %v10556_v23 = vld [vmem:[#allocation61_spill] sm:$0xff]  ;;  %v10558_v48 = vld [vmem:[#allocation51_spill] sm:$0xff] }
 0x2f5   : > { %v2178_v12 = vadd.f32 %v2177_v13, %v10550_v39  ;;  %v8124_v30 = vpop.f32.mrf.mxu1  ;;  %v2311_v13 = vand.u32 4294901760, %v2310_v59  ;;  %v10557_v39 = vand.u32 4294901760, %v10556_v23  ;;  %v10560_v59 = vld [vmem:[#allocation31_spill] sm:$0xff]  ;;  %v10563_v23 = vand.u32 4294901760, %v10562_v46  ;;  %v10571_v46 = vld [vmem:[#allocation57_spill] sm:$0xff] }
 0x2f6   : > { %10551 = vst [vmem:[#allocation34_spill] sm:$0xff] %v8124_v30  ;;  %v8128_v31 = vpop.f32.mrf.mxu0  ;;  %v3736_v30 = vand.u32 4294901760, %v3735_v51 }
 0x2f7   : > { %10554 = vst [vmem:[#allocation35_spill] sm:$0xff] %v8128_v31  ;;  %v8133_v0 = vadd.f32 %v2482_v22, %v2178_v12  ;;  %5117 = vmatmul.msk.f32.gmra.mxu3 %vm10145_vm7, %v10280_v38  ;;  %4312 = vmatpush.msra.mxu0 %v10557_v39  ;;  %v2324_v12 = vsub.f32 %v4987_v3, %v4987_v3  ;;  %v10559_v31 = vand.u32 4294901760, %v10558_v48  ;;  %v10564_v39 = vld [vmem:[#allocation49_spill] sm:$0xff] }
 0x2f8   : > { %2983 = vmatmul.f32.gmra.mxu1 %v2317_v19  ;;  %vm10147_vm7 = vcmp.eq.s32.totalorder %v10561_v8, %v7235_v55 }
 0x2f9   : > { %10555 = vst [vmem:[#allocation46_spill] sm:$0xff] %v8133_v0  ;;  %2312 = vmatmul.f32.gmra.mxu2 %v2311_v13  ;;  %2755 = vmatmul.f32.gmra.mxu0 %v2308_v62  ;;  %v2318_v0 = vsub.f32 %v2316_v63, %v2317_v19  ;;  %v10566_v62 = vld [vmem:[#allocation37_spill] sm:$0xff]  ;;  %v2325_v48 = vand.u32 4294901760, %v2324_v12  ;;  %v4990_v3 = vsel %vm10147_vm7, 1.0, %v10442_v40 }
 0x2fa   : > { %v2490_v22 = vpop.f32.mrf.mxu3  ;;  %3737 = vmatpush.msrb.mxu1 %v3736_v30  ;;  %4316 = vmatpush.msra.mxu0 %v10559_v31  ;;  %v10568_v31 = vld [vmem:[#allocation66_spill] sm:$0xff] }
 0x2fb   : > { %v10569_v19 = vand.u32 4294901760, %v10568_v31 }
 0x2fc   : > { %4495 = vmatpush.msra.mxu1 %v10560_v59  ;;  %v2185_v2 = vpop.f32.mrf.mxu2  ;;  %4320 = vmatpush.msra.mxu0 %v10563_v23  ;;  %v10572_v23 = vld [vmem:[#allocation44_spill] sm:$0xff] }
 0x2fd   : > { %v2186_v51 = vadd.f32 %v2185_v2, %v10564_v39  ;;  %v8153_v13 = vpop.f32.mrf.mxu1  ;;  %v2319_v2 = vand.u32 4294901760, %v2318_v0  ;;  %v10573_v39 = vand.u32 4294901760, %v10572_v23 }
 0x2fe   : > { %10565 = vst [vmem:[#allocation53_spill] sm:$0xff] %v8153_v13  ;;  %4497 = vmatpush.msra.mxu1 %v10566_v62  ;;  %v8156_v30 = vpop.f32.mrf.mxu0  ;;  %4324 = vmatpush.msra.mxu0 %v10569_v19  ;;  %v2332_v62 = vsub.f32 %v4990_v3, %v4990_v3  ;;  %v10574_v19 = vld [vmem:[#allocation47_spill] sm:$0xff] }
 0x2ff   : > { %10567 = vst [vmem:[#allocation61_spill] sm:$0xff] %v8156_v30  ;;  %v8164_v59 = vadd.f32 %v2486_v16, %v2186_v51  ;;  %5118 = vmatmul.msk.f32.gmra.mxu3 %vm10146_vm6, %v10280_v38  ;;  %v10575_v16 = vand.u32 4294901760, %v7690_v34  ;;  %v10576_v51 = vld [vmem:[#allocation7_spill] sm:$0xff]  ;;  %v2326_v30 = vsub.f32 %v2324_v12, %v2325_v48 }
 0x300   : > { %4499 = vmatpush.msra.mxu1 %v10571_v46  ;;  %4328 = vmatpush.msra.mxu0 %v10573_v39  ;;  %v8177_v13 = vadd.s32 256, %v10576_v51  ;;  %v10578_v46 = vand.u32 4294901760, %v7749_v28  ;;  %v2333_v34 = vand.u32 4294901760, %v2332_v62  ;;  %v10583_v51 = vand.u32 4294901760, %v7867_v18 }
 0x301   : > { %10570 = vst [vmem:[#allocation51_spill] sm:$0xff] %v8164_v59  ;;  %2989 = vmatmul.f32.gmra.mxu1 %v2325_v48  ;;  %2320 = vmatmul.f32.gmra.mxu2 %v2319_v2  ;;  %v10577_v59 = vld [vmem:[#allocation68_spill] sm:$0xff]  ;;  %v10579_v2 = vld [vmem:[#allocation9_spill] sm:$0xff]  ;;  %v10582_v48 = vand.u32 4294901760, %v7808_v41  ;;  %v2327_v28 = vand.u32 4294901760, %v2326_v30 }
 0x302   : > { %2760 = vmatmul.f32.gmra.mxu0 %v2316_v63  ;;  %v2494_v31 = vpop.f32.mrf.mxu3  ;;  %4501 = vmatpush.msra.mxu1 %v10574_v19  ;;  %vm10148_vm6 = vcmp.eq.s32.totalorder %v10579_v2, %v8177_v13  ;;  %v10580_v63 = vld [vmem:[#allocation42_spill] sm:$0xff]  ;;  %v10581_v19 = vld [vmem:[#allocation43_spill] sm:$0xff]  ;;  %v2334_v30 = vsub.f32 %v2332_v62, %v2333_v34 }
 0x303   : > { %4332 = vmatpush.msra.mxu0 %v10575_v16 }
 0x304   : > { %v2193_v0 = vpop.f32.mrf.mxu2  ;;  %4503 = vmatpush.msra.mxu1 %v10577_v59  ;;  %v4898_v59 = vsel %vm10148_vm6, 1.0, %v10442_v40 }
 0x305   : > { %4336 = vmatpush.msra.mxu0 %v10578_v46  ;;  %v2194_v3 = vadd.f32 %v2193_v0, %v10580_v63  ;;  %v8185_v23 = vpop.f32.mrf.mxu1  ;;  %v10585_v0 = vand.u32 4294901760, %v7926_v60  ;;  %v8207_v46 = vsub.f32 %v4898_v59, %v4898_v59  ;;  %v10590_v60 = vand.u32 4294901760, %v8034_v17 }
 0x306   : > { %v8187_v39 = vpop.f32.mrf.mxu0  ;;  %4505 = vmatpush.msra.mxu1 %v10581_v19  ;;  %v10587_v19 = vand.u32 4294901760, %v7985_v9  ;;  %v2335_v9 = vand.u32 4294901760, %v2334_v30  ;;  %v10591_v17 = vand.u32 4294901760, %v8083_v4 }
 0x307   : > { %4340 = vmatpush.msra.mxu0 %v10582_v48  ;;  %v8192_v16 = vadd.f32 %v2490_v22, %v2194_v3  ;;  %5119 = vmatmul.msk.f32.gmra.mxu3 %vm10147_vm7, %v10280_v38  ;;  %v10584_v22 = vld [vmem:[#allocation76_spill] sm:$0xff]  ;;  %v10588_v48 = vld [vmem:[#allocation45_spill] sm:$0xff] }
 0x308   : > { %4507 = vmatpush.msra.mxu1 %v10584_v22  ;;  %v10586_v3 = vld [vmem:[#allocation72_spill] sm:$0xff]  ;;  %v10592_v22 = vand.u32 4294901760, %v8113_v33 }
 0x309   : > { %2995 = vmatmul.f32.gmra.mxu1 %v2333_v34  ;;  %4344 = vmatpush.msra.mxu0 %v10583_v51  ;;  %v10152_v34 = vand.u32 4294901760, %v8207_v46 }
 0x30a   : > { %2328 = vmatmul.f32.gmra.mxu2 %v2327_v28  ;;  %2765 = vmatmul.f32.gmra.mxu0 %v2324_v12  ;;  %v2498_v41 = vpop.f32.mrf.mxu3  ;;  %v10589_v12 = vld [vmem:[#allocation6_spill] sm:$0xff] }
 0x30b   : > { %4348 = vmatpush.msra.mxu0 %v10585_v0  ;;  %4509 = vmatpush.msra.mxu1 %v10586_v3  ;;  %vm386_vm7 = vcmp.eq.s32.totalorder %v10589_v12, %v8177_v13  ;;  %v3388_v0 = vsub.f32 %v8207_v46, %v10152_v34  ;;  %v10593_v3 = vld [vmem:[#allocation39_spill] sm:$0xff] }
 0x30c   : > { %v2201_v63 = vpop.f32.mrf.mxu2 }
 0x30d   : > { %4352 = vmatpush.msra.mxu0 %v10587_v19  ;;  %v2202_v18 = vadd.f32 %v2201_v63, %v10588_v48  ;;  %v8213_v51 = vpop.f32.mrf.mxu1  ;;  %4511 = vmatpush.msra.mxu1 %v7724_v57  ;;  %v4901_v57 = vsel %vm386_vm7, 1.0, %v10442_v40  ;;  %v3389_v48 = vand.u32 4294901760, %v3388_v0  ;;  %v10598_v0 = vld [vmem:[#allocation10_spill] sm:$0xff] }
 0x30e   : > { %v8217_v28 = vpop.f32.mrf.mxu0  ;;  %v8245_v30 = vsub.f32 %v4901_v57, %v4901_v57  ;;  %v10596_v57 = vld [vmem:[#allocation59_spill] sm:$0xff] }
 0x30f   : > { %4356 = vmatpush.msra.mxu0 %v10590_v60  ;;  %v8223_v59 = vadd.f32 %v2494_v31, %v2202_v18  ;;  %5152 = vmatmul.msk.f32.vlgmr.msrb.gmra.mxu3 %vm382_vm3, %v10280_v38 }
 0x310   : > { %4513 = vmatpush.msra.mxu1 %v7783_v43 }
 0x311   : > { %5184 = vmatmul.msk.f32.vlgmr.msrb.gmra.mxu1 %vm10148_vm6, %v10280_v38  ;;  %4360 = vmatpush.msra.mxu0 %v10591_v17 }
 0x312   : > { %2336 = vmatmul.f32.gmra.mxu2 %v2335_v9  ;;  %2770 = vmatmul.f32.gmra.mxu0 %v2332_v62  ;;  %v2502_v31 = vpop.f32.mrf.mxu3  ;;  %v10595_v62 = vld [vmem:[#allocation11_spill] sm:$0xff] }
 0x313   : > { %4364 = vmatpush.msra.mxu0 %v10592_v22  ;;  %4515 = vmatpush.msra.mxu1 %v7842_v7  ;;  %vm10149_vm6 = vcmp.eq.s32.totalorder %v10595_v62, %v8177_v13  ;;  %v10150_v7 = vand.u32 4294901760, %v8245_v30 }
 0x314   : > { %v2209_v63 = vpop.f32.mrf.mxu2 }
 0x315   : > { %v2210_v4 = vadd.f32 %v2209_v63, %v10593_v3  ;;  %v8249_v19 = vpop.f32.mrf.mxu1  ;;  %4517 = vmatpush.msra.mxu1 %v7901_v44  ;;  %v4904_v44 = vsel %vm10149_vm6, 1.0, %v10442_v40  ;;  %v3396_v60 = vsub.f32 %v8245_v30, %v10150_v7 }
 0x316   : > { %10594 = vst [vmem:[#allocation31_spill] sm:$0xff] %v8249_v19  ;;  %v8253_v43 = vpop.f32.mrf.mxu0  ;;  %v8276_v18 = vsub.f32 %v4904_v44, %v4904_v44 }
 0x317   : > { %v8256_v33 = vadd.f32 %v2498_v41, %v2210_v4  ;;  %5153 = vmatmul.msk.f32.gmra.mxu3 %vm385_vm5, %v10280_v38  ;;  %4519 = vmatpush.msra.mxu1 %v7960_v35  ;;  %v3397_v3 = vand.u32 4294901760, %v3396_v60  ;;  %v10600_v60 = vld [vmem:[#allocation63_spill] sm:$0xff] }
 0x319   : > { %5185 = vmatmul.msk.f32.gmra.mxu1 %vm386_vm7, %v10280_v38 }
 0x31a   : > { %5120 = vmatmul.msk.f32.vlgmr.msrb.gmra.mxu2 %vm382_vm3, %v10280_v38  ;;  %3390 = vmatmul.f32.vlgmr.msrb.gmra.mxu0 %v3389_v48  ;;  %v2506_v41 = vpop.f32.mrf.mxu3  ;;  %vm392_vm3 = vcmp.eq.s32.totalorder %v10598_v0, %v8177_v13 }
 0x31b   : > { %4521 = vmatpush.msra.mxu1 %v8012_v11  ;;  %v10151_v11 = vand.u32 4294901760, %v8276_v18 }
 0x31c   : > { %v2217_v9 = vpop.f32.mrf.mxu2 }
 0x31d   : > { %v2218_v17 = vadd.f32 %v2217_v9, %v10596_v57  ;;  %v8283_v22 = vpop.f32.mrf.mxu1  ;;  %4523 = vmatpush.msra.mxu1 %v8061_v32  ;;  %v4907_v32 = vsel %vm392_vm3, 1.0, %v10442_v40  ;;  %v3404_v48 = vsub.f32 %v8276_v18, %v10151_v11  ;;  %v10605_v11 = vld [vmem:[#allocation70_spill] sm:$0xff] }
 0x31e   : > { %10597 = vst [vmem:[#allocation40_spill] sm:$0xff] %v8283_v22  ;;  %v8287_v63 = vpop.f32.mrf.mxu0  ;;  %v8310_v4 = vsub.f32 %v4907_v32, %v4907_v32  ;;  %v10607_v22 = vld [vmem:[#allocation16_spill] sm:$0xff] }
 0x31f   : > { %v8290_v35 = vadd.f32 %v2502_v31, %v2218_v17  ;;  %5154 = vmatmul.msk.f32.gmra.mxu3 %vm388_vm1, %v10280_v38  ;;  %4525 = vmatpush.msra.mxu1 %v8110_v42  ;;  %v10602_v17 = vld [vmem:[#allocation14_spill] sm:$0xff]  ;;  %v3405_v42 = vand.u32 4294901760, %v3404_v48 }
 0x320   : > { %10599 = vst [vmem:[#allocation55_spill] sm:$0xff] %v8310_v4  ;;  %v10153_v32 = vand.u32 4294901760, %v8310_v4 }
 0x321   : > { %5186 = vmatmul.msk.f32.gmra.mxu1 %vm10149_vm6, %v10280_v38  ;;  %vm395_vm6 = vcmp.eq.s32.totalorder %v10602_v17, %v8177_v13 }
 0x322   : > { %5121 = vmatmul.msk.f32.gmra.mxu2 %vm385_vm5, %v10280_v38  ;;  %3398 = vmatmul.f32.gmra.mxu0 %v3397_v3  ;;  %v2510_v31 = vpop.f32.mrf.mxu3  ;;  %vm398_vm5 = vcmp.eq.s32.totalorder %v10607_v22, %v8177_v13 }
 0x324   : > { %v2225_v44 = vpop.f32.mrf.mxu2 }
 0x325   : > { %v2226_v9 = vadd.f32 %v2225_v44, %v10600_v60  ;;  %v8316_v57 = vpop.f32.mrf.mxu1  ;;  %v4910_v44 = vsel %vm395_vm6, 1.0, %v10442_v40  ;;  %v3412_v60 = vsub.f32 %v8310_v4, %v10153_v32  ;;  %v10611_v32 = vld [vmem:[#allocation80_spill] sm:$0xff] }
 0x326   : > { %10601 = vst [vmem:[#allocation49_spill] sm:$0xff] %v8316_v57  ;;  %v8320_v7 = vpop.f32.mrf.mxu0  ;;  %v8341_v48 = vsub.f32 %v4910_v44, %v4910_v44 }
 0x327   : > { %10603 = vst [vmem:[#allocation37_spill] sm:$0xff] %v8320_v7  ;;  %v8322_v3 = vadd.f32 %v2506_v41, %v2226_v9  ;;  %5155 = vmatmul.msk.f32.gmra.mxu3 %vm391_vm8, %v10280_v38 }
 0x328   : > { %10604 = vst [vmem:[#allocation66_spill] sm:$0xff] %v8341_v48  ;;  %v10157_v44 = vand.u32 4294901760, %v8341_v48 }
 0x329   : > { %5187 = vmatmul.msk.f32.gmra.mxu1 %vm392_vm3, %v10280_v38 }
 0x32a   : > { %5122 = vmatmul.msk.f32.gmra.mxu2 %vm388_vm1, %v10280_v38  ;;  %3406 = vmatmul.f32.gmra.mxu0 %v3405_v42  ;;  %v2514_v41 = vpop.f32.mrf.mxu3  ;;  %v3413_v42 = vand.u32 4294901760, %v3412_v60  ;;  %v3420_v60 = vsub.f32 %v8341_v48, %v10157_v44  ;;  %v10617_v44 = vld [vmem:[#allocation75_spill] sm:$0xff] }
 0x32c   : > { %v2233_v9 = vpop.f32.mrf.mxu2 }
 0x32d   : > { %v2234_v34 = vadd.f32 %v2233_v9, %v10605_v11  ;;  %v8347_v57 = vpop.f32.mrf.mxu1  ;;  %v4913_v11 = vsel %vm398_vm5, 1.0, %v10442_v40 }
 0x32e   : > { %10606 = vst [vmem:[#allocation57_spill] sm:$0xff] %v8347_v57  ;;  %v8351_v7 = vpop.f32.mrf.mxu0 }
 0x32f   : > { %10608 = vst [vmem:[#allocation44_spill] sm:$0xff] %v8351_v7  ;;  %v8353_v19 = vadd.f32 %v2510_v31, %v2234_v34  ;;  %5156 = vmatmul.msk.f32.gmra.mxu3 %vm394_vm4, %v10280_v38  ;;  %v8372_v31 = vsub.f32 %v4913_v11, %v4913_v11 }
 0x331   : > { %10609 = vst [vmem:[#allocation47_spill] sm:$0xff] %v8353_v19  ;;  %5188 = vmatmul.msk.f32.gmra.mxu1 %vm395_vm6, %v10280_v38  ;;  %v10613_v19 = vld [vmem:[#allocation18_spill] sm:$0xff]  ;;  %v10161_v11 = vand.u32 4294901760, %v8372_v31 }
 0x332   : > { %5123 = vmatmul.msk.f32.gmra.mxu2 %vm391_vm8, %v10280_v38  ;;  %3414 = vmatmul.f32.gmra.mxu0 %v3413_v42  ;;  %v2518_v34 = vpop.f32.mrf.mxu3  ;;  %10610 = vst [vmem:[#allocation7_spill] sm:$0xff] %v8372_v31  ;;  %vm401_vm1 = vcmp.eq.s32.totalorder %v10613_v19, %v8177_v13  ;;  %v3421_v42 = vand.u32 4294901760, %v3420_v60 }
 0x333   : > { %v3428_v60 = vsub.f32 %v8372_v31, %v10161_v11  ;;  %v10622_v11 = vld [vmem:[#allocation78_spill] sm:$0xff] }
 0x334   : > { %v2241_v9 = vpop.f32.mrf.mxu2 }
 0x335   : > { %v2242_v57 = vadd.f32 %v2241_v9, %v10611_v32  ;;  %v8378_v7 = vpop.f32.mrf.mxu1  ;;  %v4916_v32 = vsel %vm401_vm1, 1.0, %v10442_v40 }
 0x336   : > { %10612 = vst [vmem:[#allocation68_spill] sm:$0xff] %v8378_v7  ;;  %v8382_v4 = vpop.f32.mrf.mxu0 }
 0x337   : > { %10614 = vst [vmem:[#allocation9_spill] sm:$0xff] %v8382_v4  ;;  %v8384_v0 = vadd.f32 %v2514_v41, %v2242_v57  ;;  %5157 = vmatmul.msk.f32.gmra.mxu3 %vm397_vm9, %v10280_v38  ;;  %v8403_v41 = vsub.f32 %v4916_v32, %v4916_v32 }
 0x339   : > { %10615 = vst [vmem:[#allocation42_spill] sm:$0xff] %v8384_v0  ;;  %5189 = vmatmul.msk.f32.gmra.mxu1 %vm398_vm5, %v10280_v38  ;;  %v10619_v0 = vld [vmem:[#allocation20_spill] sm:$0xff]  ;;  %v10165_v32 = vand.u32 4294901760, %v8403_v41 }
 0x33a   : > { %5124 = vmatmul.msk.f32.gmra.mxu2 %vm394_vm4, %v10280_v38  ;;  %3422 = vmatmul.f32.gmra.mxu0 %v3421_v42  ;;  %v2522_v57 = vpop.f32.mrf.mxu3  ;;  %10616 = vst [vmem:[#allocation43_spill] sm:$0xff] %v8403_v41  ;;  %vm404_vm8 = vcmp.eq.s32.totalorder %v10619_v0, %v8177_v13  ;;  %v3429_v42 = vand.u32 4294901760, %v3428_v60 }
 0x33b   : > { %v3436_v60 = vsub.f32 %v8403_v41, %v10165_v32  ;;  %v10627_v32 = vld [vmem:[#allocation74_spill] sm:$0xff] }
 0x33c   : > { %v2249_v9 = vpop.f32.mrf.mxu2 }
 0x33d   : > { %v2250_v7 = vadd.f32 %v2249_v9, %v10617_v44  ;;  %v8409_v4 = vpop.f32.mrf.mxu1  ;;  %v4919_v44 = vsel %vm404_vm8, 1.0, %v10442_v40 }
 0x33e   : > { %10618 = vst [vmem:[#allocation76_spill] sm:$0xff] %v8409_v4  ;;  %v8413_v48 = vpop.f32.mrf.mxu0 }
 0x33f   : > { %10620 = vst [vmem:[#allocation72_spill] sm:$0xff] %v8413_v48  ;;  %v8415_v17 = vadd.f32 %v2518_v34, %v2250_v7  ;;  %5158 = vmatmul.msk.f32.gmra.mxu3 %vm400_vm10, %v10280_v38  ;;  %v8434_v34 = vsub.f32 %v4919_v44, %v4919_v44 }
 0x341   : > { %10621 = vst [vmem:[#allocation45_spill] sm:$0xff] %v8415_v17  ;;  %5190 = vmatmul.msk.f32.gmra.mxu1 %vm401_vm1, %v10280_v38  ;;  %v10624_v17 = vld [vmem:[#allocation22_spill] sm:$0xff]  ;;  %v10169_v44 = vand.u32 4294901760, %v8434_v34 }
 0x342   : > { %5125 = vmatmul.msk.f32.gmra.mxu2 %vm397_vm9, %v10280_v38  ;;  %3430 = vmatmul.f32.gmra.mxu0 %v3429_v42  ;;  %v2526_v7 = vpop.f32.mrf.mxu3  ;;  %vm407_vm4 = vcmp.eq.s32.totalorder %v10624_v17, %v8177_v13  ;;  %v3437_v42 = vand.u32 4294901760, %v3436_v60 }
 0x343   : > { %v3444_v60 = vsub.f32 %v8434_v34, %v10169_v44 }
 0x344   : > { %v2257_v9 = vpop.f32.mrf.mxu2 }
 0x345   : > { %v2258_v4 = vadd.f32 %v2257_v9, %v10622_v11  ;;  %v8440_v48 = vpop.f32.mrf.mxu1  ;;  %v4922_v11 = vsel %vm407_vm4, 1.0, %v10442_v40 }
 0x346   : > { %10623 = vst [vmem:[#allocation6_spill] sm:$0xff] %v8440_v48  ;;  %v8444_v31 = vpop.f32.mrf.mxu0 }
 0x347   : > { %10625 = vst [vmem:[#allocation39_spill] sm:$0xff] %v8444_v31  ;;  %v8446_v22 = vadd.f32 %v2522_v57, %v2258_v4  ;;  %5159 = vmatmul.msk.f32.gmra.mxu3 %vm403_vm11, %v10280_v38  ;;  %v8465_v57 = vsub.f32 %v4922_v11, %v4922_v11 }
 0x349   : > { %10626 = vst [vmem:[#allocation11_spill] sm:$0xff] %v8446_v22  ;;  %5191 = vmatmul.msk.f32.gmra.mxu1 %vm404_vm8, %v10280_v38  ;;  %v10629_v22 = vld [vmem:[#allocation24_spill] sm:$0xff]  ;;  %v10171_v11 = vand.u32 4294901760, %v8465_v57 }
 0x34a   : > { %5126 = vmatmul.msk.f32.gmra.mxu2 %vm400_vm10, %v10280_v38  ;;  %3438 = vmatmul.f32.gmra.mxu0 %v3437_v42  ;;  %v2530_v4 = vpop.f32.mrf.mxu3  ;;  %vm410_vm9 = vcmp.eq.s32.totalorder %v10629_v22, %v8177_v13  ;;  %v3445_v42 = vand.u32 4294901760, %v3444_v60 }
 0x34b   : > { %v3452_v60 = vsub.f32 %v8465_v57, %v10171_v11 }
 0x34c   : > { %v2265_v9 = vpop.f32.mrf.mxu2 }
 0x34d   : > { %v2266_v48 = vadd.f32 %v2265_v9, %v10627_v32  ;;  %v8471_v31 = vpop.f32.mrf.mxu1  ;;  %v4925_v32 = vsel %vm410_vm9, 1.0, %v10442_v40 }
 0x34e   : > { %10628 = vst [vmem:[#allocation59_spill] sm:$0xff] %v8471_v31  ;;  %v8475_v41 = vpop.f32.mrf.mxu0 }
 0x34f   : > { %10630 = vst [vmem:[#allocation63_spill] sm:$0xff] %v8475_v41  ;;  %v8477_v19 = vadd.f32 %v2526_v7, %v2266_v48  ;;  %5160 = vmatmul.msk.f32.gmra.mxu3 %vm406_vm12, %v10280_v38  ;;  %v8496_v7 = vsub.f32 %v4925_v32, %v4925_v32  ;;  %v10633_v41 = vld [vmem:[#allocation27_spill] sm:$0xff] }
 0x350   : > { %vm413_vm10 = vcmp.eq.s32.totalorder %v10633_v41, %v8177_v13 }
 0x351   : > { %10631 = vst [vmem:[#allocation70_spill] sm:$0xff] %v8477_v19  ;;  %5192 = vmatmul.msk.f32.gmra.mxu1 %vm407_vm4, %v10280_v38  ;;  %v10173_v32 = vand.u32 4294901760, %v8496_v7 }
 0x352   : > { %5127 = vmatmul.msk.f32.gmra.mxu2 %vm403_vm11, %v10280_v38  ;;  %3446 = vmatmul.f32.gmra.mxu0 %v3445_v42  ;;  %v2534_v48 = vpop.f32.mrf.mxu3  ;;  %v3453_v42 = vand.u32 4294901760, %v3452_v60 }
 0x353   : > { %v3460_v60 = vsub.f32 %v8496_v7, %v10173_v32 }
 0x354   : > { %v2273_v9 = vpop.f32.mrf.mxu2 }
 0x355   : > { %v2274_v44 = vadd.f32 %v2273_v9, %v7761_v14  ;;  %v8502_v31 = vpop.f32.mrf.mxu1  ;;  %v4928_v14 = vsel %vm413_vm10, 1.0, %v10442_v40 }
 0x356   : > { %10632 = vst [vmem:[#allocation80_spill] sm:$0xff] %v8502_v31  ;;  %v8506_v19 = vpop.f32.mrf.mxu0 }
 0x357   : > { %10634 = vst [vmem:[#allocation75_spill] sm:$0xff] %v8506_v19  ;;  %v8508_v0 = vadd.f32 %v2530_v4, %v2274_v44  ;;  %5161 = vmatmul.msk.f32.gmra.mxu3 %vm409_vm13, %v10280_v38  ;;  %v8527_v4 = vsub.f32 %v4928_v14, %v4928_v14  ;;  %v10637_v19 = vld [vmem:[#allocation30_spill] sm:$0xff] }
 0x358   : > { %vm416_vm11 = vcmp.eq.s32.totalorder %v10637_v19, %v8177_v13 }
 0x359   : > { %10635 = vst [vmem:[#allocation78_spill] sm:$0xff] %v8508_v0  ;;  %5193 = vmatmul.msk.f32.gmra.mxu1 %vm410_vm9, %v10280_v38  ;;  %v10175_v14 = vand.u32 4294901760, %v8527_v4 }
 0x35a   : > { %5128 = vmatmul.msk.f32.gmra.mxu2 %vm406_vm12, %v10280_v38  ;;  %3454 = vmatmul.f32.gmra.mxu0 %v3453_v42  ;;  %v2538_v44 = vpop.f32.mrf.mxu3  ;;  %v3461_v42 = vand.u32 4294901760, %v3460_v60 }
 0x35b   : > { %v3468_v60 = vsub.f32 %v8527_v4, %v10175_v14 }
 0x35c   : > { %v2281_v9 = vpop.f32.mrf.mxu2 }
 0x35d   : > { %v2282_v11 = vadd.f32 %v2281_v9, %v7788_v15  ;;  %v8533_v31 = vpop.f32.mrf.mxu1  ;;  %v4931_v15 = vsel %vm416_vm11, 1.0, %v10442_v40 }
 0x35e   : > { %10636 = vst [vmem:[#allocation74_spill] sm:$0xff] %v8533_v31  ;;  %v8537_v0 = vpop.f32.mrf.mxu0 }
 0x35f   : > { %10638 = vst [vmem:[#allocation93_spill] sm:$0xff] %v8537_v0  ;;  %v8539_v17 = vadd.f32 %v2534_v48, %v2282_v11  ;;  %5162 = vmatmul.msk.f32.gmra.mxu3 %vm412_vm14, %v10280_v38  ;;  %v8558_v48 = vsub.f32 %v4931_v15, %v4931_v15  ;;  %v10641_v0 = vld [vmem:[#allocation33_spill] sm:$0xff] }
 0x360   : > { %vm419_vm12 = vcmp.eq.s32.totalorder %v10641_v0, %v8177_v13 }
 0x361   : > { %10639 = vst [vmem:[#allocation94_spill] sm:$0xff] %v8539_v17  ;;  %5194 = vmatmul.msk.f32.gmra.mxu1 %vm413_vm10, %v10280_v38  ;;  %v10177_v15 = vand.u32 4294901760, %v8558_v48 }
 0x362   : > { %5129 = vmatmul.msk.f32.gmra.mxu2 %vm409_vm13, %v10280_v38  ;;  %3462 = vmatmul.f32.gmra.mxu0 %v3461_v42  ;;  %v2542_v11 = vpop.f32.mrf.mxu3  ;;  %v3469_v42 = vand.u32 4294901760, %v3468_v60 }
 0x363   : > { %v3476_v60 = vsub.f32 %v8558_v48, %v10177_v15  ;;  %v10648_v15 = vld [vmem:[#allocation38_spill] sm:$0xff] }
 0x364   : > { %v2289_v9 = vpop.f32.mrf.mxu2 }
 0x365   : > { %v2290_v32 = vadd.f32 %v2289_v9, %v7820_v53  ;;  %v8564_v31 = vpop.f32.mrf.mxu1  ;;  %v4934_v53 = vsel %vm419_vm12, 1.0, %v10442_v40 }
 0x366   : > { %10640 = vst [vmem:[#allocation95_spill] sm:$0xff] %v8564_v31  ;;  %v8568_v17 = vpop.f32.mrf.mxu0 }
 0x367   : > { %10642 = vst [vmem:[#allocation96_spill] sm:$0xff] %v8568_v17  ;;  %v8570_v22 = vadd.f32 %v2538_v44, %v2290_v32  ;;  %5163 = vmatmul.msk.f32.gmra.mxu3 %vm415_vm15, %v10280_v38  ;;  %v8589_v44 = vsub.f32 %v4934_v53, %v4934_v53  ;;  %v10645_v17 = vld [vmem:[#allocation36_spill] sm:$0xff] }
 0x368   : > { %vm422_vm13 = vcmp.eq.s32.totalorder %v10645_v17, %v8177_v13 }
 0x369   : > { %10643 = vst [vmem:[#allocation97_spill] sm:$0xff] %v8570_v22  ;;  %5195 = vmatmul.msk.f32.gmra.mxu1 %vm416_vm11, %v10280_v38  ;;  %v10179_v53 = vand.u32 4294901760, %v8589_v44 }
 0x36a   : > { %5130 = vmatmul.msk.f32.gmra.mxu2 %vm412_vm14, %v10280_v38  ;;  %3470 = vmatmul.f32.gmra.mxu0 %v3469_v42  ;;  %v2546_v32 = vpop.f32.mrf.mxu3  ;;  %v3477_v42 = vand.u32 4294901760, %v3476_v60  ;;  %vm10183_vm14 = vcmp.eq.s32.totalorder %v10648_v15, %v8177_v13 }
 0x36b   : > { %v3484_v60 = vsub.f32 %v8589_v44, %v10179_v53  ;;  %v4940_v53 = vsel %vm10183_vm14, 1.0, %v10442_v40 }
 0x36c   : > { %v2297_v9 = vpop.f32.mrf.mxu2 }
 0x36d   : > { %v2298_v14 = vadd.f32 %v2297_v9, %v7847_v50  ;;  %v8595_v31 = vpop.f32.mrf.mxu1  ;;  %v4937_v50 = vsel %vm422_vm13, 1.0, %v10442_v40 }
 0x36e   : > { %10644 = vst [vmem:[#allocation98_spill] sm:$0xff] %v8595_v31  ;;  %v8599_v22 = vpop.f32.mrf.mxu0 }
 0x36f   : > { %10646 = vst [vmem:[#allocation99_spill] sm:$0xff] %v8599_v22  ;;  %v8601_v41 = vadd.f32 %v2542_v11, %v2298_v14  ;;  %5164 = vmatmul.msk.f32.gmra.mxu3 %vm418_vm0, %v10280_v38  ;;  %v8620_v11 = vsub.f32 %v4937_v50, %v4937_v50 }
 0x371   : > { %10647 = vst [vmem:[#allocation100_spill] sm:$0xff] %v8601_v41  ;;  %5196 = vmatmul.msk.f32.gmra.mxu1 %vm419_vm12, %v10280_v38  ;;  %v10181_v50 = vand.u32 4294901760, %v8620_v11 }
 0x372   : > { %5131 = vmatmul.msk.f32.gmra.mxu2 %vm415_vm15, %v10280_v38  ;;  %3478 = vmatmul.f32.gmra.mxu0 %v3477_v42  ;;  %v2550_v14 = vpop.f32.mrf.mxu3  ;;  %v3485_v42 = vand.u32 4294901760, %v3484_v60 }
 0x374   : > { %v2305_v9 = vpop.f32.mrf.mxu2 }
 0x375   : > { %v2306_v31 = vadd.f32 %v2305_v9, %v7879_v27  ;;  %v8628_v22 = vpop.f32.mrf.mxu1  ;;  %v10652_v9 = vld [vmem:[#allocation41_spill] sm:$0xff] }
 0x376   : > { %10649 = vst [vmem:[#allocation101_spill] sm:$0xff] %v8628_v22  ;;  %v8630_v41 = vpop.f32.mrf.mxu0  ;;  %vm428_vm15 = vcmp.eq.s32.totalorder %v10652_v9, %v8177_v13 }
 0x377   : > { %10650 = vst [vmem:[#allocation102_spill] sm:$0xff] %v8630_v41  ;;  %v8632_v19 = vadd.f32 %v2546_v32, %v2306_v31  ;;  %5165 = vmatmul.msk.f32.gmra.mxu3 %vm421_vm2, %v10280_v38  ;;  %v8651_v31 = vsub.f32 %v4940_v53, %v4940_v53  ;;  %v3492_v32 = vsub.f32 %v8620_v11, %v10181_v50  ;;  %v4943_v50 = vsel %vm428_vm15, 1.0, %v10442_v40 }
 0x379   : > { %10651 = vst [vmem:[#allocation103_spill] sm:$0xff] %v8632_v19  ;;  %5197 = vmatmul.msk.f32.gmra.mxu1 %vm422_vm13, %v10280_v38  ;;  %v3493_v53 = vand.u32 4294901760, %v3492_v32 }
 0x37a   : > { %5132 = vmatmul.msk.f32.gmra.mxu2 %vm418_vm0, %v10280_v38  ;;  %3486 = vmatmul.f32.gmra.mxu0 %v3485_v42  ;;  %v2554_v27 = vpop.f32.mrf.mxu3  ;;  %vm10655_vm0 = vcmp.eq.s32.totalorder %v10648_v15, %v7235_v55  ;;  %v10184_v42 = vand.u32 4294901760, %v8651_v31 }
 0x37c   : > { %v2313_v60 = vpop.f32.mrf.mxu2 }
 0x37d   : > { %v2314_v22 = vadd.f32 %v2313_v60, %v7906_v37 }
 0x37e   : > { %v8659_v41 = vpop.f32.mrf.mxu1 }
 0x37f   : > { %10653 = vst [vmem:[#allocation104_spill] sm:$0xff] %v8659_v41  ;;  %v8661_v19 = vpop.f32.mrf.mxu0  ;;  %v8663_v0 = vadd.f32 %v2550_v14, %v2314_v22  ;;  %5166 = vmatmul.msk.f32.gmra.mxu3 %vm10655_vm0, %v10280_v38  ;;  %v8682_v22 = vsub.f32 %v4943_v50, %v4943_v50  ;;  %v3500_v14 = vsub.f32 %v8651_v31, %v10184_v42 }
 0x380   : > { %10654 = vst [vmem:[#allocation105_spill] sm:$0xff] %v8661_v19  ;;  %vm10187_vm0 = vcmp.eq.s32.totalorder %v10507_v10, %v8177_v13 }
 0x381   : > { %5198 = vmatmul.msk.f32.gmra.mxu1 %vm10183_vm14, %v10280_v38  ;;  %v3501_v50 = vand.u32 4294901760, %v3500_v14  ;;  %vm10659_vm14 = vcmp.eq.s32.totalorder %v10648_v15, %v7235_v55 }
 0x382   : > { %5133 = vmatmul.msk.f32.gmra.mxu2 %vm421_vm2, %v10280_v38  ;;  %3494 = vmatmul.f32.gmra.mxu0 %v3493_v53  ;;  %v2558_v37 = vpop.f32.mrf.mxu3  ;;  %vm10658_vm2 = vcmp.eq.s32.totalorder %v10652_v9, %v7235_v55  ;;  %v10186_v53 = vand.u32 4294901760, %v8682_v22 }
 0x384   : > { %v2321_v32 = vpop.f32.mrf.mxu2 }
 0x385   : > { %v2322_v60 = vadd.f32 %v2321_v32, %v7938_v47  ;;  %v4946_v47 = vsel %vm10187_vm0, 1.0, %v10442_v40  ;;  %v3508_v32 = vsub.f32 %v8682_v22, %v10186_v53 }
 0x386   : > { %v8688_v41 = vpop.f32.mrf.mxu1  ;;  %v8713_v14 = vsub.f32 %v4946_v47, %v4946_v47  ;;  %v1888_v47 = vadd.f32 %v7766_v24, %v7797_v52  ;;  %v10665_v24 = vld [vmem:[#allocation48_spill] sm:$0xff] }
 0x387   : > { %10656 = vst [vmem:[#allocation106_spill] sm:$0xff] %v8688_v41  ;;  %v8692_v19 = vpop.f32.mrf.mxu0  ;;  %v8694_v17 = vadd.f32 %v2554_v27, %v2322_v60  ;;  %5167 = vmatmul.msk.f32.gmra.mxu3 %vm10658_vm2, %v10280_v38  ;;  %vm10190_vm2 = vcmp.eq.s32.totalorder %v5925_v56, %v8177_v13 }
 0x388   : > { %10657 = vst [vmem:[#allocation107_spill] sm:$0xff] %v8692_v19  ;;  %v2049_v52 = vadd.f32 %v10665_v24, %v1888_v47  ;;  %v10669_v47 = vld [vmem:[#allocation54_spill] sm:$0xff] }
 0x389   : > { %5199 = vmatmul.msk.f32.gmra.mxu1 %vm428_vm15, %v10280_v38 }
 0x38a   : > { %5134 = vmatmul.msk.f32.gmra.mxu2 %vm10659_vm14, %v10280_v38  ;;  %3502 = vmatmul.f32.gmra.mxu0 %v3501_v50  ;;  %v2562_v27 = vpop.f32.mrf.mxu3  ;;  %vm10663_vm14 = vcmp.eq.s32.totalorder %v10507_v10, %v7235_v55  ;;  %v3509_v50 = vand.u32 4294901760, %v3508_v32 }
 0x38d   : > { %v2329_v60 = vpop.f32.mrf.mxu2 }
 0x38e   : > { %v2330_v42 = vadd.f32 %v2329_v60, %v7965_v54  ;;  %v8719_v41 = vpop.f32.mrf.mxu1  ;;  %v10189_v54 = vand.u32 4294901760, %v8713_v14 }
 0x38f   : > { %10660 = vst [vmem:[#allocation108_spill] sm:$0xff] %v8719_v41  ;;  %v8723_v19 = vpop.f32.mrf.mxu0  ;;  %5168 = vmatmul.msk.f32.gmra.mxu3 %vm10663_vm14, %v10280_v38  ;;  %vm10664_vm14 = vcmp.eq.s32.totalorder %v10652_v9, %v7235_v55 }
 0x390   : > { %10661 = vst [vmem:[#allocation109_spill] sm:$0xff] %v8723_v19  ;;  %v8725_v15 = vadd.f32 %v2558_v37, %v2330_v42  ;;  %v4949_v42 = vsel %vm10190_vm2, 1.0, %v10442_v40  ;;  %v3516_v60 = vsub.f32 %v8713_v14, %v10189_v54 }
 0x391   : > { %5200 = vmatmul.msk.f32.gmra.mxu1 %vm10187_vm0, %v10280_v38  ;;  %v8747_v32 = vsub.f32 %v4949_v42, %v4949_v42  ;;  %vm10193_vm0 = vcmp.eq.s32.totalorder %v5931_v61, %v8177_v13  ;;  %v2617_v42 = vadd.f32 %v10669_v47, %v7827_v20  ;;  %v10671_v20 = vld [vmem:[#allocation50_spill] sm:$0xff] }
 0x392   : > { %10662 = vst [vmem:[#allocation110_spill] sm:$0xff] %v8725_v15  ;;  %5135 = vmatmul.msk.f32.gmra.mxu2 %vm10664_vm14, %v10280_v38  ;;  %3510 = vmatmul.f32.gmra.mxu0 %v3509_v50  ;;  %v3226_v37 = vpop.f32.mrf.mxu3  ;;  %vm10668_vm14 = vcmp.eq.s32.totalorder %v5925_v56, %v7235_v55  ;;  %v3517_v50 = vand.u32 4294901760, %v3516_v60 }
 0x393   : > { %v2811_v24 = vadd.f32 %v10671_v20, %v2617_v42  ;;  %v2622_v42 = vadd.f32 %v7825_v45, %v7856_v58  ;;  %v10676_v45 = vld [vmem:[#allocation52_spill] sm:$0xff] }
 0x395   : > { %v2337_v53 = vpop.f32.mrf.mxu2  ;;  %v2817_v58 = vadd.f32 %v10676_v45, %v2622_v42  ;;  %v2627_v42 = vadd.f32 %v7854_v5, %v7886_v1  ;;  %v10681_v5 = vld [vmem:[#allocation56_spill] sm:$0xff] }
 0x396   : > { %v2338_v41 = vadd.f32 %v2337_v53, %v2049_v52  ;;  %v8752_v19 = vpop.f32.mrf.mxu1  ;;  %v10192_v53 = vand.u32 4294901760, %v8747_v32  ;;  %v10893_v12 = vld [vmem:[#allocation108_spill] sm:$0xff] }
 0x397   : > { %10666 = vst [vmem:[#allocation48_spill] sm:$0xff] %v8752_v19  ;;  %v8756_v15 = vpop.f32.mrf.mxu0  ;;  %5169 = vmatmul.msk.f32.gmra.mxu3 %vm10668_vm14, %v10280_v38  ;;  %vm10670_vm14 = vcmp.eq.s32.totalorder %v10507_v10, %v7235_v55  ;;  %v2823_v1 = vadd.f32 %v10681_v5, %v2627_v42  ;;  %v2632_v42 = vadd.f32 %v7884_v29, %v7915_v26  ;;  %v10687_v29 = vld [vmem:[#allocation58_spill] sm:$0xff] }
 0x398   : > { %10667 = vst [vmem:[#allocation111_spill] sm:$0xff] %v8756_v15  ;;  %v8758_v9 = vadd.f32 %v2562_v27, %v2338_v41  ;;  %v4952_v41 = vsel %vm10193_vm0, 1.0, %v10442_v40  ;;  %v3524_v60 = vsub.f32 %v8747_v32, %v10192_v53 }
 0x399   : > { %5201 = vmatmul.msk.f32.gmra.mxu1 %vm10190_vm2, %v10280_v38  ;;  %v8780_v52 = vsub.f32 %v4952_v41, %v4952_v41  ;;  %vm10195_vm2 = vcmp.eq.s32.totalorder %v5912_v49, %v8177_v13  ;;  %v2829_v26 = vadd.f32 %v10687_v29, %v2632_v42  ;;  %v10693_v42 = vld [vmem:[#allocation69_spill] sm:$0xff] }
 0x39a   : > { %5136 = vmatmul.msk.f32.gmra.mxu2 %vm10670_vm14, %v10280_v38  ;;  %3518 = vmatmul.f32.gmra.mxu0 %v3517_v50  ;;  %v3230_v27 = vpop.f32.mrf.mxu3  ;;  %vm10674_vm14 = vcmp.eq.s32.totalorder %v5931_v61, %v7235_v55  ;;  %v3525_v50 = vand.u32 4294901760, %v3524_v60 }
 0x39b   : > { %v10194_v41 = vand.u32 4294901760, %v8780_v52 }
 0x39d   : > { %v3065_v47 = vpop.f32.mrf.mxu2 }
 0x39e   : > { %v3066_v54 = vadd.f32 %v3065_v47, %v2811_v24  ;;  %v8785_v19 = vpop.f32.mrf.mxu1  ;;  %v3532_v24 = vsub.f32 %v8780_v52, %v10194_v41 }
 0x39f   : > { %10672 = vst [vmem:[#allocation54_spill] sm:$0xff] %v8785_v19  ;;  %v8789_v15 = vpop.f32.mrf.mxu0  ;;  %5170 = vmatmul.msk.f32.gmra.mxu3 %vm10674_vm14, %v10280_v38  ;;  %vm10675_vm14 = vcmp.eq.s32.totalorder %v5925_v56, %v7235_v55 }
 0x3a0   : > { %10673 = vst [vmem:[#allocation50_spill] sm:$0xff] %v8789_v15  ;;  %v8791_v10 = vadd.f32 %v3226_v37, %v3066_v54  ;;  %v4955_v54 = vsel %vm10195_vm2, 1.0, %v10442_v40 }
 0x3a1   : > { %5202 = vmatmul.msk.f32.gmra.mxu1 %vm10193_vm0, %v10280_v38  ;;  %v8813_v20 = vsub.f32 %v4955_v54, %v4955_v54  ;;  %vm10197_vm0 = vcmp.eq.s32.totalorder %v5972_v36, %v8177_v13 }
 0x3a2   : > { %5137 = vmatmul.msk.f32.gmra.mxu2 %vm10675_vm14, %v10280_v38  ;;  %3526 = vmatmul.f32.gmra.mxu0 %v3525_v50  ;;  %v3234_v37 = vpop.f32.mrf.mxu3  ;;  %vm10679_vm14 = vcmp.eq.s32.totalorder %v5912_v49, %v7235_v55  ;;  %v3533_v50 = vand.u32 4294901760, %v3532_v24 }
 0x3a3   : > { %v10196_v54 = vand.u32 4294901760, %v8813_v20 }
 0x3a5   : > { %v3069_v60 = vpop.f32.mrf.mxu2  ;;  %v3540_v24 = vsub.f32 %v8813_v20, %v10196_v54 }
 0x3a6   : > { %v3070_v47 = vadd.f32 %v3069_v60, %v2817_v58  ;;  %v8818_v53 = vpop.f32.mrf.mxu1 }
 0x3a7   : > { %10677 = vst [vmem:[#allocation52_spill] sm:$0xff] %v8818_v53  ;;  %v8822_v19 = vpop.f32.mrf.mxu0  ;;  %5171 = vmatmul.msk.f32.gmra.mxu3 %vm10679_vm14, %v10280_v38  ;;  %vm10680_vm14 = vcmp.eq.s32.totalorder %v5931_v61, %v7235_v55 }
 0x3a8   : > { %10678 = vst [vmem:[#allocation112_spill] sm:$0xff] %v8822_v19  ;;  %v8824_v15 = vadd.f32 %v3230_v27, %v3070_v47  ;;  %v4958_v27 = vsel %vm10197_vm0, 1.0, %v10442_v40 }
 0x3a9   : > { %5203 = vmatmul.msk.f32.gmra.mxu1 %vm10195_vm2, %v10280_v38  ;;  %v8846_v58 = vsub.f32 %v4958_v27, %v4958_v27  ;;  %vm10199_vm2 = vcmp.eq.s32.totalorder %v6012_v6, %v8177_v13 }
 0x3aa   : > { %5138 = vmatmul.msk.f32.gmra.mxu2 %vm10680_vm14, %v10280_v38  ;;  %3534 = vmatmul.f32.gmra.mxu0 %v3533_v50  ;;  %v3238_v45 = vpop.f32.mrf.mxu3  ;;  %vm10685_vm14 = vcmp.eq.s32.totalorder %v5972_v36, %v7235_v55  ;;  %v3541_v50 = vand.u32 4294901760, %v3540_v24 }
 0x3ab   : > { %10682 = vst [vmem:[#allocation56_spill] sm:$0xff] %v8846_v58  ;;  %v10198_v27 = vand.u32 4294901760, %v8846_v58 }
 0x3ad   : > { %v3073_v60 = vpop.f32.mrf.mxu2  ;;  %v3548_v24 = vsub.f32 %v8846_v58, %v10198_v27 }
 0x3ae   : > { %v3074_v47 = vadd.f32 %v3073_v60, %v2823_v1  ;;  %v8851_v41 = vpop.f32.mrf.mxu1 }
 0x3af   : > { %10683 = vst [vmem:[#allocation113_spill] sm:$0xff] %v8851_v41  ;;  %v8855_v53 = vpop.f32.mrf.mxu0  ;;  %5172 = vmatmul.msk.f32.gmra.mxu3 %vm10685_vm14, %v10280_v38  ;;  %vm10686_vm14 = vcmp.eq.s32.totalorder %v5912_v49, %v7235_v55 }
 0x3b0   : > { %10684 = vst [vmem:[#allocation114_spill] sm:$0xff] %v8855_v53  ;;  %v8857_v19 = vadd.f32 %v3234_v37, %v3074_v47  ;;  %v4961_v37 = vsel %vm10199_vm2, 1.0, %v10442_v40 }
 0x3b1   : > { %5204 = vmatmul.msk.f32.gmra.mxu1 %vm10197_vm0, %v10280_v38  ;;  %v8879_v1 = vsub.f32 %v4961_v37, %v4961_v37  ;;  %vm10205_vm0 = vcmp.eq.s32.totalorder %v6036_v21, %v8177_v13  ;;  %v10694_v37 = vld [vmem:[#allocation64_spill] sm:$0xff] }
 0x3b2   : > { %5139 = vmatmul.msk.f32.gmra.mxu2 %vm10686_vm14, %v10280_v38  ;;  %3542 = vmatmul.f32.gmra.mxu0 %v3541_v50  ;;  %v3242_v5 = vpop.f32.mrf.mxu3  ;;  %vm10692_vm14 = vcmp.eq.s32.totalorder %v6012_v6, %v7235_v55  ;;  %v3549_v50 = vand.u32 4294901760, %v3548_v24  ;;  %v2637_v29 = vadd.f32 %v10694_v37, %v10693_v42 }
 0x3b3   : > { %10688 = vst [vmem:[#allocation58_spill] sm:$0xff] %v8879_v1 }
 0x3b5   : > { %v3077_v60 = vpop.f32.mrf.mxu2 }
 0x3b6   : > { %v3078_v47 = vadd.f32 %v3077_v60, %v2829_v26  ;;  %v8884_v54 = vpop.f32.mrf.mxu1  ;;  %v10204_v26 = vand.u32 4294901760, %v8879_v1  ;;  %v10696_v60 = vld [vmem:[#allocation60_spill] sm:$0xff] }
 0x3b7   : > { %10689 = vst [vmem:[#allocation115_spill] sm:$0xff] %v8884_v54  ;;  %v8888_v41 = vpop.f32.mrf.mxu0  ;;  %5173 = vmatmul.msk.f32.gmra.mxu3 %vm10692_vm14, %v10280_v38  ;;  %vm10695_vm14 = vcmp.eq.s32.totalorder %v5972_v36, %v7235_v55 }
 0x3b8   : > { %10690 = vst [vmem:[#allocation116_spill] sm:$0xff] %v8888_v41  ;;  %v8890_v53 = vadd.f32 %v3238_v45, %v3078_v47  ;;  %v4964_v45 = vsel %vm10205_vm0, 1.0, %v10442_v40  ;;  %v2835_v47 = vadd.f32 %v10696_v60, %v2637_v29  ;;  %v3556_v37 = vsub.f32 %v8879_v1, %v10204_v26  ;;  %v10703_v29 = vld [vmem:[#allocation77_spill] sm:$0xff] }
 0x3b9   : > { %5205 = vmatmul.msk.f32.gmra.mxu1 %vm10199_vm2, %v10280_v38  ;;  %v8912_v42 = vsub.f32 %v4964_v45, %v4964_v45  ;;  %v10704_v45 = vld [vmem:[#allocation67_spill] sm:$0xff] }
 0x3ba   : > { %10691 = vst [vmem:[#allocation117_spill] sm:$0xff] %v8890_v53  ;;  %5140 = vmatmul.msk.f32.gmra.mxu2 %vm10695_vm14, %v10280_v38  ;;  %3550 = vmatmul.f32.gmra.mxu0 %v3549_v50  ;;  %v3246_v24 = vpop.f32.mrf.mxu3  ;;  %v10699_v53 = vld [vmem:[#allocation17_spill] sm:$0xff]  ;;  %vm10702_vm14 = vcmp.eq.s32.totalorder %v6036_v21, %v7235_v55  ;;  %v3557_v50 = vand.u32 4294901760, %v3556_v37  ;;  %v2642_v60 = vadd.f32 %v10704_v45, %v10703_v29 }
 0x3bb   : > { %10697 = vst [vmem:[#allocation69_spill] sm:$0xff] %v8912_v42  ;;  %vm10211_vm2 = vcmp.eq.s32.totalorder %v10699_v53, %v8177_v13 }
 0x3bd   : > { %v3081_v27 = vpop.f32.mrf.mxu2 }
 0x3be   : > { %v3082_v54 = vadd.f32 %v3081_v27, %v2835_v47  ;;  %v8917_v41 = vpop.f32.mrf.mxu1  ;;  %v10210_v27 = vand.u32 4294901760, %v8912_v42  ;;  %v10706_v47 = vld [vmem:[#allocation62_spill] sm:$0xff] }
 0x3bf   : > { %10698 = vst [vmem:[#allocation64_spill] sm:$0xff] %v8917_v41  ;;  %v8921_v58 = vpop.f32.mrf.mxu0  ;;  %5174 = vmatmul.msk.f32.gmra.mxu3 %vm10702_vm14, %v10280_v38  ;;  %vm10705_vm14 = vcmp.eq.s32.totalorder %v6012_v6, %v7235_v55  ;;  %v2841_v37 = vadd.f32 %v10706_v47, %v2642_v60  ;;  %v10713_v60 = vld [vmem:[#allocation81_spill] sm:$0xff] }
 0x3c0   : > { %10700 = vst [vmem:[#allocation60_spill] sm:$0xff] %v8921_v58  ;;  %v8923_v36 = vadd.f32 %v3242_v5, %v3082_v54  ;;  %v4967_v54 = vsel %vm10211_vm2, 1.0, %v10442_v40  ;;  %v3564_v45 = vsub.f32 %v8912_v42, %v10210_v27 }
 0x3c1   : > { %5206 = vmatmul.msk.f32.gmra.mxu1 %vm10205_vm0, %v10280_v38  ;;  %v8945_v29 = vsub.f32 %v4967_v54, %v4967_v54  ;;  %v10714_v54 = vld [vmem:[#allocation73_spill] sm:$0xff] }
 0x3c2   : > { %10701 = vst [vmem:[#allocation118_spill] sm:$0xff] %v8923_v36  ;;  %5141 = vmatmul.msk.f32.gmra.mxu2 %vm10705_vm14, %v10280_v38  ;;  %3558 = vmatmul.f32.gmra.mxu0 %v3557_v50  ;;  %v3250_v5 = vpop.f32.mrf.mxu3  ;;  %v10709_v36 = vld [vmem:[#allocation19_spill] sm:$0xff]  ;;  %vm10712_vm14 = vcmp.eq.s32.totalorder %v10699_v53, %v7235_v55  ;;  %v3565_v50 = vand.u32 4294901760, %v3564_v45  ;;  %v2647_v47 = vadd.f32 %v10714_v54, %v10713_v60 }
 0x3c3   : > { %10707 = vst [vmem:[#allocation77_spill] sm:$0xff] %v8945_v29  ;;  %vm10217_vm0 = vcmp.eq.s32.totalorder %v10709_v36, %v8177_v13 }
 0x3c5   : > { %v3085_v26 = vpop.f32.mrf.mxu2 }
 0x3c6   : > { %v3086_v41 = vadd.f32 %v3085_v26, %v2841_v37  ;;  %v8950_v58 = vpop.f32.mrf.mxu1  ;;  %v10216_v26 = vand.u32 4294901760, %v8945_v29  ;;  %v10716_v37 = vld [vmem:[#allocation65_spill] sm:$0xff] }
 0x3c7   : > { %10708 = vst [vmem:[#allocation67_spill] sm:$0xff] %v8950_v58  ;;  %v8954_v1 = vpop.f32.mrf.mxu0  ;;  %5175 = vmatmul.msk.f32.gmra.mxu3 %vm10712_vm14, %v10280_v38  ;;  %vm10715_vm14 = vcmp.eq.s32.totalorder %v6036_v21, %v7235_v55  ;;  %v2847_v45 = vadd.f32 %v10716_v37, %v2647_v47  ;;  %v10723_v47 = vld [vmem:[#allocation83_spill] sm:$0xff] }
 0x3c8   : > { %10710 = vst [vmem:[#allocation62_spill] sm:$0xff] %v8954_v1  ;;  %v8956_v6 = vadd.f32 %v3246_v24, %v3086_v41  ;;  %v4970_v41 = vsel %vm10217_vm0, 1.0, %v10442_v40  ;;  %v3572_v54 = vsub.f32 %v8945_v29, %v10216_v26 }
 0x3c9   : > { %5207 = vmatmul.msk.f32.gmra.mxu1 %vm10211_vm2, %v10280_v38  ;;  %v8978_v60 = vsub.f32 %v4970_v41, %v4970_v41  ;;  %v10724_v41 = vld [vmem:[#allocation25_spill] sm:$0xff] }
 0x3ca   : > { %10711 = vst [vmem:[#allocation119_spill] sm:$0xff] %v8956_v6  ;;  %5142 = vmatmul.msk.f32.gmra.mxu2 %vm10715_vm14, %v10280_v38  ;;  %3566 = vmatmul.f32.gmra.mxu0 %v3565_v50  ;;  %v3254_v24 = vpop.f32.mrf.mxu3  ;;  %v10719_v6 = vld [vmem:[#allocation21_spill] sm:$0xff]  ;;  %vm10722_vm14 = vcmp.eq.s32.totalorder %v10709_v36, %v7235_v55  ;;  %v3573_v50 = vand.u32 4294901760, %v3572_v54  ;;  %v2652_v37 = vadd.f32 %v10724_v41, %v10723_v47 }
 0x3cb   : > { %10717 = vst [vmem:[#allocation81_spill] sm:$0xff] %v8978_v60  ;;  %vm10222_vm2 = vcmp.eq.s32.totalorder %v10719_v6, %v8177_v13 }
 0x3cd   : > { %v3089_v27 = vpop.f32.mrf.mxu2 }
 0x3ce   : > { %v3090_v58 = vadd.f32 %v3089_v27, %v2847_v45  ;;  %v8983_v1 = vpop.f32.mrf.mxu1  ;;  %v10221_v27 = vand.u32 4294901760, %v8978_v60  ;;  %v10726_v45 = vld [vmem:[#allocation71_spill] sm:$0xff] }
 0x3cf   : > { %10718 = vst [vmem:[#allocation73_spill] sm:$0xff] %v8983_v1  ;;  %v8987_v42 = vpop.f32.mrf.mxu0  ;;  %5176 = vmatmul.msk.f32.gmra.mxu3 %vm10722_vm14, %v10280_v38  ;;  %vm10725_vm14 = vcmp.eq.s32.totalorder %v10699_v53, %v7235_v55  ;;  %v2853_v54 = vadd.f32 %v10726_v45, %v2652_v37  ;;  %v10733_v37 = vld [vmem:[#allocation86_spill] sm:$0xff] }
 0x3d0   : > { %10720 = vst [vmem:[#allocation65_spill] sm:$0xff] %v8987_v42  ;;  %v8989_v21 = vadd.f32 %v3250_v5, %v3090_v58  ;;  %v4973_v58 = vsel %vm10222_vm2, 1.0, %v10442_v40  ;;  %v3580_v41 = vsub.f32 %v8978_v60, %v10221_v27 }
 0x3d1   : > { %5208 = vmatmul.msk.f32.gmra.mxu1 %vm10217_vm0, %v10280_v38  ;;  %v9011_v47 = vsub.f32 %v4973_v58, %v4973_v58  ;;  %v10734_v58 = vld [vmem:[#allocation82_spill] sm:$0xff] }
 0x3d2   : > { %10721 = vst [vmem:[#allocation120_spill] sm:$0xff] %v8989_v21  ;;  %5143 = vmatmul.msk.f32.gmra.mxu2 %vm10725_vm14, %v10280_v38  ;;  %3574 = vmatmul.f32.gmra.mxu0 %v3573_v50  ;;  %v3258_v5 = vpop.f32.mrf.mxu3  ;;  %v10729_v21 = vld [vmem:[#allocation23_spill] sm:$0xff]  ;;  %vm10732_vm14 = vcmp.eq.s32.totalorder %v10719_v6, %v7235_v55  ;;  %v3581_v50 = vand.u32 4294901760, %v3580_v41  ;;  %v2657_v45 = vadd.f32 %v10734_v58, %v10733_v37 }
 0x3d3   : > { %10727 = vst [vmem:[#allocation83_spill] sm:$0xff] %v9011_v47  ;;  %vm10227_vm0 = vcmp.eq.s32.totalorder %v10729_v21, %v8177_v13 }
 0x3d5   : > { %v3093_v26 = vpop.f32.mrf.mxu2 }
 0x3d6   : > { %v3094_v1 = vadd.f32 %v3093_v26, %v2853_v54  ;;  %v9016_v42 = vpop.f32.mrf.mxu1  ;;  %v10226_v26 = vand.u32 4294901760, %v9011_v47  ;;  %v10736_v54 = vld [vmem:[#allocation79_spill] sm:$0xff] }
 0x3d7   : > { %10728 = vst [vmem:[#allocation25_spill] sm:$0xff] %v9016_v42  ;;  %v9020_v29 = vpop.f32.mrf.mxu0  ;;  %5177 = vmatmul.msk.f32.gmra.mxu3 %vm10732_vm14, %v10280_v38  ;;  %vm10735_vm14 = vcmp.eq.s32.totalorder %v10709_v36, %v7235_v55  ;;  %v2859_v41 = vadd.f32 %v10736_v54, %v2657_v45  ;;  %v10743_v45 = vld [vmem:[#allocation89_spill] sm:$0xff] }
 0x3d8   : > { %10730 = vst [vmem:[#allocation71_spill] sm:$0xff] %v9020_v29  ;;  %v9022_v53 = vadd.f32 %v3254_v24, %v3094_v1  ;;  %v4976_v1 = vsel %vm10227_vm0, 1.0, %v10442_v40  ;;  %v3588_v58 = vsub.f32 %v9011_v47, %v10226_v26 }
 0x3d9   : > { %5209 = vmatmul.msk.f32.gmra.mxu1 %vm10222_vm2, %v10280_v38  ;;  %v9044_v37 = vsub.f32 %v4976_v1, %v4976_v1  ;;  %v10744_v1 = vld [vmem:[#allocation85_spill] sm:$0xff] }
 0x3da   : > { %10731 = vst [vmem:[#allocation121_spill] sm:$0xff] %v9022_v53  ;;  %5144 = vmatmul.msk.f32.gmra.mxu2 %vm10735_vm14, %v10280_v38  ;;  %3582 = vmatmul.f32.gmra.mxu0 %v3581_v50  ;;  %v3262_v24 = vpop.f32.mrf.mxu3  ;;  %v10739_v53 = vld [vmem:[#allocation26_spill] sm:$0xff]  ;;  %vm10742_vm14 = vcmp.eq.s32.totalorder %v10729_v21, %v7235_v55  ;;  %v3589_v50 = vand.u32 4294901760, %v3588_v58  ;;  %v2662_v54 = vadd.f32 %v10744_v1, %v10743_v45 }
 0x3db   : > { %10737 = vst [vmem:[#allocation86_spill] sm:$0xff] %v9044_v37  ;;  %vm10232_vm2 = vcmp.eq.s32.totalorder %v10739_v53, %v8177_v13 }
 0x3dd   : > { %v3097_v27 = vpop.f32.mrf.mxu2 }
 0x3de   : > { %v3098_v42 = vadd.f32 %v3097_v27, %v2859_v41  ;;  %v9049_v29 = vpop.f32.mrf.mxu1  ;;  %v10231_v27 = vand.u32 4294901760, %v9044_v37  ;;  %v10746_v41 = vld [vmem:[#allocation28_spill] sm:$0xff] }
 0x3df   : > { %10738 = vst [vmem:[#allocation82_spill] sm:$0xff] %v9049_v29  ;;  %v9053_v60 = vpop.f32.mrf.mxu0  ;;  %5178 = vmatmul.msk.f32.gmra.mxu3 %vm10742_vm14, %v10280_v38  ;;  %vm10745_vm14 = vcmp.eq.s32.totalorder %v10719_v6, %v7235_v55  ;;  %v2865_v58 = vadd.f32 %v10746_v41, %v2662_v54  ;;  %v10752_v54 = vld [vmem:[#allocation92_spill] sm:$0xff] }
 0x3e0   : > { %10740 = vst [vmem:[#allocation79_spill] sm:$0xff] %v9053_v60  ;;  %v9055_v36 = vadd.f32 %v3258_v5, %v3098_v42  ;;  %v4979_v42 = vsel %vm10232_vm2, 1.0, %v10442_v40  ;;  %v3596_v1 = vsub.f32 %v9044_v37, %v10231_v27 }
 0x3e1   : > { %5210 = vmatmul.msk.f32.gmra.mxu1 %vm10227_vm0, %v10280_v38  ;;  %v9077_v45 = vsub.f32 %v4979_v42, %v4979_v42  ;;  %v10753_v42 = vld [vmem:[#allocation88_spill] sm:$0xff] }
 0x3e2   : > { %10741 = vst [vmem:[#allocation122_spill] sm:$0xff] %v9055_v36  ;;  %5145 = vmatmul.msk.f32.gmra.mxu2 %vm10745_vm14, %v10280_v38  ;;  %3590 = vmatmul.f32.gmra.mxu0 %v3589_v50  ;;  %v3266_v5 = vpop.f32.mrf.mxu3  ;;  %v10748_v36 = vld [vmem:[#allocation29_spill] sm:$0xff]  ;;  %vm10751_vm14 = vcmp.eq.s32.totalorder %v10739_v53, %v7235_v55  ;;  %v3597_v50 = vand.u32 4294901760, %v3596_v1  ;;  %v2667_v41 = vadd.f32 %v10753_v42, %v10752_v54 }
 0x3e3   : > { %vm10237_vm0 = vcmp.eq.s32.totalorder %v10748_v36, %v8177_v13 }
 0x3e5   : > { %v3101_v26 = vpop.f32.mrf.mxu2 }
 0x3e6   : > { %v3102_v29 = vadd.f32 %v3101_v26, %v2865_v58  ;;  %v9082_v60 = vpop.f32.mrf.mxu1  ;;  %v10236_v26 = vand.u32 4294901760, %v9077_v45  ;;  %v10755_v58 = vld [vmem:[#allocation84_spill] sm:$0xff] }
 0x3e7   : > { %10747 = vst [vmem:[#allocation89_spill] sm:$0xff] %v9082_v60  ;;  %v9086_v47 = vpop.f32.mrf.mxu0  ;;  %5179 = vmatmul.msk.f32.gmra.mxu3 %vm10751_vm14, %v10280_v38  ;;  %vm10754_vm14 = vcmp.eq.s32.totalorder %v10729_v21, %v7235_v55  ;;  %v2871_v1 = vadd.f32 %v10755_v58, %v2667_v41  ;;  %v10761_v41 = vld [vmem:[#allocation46_spill] sm:$0xff] }
 0x3e8   : > { %10749 = vst [vmem:[#allocation85_spill] sm:$0xff] %v9086_v47  ;;  %v9088_v6 = vadd.f32 %v3262_v24, %v3102_v29  ;;  %v4982_v29 = vsel %vm10237_vm0, 1.0, %v10442_v40  ;;  %v3604_v42 = vsub.f32 %v9077_v45, %v10236_v26 }
 0x3e9   : > { %5211 = vmatmul.msk.f32.gmra.mxu1 %vm10232_vm2, %v10280_v38  ;;  %v9110_v54 = vsub.f32 %v4982_v29, %v4982_v29  ;;  %v10762_v29 = vld [vmem:[#allocation91_spill] sm:$0xff] }
 0x3ea   : > { %10750 = vst [vmem:[#allocation28_spill] sm:$0xff] %v9088_v6  ;;  %5146 = vmatmul.msk.f32.gmra.mxu2 %vm10754_vm14, %v10280_v38  ;;  %3598 = vmatmul.f32.gmra.mxu0 %v3597_v50  ;;  %v3270_v24 = vpop.f32.mrf.mxu3  ;;  %v10757_v6 = vld [vmem:[#allocation32_spill] sm:$0xff]  ;;  %vm10760_vm14 = vcmp.eq.s32.totalorder %v10748_v36, %v7235_v55  ;;  %v3605_v50 = vand.u32 4294901760, %v3604_v42  ;;  %v2672_v58 = vadd.f32 %v10762_v29, %v10761_v41 }
 0x3eb   : > { %vm10240_vm2 = vcmp.eq.s32.totalorder %v10757_v6, %v8177_v13 }
 0x3ed   : > { %v3105_v27 = vpop.f32.mrf.mxu2 }
 0x3ee   : > { %v3106_v60 = vadd.f32 %v3105_v27, %v2871_v1  ;;  %v9115_v47 = vpop.f32.mrf.mxu1  ;;  %v10239_v27 = vand.u32 4294901760, %v9110_v54  ;;  %v10764_v1 = vld [vmem:[#allocation87_spill] sm:$0xff] }
 0x3ef   : > { %10756 = vst [vmem:[#allocation92_spill] sm:$0xff] %v9115_v47  ;;  %v9119_v37 = vpop.f32.mrf.mxu0  ;;  %5180 = vmatmul.msk.f32.gmra.mxu3 %vm10760_vm14, %v10280_v38  ;;  %vm10763_vm14 = vcmp.eq.s32.totalorder %v10739_v53, %v7235_v55  ;;  %v2877_v42 = vadd.f32 %v10764_v1, %v2672_v58  ;;  %v10769_v58 = vld [vmem:[#allocation51_spill] sm:$0xff] }
 0x3f0   : > { %10758 = vst [vmem:[#allocation88_spill] sm:$0xff] %v9119_v37  ;;  %v9121_v21 = vadd.f32 %v3266_v5, %v3106_v60  ;;  %v4985_v60 = vsel %vm10240_vm2, 1.0, %v10442_v40  ;;  %v3612_v29 = vsub.f32 %v9110_v54, %v10239_v27 }
 0x3f1   : > { %5212 = vmatmul.msk.f32.gmra.mxu1 %vm10237_vm0, %v10280_v38  ;;  %v9143_v41 = vsub.f32 %v4985_v60, %v4985_v60  ;;  %vm10243_vm0 = vcmp.eq.s32.totalorder %v10549_v25, %v8177_v13  ;;  %v10770_v60 = vld [vmem:[#allocation35_spill] sm:$0xff] }
 0x3f2   : > { %10759 = vst [vmem:[#allocation84_spill] sm:$0xff] %v9121_v21  ;;  %5147 = vmatmul.msk.f32.gmra.mxu2 %vm10763_vm14, %v10280_v38  ;;  %3606 = vmatmul.f32.gmra.mxu0 %v3605_v50  ;;  %v3274_v5 = vpop.f32.mrf.mxu3  ;;  %vm10768_vm14 = vcmp.eq.s32.totalorder %v10757_v6, %v7235_v55  ;;  %v3613_v50 = vand.u32 4294901760, %v3612_v29  ;;  %v2677_v1 = vadd.f32 %v10770_v60, %v10769_v58 }
 0x3f5   : > { %v3109_v26 = vpop.f32.mrf.mxu2 }
 0x3f6   : > { %v3110_v47 = vadd.f32 %v3109_v26, %v2877_v42  ;;  %v9148_v37 = vpop.f32.mrf.mxu1  ;;  %v10242_v26 = vand.u32 4294901760, %v9143_v41  ;;  %v10772_v42 = vld [vmem:[#allocation90_spill] sm:$0xff] }
 0x3f7   : > { %10765 = vst [vmem:[#allocation32_spill] sm:$0xff] %v9148_v37  ;;  %v9152_v21 = vpop.f32.mrf.mxu0  ;;  %5181 = vmatmul.msk.f32.gmra.mxu3 %vm10768_vm14, %v10280_v38  ;;  %vm10771_vm14 = vcmp.eq.s32.totalorder %v10748_v36, %v7235_v55  ;;  %v2883_v29 = vadd.f32 %v10772_v42, %v2677_v1  ;;  %v10776_v1 = vld [vmem:[#allocation61_spill] sm:$0xff] }
 0x3f8   : > { %10766 = vst [vmem:[#allocation46_spill] sm:$0xff] %v9152_v21  ;;  %v9154_v53 = vadd.f32 %v3270_v24, %v3110_v47  ;;  %v4988_v47 = vsel %vm10243_vm0, 1.0, %v10442_v40  ;;  %v3620_v60 = vsub.f32 %v9143_v41, %v10242_v26 }
 0x3f9   : > { %5213 = vmatmul.msk.f32.gmra.mxu1 %vm10240_vm2, %v10280_v38  ;;  %v9176_v58 = vsub.f32 %v4988_v47, %v4988_v47  ;;  %vm476_vm2 = vcmp.eq.s32.totalorder %v10561_v8, %v8177_v13  ;;  %v2682_v47 = vadd.f32 %v10776_v1, %v8192_v16 }
 0x3fa   : > { %10767 = vst [vmem:[#allocation91_spill] sm:$0xff] %v9154_v53  ;;  %5148 = vmatmul.msk.f32.gmra.mxu2 %vm10771_vm14, %v10280_v38  ;;  %3614 = vmatmul.f32.gmra.mxu0 %v3613_v50  ;;  %v3278_v24 = vpop.f32.mrf.mxu3  ;;  %vm10775_vm14 = vcmp.eq.s32.totalorder %v10549_v25, %v7235_v55  ;;  %v3621_v50 = vand.u32 4294901760, %v3620_v60 }
 0x3fb   : > { %v10244_v42 = vand.u32 4294901760, %v9176_v58 }
 0x3fd   : > { %v3113_v27 = vpop.f32.mrf.mxu2 }
 0x3fe   : > { %v3114_v37 = vadd.f32 %v3113_v27, %v2883_v29  ;;  %v9183_v21 = vpop.f32.mrf.mxu1  ;;  %v4991_v27 = vsel %vm476_vm2, 1.0, %v10442_v40  ;;  %v3628_v40 = vsub.f32 %v9176_v58, %v10244_v42 }
 0x3ff   : > { %10773 = vst [vmem:[#allocation87_spill] sm:$0xff] %v9183_v21  ;;  %v9185_v53 = vpop.f32.mrf.mxu0  ;;  %5182 = vmatmul.msk.f32.gmra.mxu3 %vm10775_vm14, %v10280_v38  ;;  %vm10777_vm14 = vcmp.eq.s32.totalorder %v10757_v6, %v7235_v55  ;;  %v9208_v16 = vsub.f32 %v4991_v27, %v4991_v27 }
 0x400   : > { %10774 = vst [vmem:[#allocation51_spill] sm:$0xff] %v9185_v53  ;;  %v9187_v36 = vadd.f32 %v3274_v5, %v3114_v37  ;;  %v10778_v5 = vld [vmem:[#allocation34_spill] sm:$0xff] }
 0x401   : > { %5214 = vmatmul.msk.f32.gmra.mxu1 %vm10243_vm0, %v10280_v38  ;;  %v2889_v29 = vadd.f32 %v10778_v5, %v2682_v47  ;;  %v2687_v47 = vadd.f32 %v8187_v39, %v8223_v59  ;;  %v10245_v27 = vand.u32 4294901760, %v9208_v16  ;;  %vm10782_vm0 = vcmp.eq.s32.totalorder %v10549_v25, %v7235_v55  ;;  %v10783_v5 = vld [vmem:[#allocation53_spill] sm:$0xff] }
 0x402   : > { %5149 = vmatmul.msk.f32.gmra.mxu2 %vm10777_vm14, %v10280_v38  ;;  %3622 = vmatmul.f32.gmra.mxu0 %v3621_v50  ;;  %v3282_v37 = vpop.f32.mrf.mxu3  ;;  %vm10781_vm14 = vcmp.eq.s32.totalorder %v10561_v8, %v7235_v55  ;;  %v3629_v50 = vand.u32 4294901760, %v3628_v40 }
 0x403   : > { %v3636_v39 = vsub.f32 %v9208_v16, %v10245_v27 }
 0x405   : > { %v3117_v60 = vpop.f32.mrf.mxu2 }
 0x406   : > { %v3118_v1 = vadd.f32 %v3117_v60, %v2889_v29  ;;  %v9214_v26 = vpop.f32.mrf.mxu1  ;;  %v2895_v29 = vadd.f32 %v10783_v5, %v2687_v47 }
 0x407   : > { %10779 = vst [vmem:[#allocation35_spill] sm:$0xff] %v9214_v26  ;;  %v9216_v21 = vpop.f32.mrf.mxu0  ;;  %5183 = vmatmul.msk.f32.gmra.mxu3 %vm10781_vm14, %v10280_v38  ;;  %v10784_v26 = vand.u32 4294901760, %v8207_v46 }
 0x408   : > { %10780 = vst [vmem:[#allocation90_spill] sm:$0xff] %v9216_v21  ;;  %v9218_v53 = vadd.f32 %v3278_v24, %v3118_v1  ;;  %v3637_v21 = vand.u32 4294901760, %v3636_v39 }
 0x409   : > { %5215 = vmatmul.msk.f32.gmra.mxu1 %vm476_vm2, %v10280_v38 }
 0x40a   : > { %5150 = vmatmul.msk.f32.gmra.mxu2 %vm10782_vm0, %v10280_v38  ;;  %3630 = vmatmul.f32.gmra.mxu0 %v3629_v50  ;;  %v3286_v24 = vpop.f32.mrf.mxu3  ;;  %v2692_v50 = vadd.f32 %v8217_v28, %v8256_v33  ;;  %vm10785_vm0 = vcmp.eq.s32.totalorder %v10579_v2, %v8177_v13  ;;  %v10786_v33 = vand.u32 4294901760, %v8245_v30 }
 0x40c   : > { %v2901_v47 = vadd.f32 %v8185_v23, %v2692_v50  ;;  %v10787_v50 = vand.u32 4294901760, %v8276_v18 }
 0x40d   : > { %v3121_v59 = vpop.f32.mrf.mxu2 }
 0x40e   : > { %v3122_v40 = vadd.f32 %v3121_v59, %v2895_v29  ;;  %v9239_v60 = vpop.f32.mrf.mxu1  ;;  %v2697_v59 = vadd.f32 %v8253_v43, %v8290_v35 }
 0x40f   : > { %v9241_v1 = vpop.f32.mrf.mxu0  ;;  %4111 = vmatmul.f32.vlgmr.msra.gmra.mxu3 %v10784_v26 }
 0x410   : > { %v9243_v42 = vadd.f32 %v3282_v37, %v3122_v40  ;;  %v2907_v55 = vadd.f32 %v8213_v51, %v2697_v59  ;;  %v10789_v51 = vld [vmem:[#allocation31_spill] sm:$0xff] }
 0x411   : > { %5248 = vmatmul.msk.f32.vlgmr.msra.gmra.mxu1 %vm10785_vm0, %v10280_v38 }
 0x412   : > { %5151 = vmatmul.msk.f32.gmra.mxu2 %vm10781_vm14, %v10280_v38  ;;  %3638 = vmatmul.f32.gmra.mxu0 %v3637_v21  ;;  %v3290_v37 = vpop.f32.mrf.mxu3  ;;  %vm10788_vm14 = vcmp.eq.s32.totalorder %v10595_v62, %v8177_v13  ;;  %v10873_v62 = vld [vmem:[#allocation38_spill] sm:$0xff] }
 0x415   : > { %v3125_v5 = vpop.f32.mrf.mxu2 }
 0x416   : > { %v3126_v26 = vadd.f32 %v3125_v5, %v2901_v47  ;;  %v9258_v29 = vpop.f32.mrf.mxu1 }
 0x417   : > { %v9260_v39 = vpop.f32.mrf.mxu0  ;;  %4117 = vmatmul.f32.gmra.mxu3 %v10786_v33  ;;  %v10791_v33 = vld [vmem:[#allocation55_spill] sm:$0xff] }
 0x418   : > { %v9262_v28 = vadd.f32 %v3286_v24, %v3126_v26  ;;  %v10792_v59 = vand.u32 4294901760, %v10791_v33 }
 0x419   : > { %5249 = vmatmul.msk.f32.gmra.mxu1 %vm386_vm7, %v10280_v38 }
 0x41a   : > { %3917 = vmatmul.f32.vlgmr.msra.gmra.mxu2 %v8207_v46  ;;  %5216 = vmatmul.msk.f32.vlgmr.msra.gmra.mxu0 %vm10785_vm0, %v10280_v38  ;;  %v3294_v21 = vpop.f32.mrf.mxu3  ;;  %v2702_v46 = vadd.f32 %v8287_v63, %v8322_v3 }
 0x41d   : > { %v3129_v23 = vpop.f32.mrf.mxu2 }
 0x41e   : > { %v3130_v24 = vadd.f32 %v3129_v23, %v2907_v55  ;;  %v9278_v40 = vpop.f32.mrf.mxu1  ;;  %v10794_v55 = vld [vmem:[#allocation37_spill] sm:$0xff] }
 0x41f   : > { %v9280_v43 = vpop.f32.mrf.mxu0  ;;  %4123 = vmatmul.f32.gmra.mxu3 %v10787_v50 }
 0x420   : > { %v9282_v35 = vadd.f32 %v3290_v37, %v3130_v24  ;;  %v2913_v37 = vadd.f32 %v10789_v51, %v2702_v46  ;;  %v10797_v24 = vld [vmem:[#allocation40_spill] sm:$0xff] }
 0x421   : > { %5250 = vmatmul.msk.f32.gmra.mxu1 %vm10788_vm14, %v10280_v38 }
 0x422   : > { %3922 = vmatmul.f32.gmra.mxu2 %v8245_v30  ;;  %5217 = vmatmul.msk.f32.gmra.mxu0 %vm386_vm7, %v10280_v38  ;;  %v3298_v2 = vpop.f32.mrf.mxu3  ;;  %v10793_v30 = vld [vmem:[#allocation47_spill] sm:$0xff]  ;;  %vm10796_vm7 = vmmov %vm10788_vm14 }
 0x423   : > { %v2707_v23 = vadd.f32 %v10794_v55, %v10793_v30  ;;  %v10803_v55 = vld [vmem:[#allocation44_spill] sm:$0xff] }
 0x425   : > { %v3133_v47 = vpop.f32.mrf.mxu2  ;;  %v2919_v50 = vadd.f32 %v10797_v24, %v2707_v23  ;;  %v10805_v23 = vld [vmem:[#allocation49_spill] sm:$0xff] }
 0x426   : > { %v3134_v5 = vadd.f32 %v3133_v47, %v2913_v37  ;;  %v9298_v26 = vpop.f32.mrf.mxu1 }
 0x427   : > { %10790 = vst [vmem:[#allocation61_spill] sm:$0xff] %v9298_v26  ;;  %v9300_v63 = vpop.f32.mrf.mxu0  ;;  %4129 = vmatmul.f32.gmra.mxu3 %v10792_v59  ;;  %v10800_v59 = vld [vmem:[#allocation66_spill] sm:$0xff]  ;;  %v10812_v26 = vld [vmem:[#allocation9_spill] sm:$0xff] }
 0x428   : > { %v9302_v3 = vadd.f32 %v3294_v21, %v3134_v5  ;;  %v10801_v30 = vand.u32 4294901760, %v10800_v59 }
 0x429   : > { %5251 = vmatmul.msk.f32.gmra.mxu1 %vm392_vm3, %v10280_v38 }
 0x42a   : > { %3927 = vmatmul.f32.gmra.mxu2 %v8276_v18  ;;  %5218 = vmatmul.msk.f32.gmra.mxu0 %vm10796_vm7, %v10280_v38  ;;  %v3302_v21 = vpop.f32.mrf.mxu3  ;;  %v10802_v18 = vld [vmem:[#allocation42_spill] sm:$0xff] }
 0x42b   : > { %v2712_v27 = vadd.f32 %v10803_v55, %v10802_v18  ;;  %v10809_v55 = vld [vmem:[#allocation7_spill] sm:$0xff] }
 0x42d   : > { %v3137_v46 = vpop.f32.mrf.mxu2  ;;  %v2925_v24 = vadd.f32 %v10805_v23, %v2712_v27 }
 0x42e   : > { %v3138_v51 = vadd.f32 %v3137_v46, %v2919_v50  ;;  %v9318_v37 = vpop.f32.mrf.mxu1 }
 0x42f   : > { %10798 = vst [vmem:[#allocation34_spill] sm:$0xff] %v9318_v37  ;;  %v9320_v47 = vpop.f32.mrf.mxu0  ;;  %4135 = vmatmul.f32.gmra.mxu3 %v10801_v30  ;;  %v10810_v37 = vand.u32 4294901760, %v10809_v55 }
 0x430   : > { %10799 = vst [vmem:[#allocation53_spill] sm:$0xff] %v9320_v47  ;;  %v9322_v5 = vadd.f32 %v3298_v2, %v3138_v51 }
 0x431   : > { %5252 = vmatmul.msk.f32.gmra.mxu1 %vm395_vm6, %v10280_v38 }
 0x432   : > { %3932 = vmatmul.f32.gmra.mxu2 %v10791_v33  ;;  %5219 = vmatmul.msk.f32.gmra.mxu0 %vm392_vm3, %v10280_v38  ;;  %v3306_v2 = vpop.f32.mrf.mxu3  ;;  %v10811_v33 = vld [vmem:[#allocation45_spill] sm:$0xff] }
 0x433   : > { %v2717_v47 = vadd.f32 %v10812_v26, %v10811_v33  ;;  %v10817_v33 = vld [vmem:[#allocation43_spill] sm:$0xff] }
 0x435   : > { %v3141_v50 = vpop.f32.mrf.mxu2 }
 0x436   : > { %v3142_v46 = vadd.f32 %v3141_v50, %v2925_v24  ;;  %v9338_v51 = vpop.f32.mrf.mxu1 }
 0x437   : > { %10806 = vst [vmem:[#allocation31_spill] sm:$0xff] %v9338_v51  ;;  %v9340_v30 = vpop.f32.mrf.mxu0  ;;  %4141 = vmatmul.f32.gmra.mxu3 %v10810_v37  ;;  %v10818_v51 = vand.u32 4294901760, %v10817_v33 }
 0x438   : > { %10807 = vst [vmem:[#allocation55_spill] sm:$0xff] %v9340_v30  ;;  %v9342_v18 = vadd.f32 %v3302_v21, %v3142_v46  ;;  %v10814_v21 = vld [vmem:[#allocation57_spill] sm:$0xff]  ;;  %v10820_v30 = vld [vmem:[#allocation72_spill] sm:$0xff] }
 0x439   : > { %5253 = vmatmul.msk.f32.gmra.mxu1 %vm398_vm5, %v10280_v38  ;;  %v2931_v23 = vadd.f32 %v10814_v21, %v2717_v47 }
 0x43a   : > { %10808 = vst [vmem:[#allocation47_spill] sm:$0xff] %v9342_v18  ;;  %3937 = vmatmul.f32.gmra.mxu2 %v10800_v59  ;;  %5220 = vmatmul.msk.f32.gmra.mxu0 %vm395_vm6, %v10280_v38  ;;  %v3310_v27 = vpop.f32.mrf.mxu3  ;;  %v10819_v59 = vld [vmem:[#allocation11_spill] sm:$0xff]  ;;  %vm10874_vm6 = vcmp.eq.s32.totalorder %v10873_v62, %v8177_v13  ;;  %v10888_v62 = vld [vmem:[#allocation106_spill] sm:$0xff] }
 0x43b   : > { %v2722_v18 = vadd.f32 %v10820_v30, %v10819_v59  ;;  %v10825_v59 = vand.u32 4294901760, %v8434_v34  ;;  %vm10882_vm3 = vmmov %vm10874_vm6 }
 0x43d   : > { %v3145_v24 = vpop.f32.mrf.mxu2 }
 0x43e   : > { %v3146_v37 = vadd.f32 %v3145_v24, %v2931_v23  ;;  %v9358_v50 = vpop.f32.mrf.mxu1 }
 0x43f   : > { %10815 = vst [vmem:[#allocation37_spill] sm:$0xff] %v9358_v50  ;;  %v9360_v26 = vpop.f32.mrf.mxu0  ;;  %4147 = vmatmul.f32.gmra.mxu3 %v10818_v51  ;;  %v10827_v50 = vld [vmem:[#allocation39_spill] sm:$0xff] }
 0x440   : > { %10816 = vst [vmem:[#allocation10_spill] sm:$0xff] %v9360_v26  ;;  %v9362_v46 = vadd.f32 %v3306_v2, %v3146_v37  ;;  %v10822_v2 = vld [vmem:[#allocation68_spill] sm:$0xff] }
 0x441   : > { %5254 = vmatmul.msk.f32.gmra.mxu1 %vm401_vm1, %v10280_v38  ;;  %v2937_v21 = vadd.f32 %v10822_v2, %v2722_v18 }
 0x442   : > { %3942 = vmatmul.f32.gmra.mxu2 %v10809_v55  ;;  %5221 = vmatmul.msk.f32.gmra.mxu0 %vm398_vm5, %v10280_v38  ;;  %v3314_v47 = vpop.f32.mrf.mxu3  ;;  %v10826_v55 = vld [vmem:[#allocation70_spill] sm:$0xff] }
 0x443   : > { %v2727_v26 = vadd.f32 %v10827_v50, %v10826_v55  ;;  %v10832_v55 = vand.u32 4294901760, %v8465_v57 }
 0x445   : > { %v3149_v23 = vpop.f32.mrf.mxu2 }
 0x446   : > { %v3150_v51 = vadd.f32 %v3149_v23, %v2937_v21  ;;  %v9378_v24 = vpop.f32.mrf.mxu1 }
 0x447   : > { %10823 = vst [vmem:[#allocation40_spill] sm:$0xff] %v9378_v24  ;;  %v9380_v30 = vpop.f32.mrf.mxu0  ;;  %4153 = vmatmul.f32.gmra.mxu3 %v10825_v59  ;;  %v10834_v24 = vld [vmem:[#allocation63_spill] sm:$0xff] }
 0x448   : > { %10824 = vst [vmem:[#allocation66_spill] sm:$0xff] %v9380_v30  ;;  %v9382_v37 = vadd.f32 %v3310_v27, %v3150_v51  ;;  %v10829_v27 = vld [vmem:[#allocation76_spill] sm:$0xff] }
 0x449   : > { %5255 = vmatmul.msk.f32.gmra.mxu1 %vm404_vm8, %v10280_v38  ;;  %v2943_v2 = vadd.f32 %v10829_v27, %v2727_v26 }
 0x44a   : > { %3947 = vmatmul.f32.gmra.mxu2 %v10817_v33  ;;  %5222 = vmatmul.msk.f32.gmra.mxu0 %vm401_vm1, %v10280_v38  ;;  %v3318_v18 = vpop.f32.mrf.mxu3  ;;  %v10833_v33 = vld [vmem:[#allocation78_spill] sm:$0xff]  ;;  %vm10891_vm1 = vcmp.eq.s32.totalorder %v5925_v56, %v8177_v13  ;;  %v10900_v56 = vld [vmem:[#allocation112_spill] sm:$0xff] }
 0x44b   : > { %v2732_v30 = vadd.f32 %v10834_v24, %v10833_v33  ;;  %v10839_v33 = vand.u32 4294901760, %v8496_v7 }
 0x44d   : > { %v3153_v21 = vpop.f32.mrf.mxu2 }
 0x44e   : > { %v3154_v23 = vadd.f32 %v3153_v21, %v2943_v2  ;;  %v9398_v51 = vpop.f32.mrf.mxu1 }
 0x44f   : > { %10830 = vst [vmem:[#allocation42_spill] sm:$0xff] %v9398_v51  ;;  %v9400_v50 = vpop.f32.mrf.mxu0  ;;  %4159 = vmatmul.f32.gmra.mxu3 %v10832_v55  ;;  %v10841_v51 = vld [vmem:[#allocation75_spill] sm:$0xff] }
 0x450   : > { %10831 = vst [vmem:[#allocation44_spill] sm:$0xff] %v9400_v50  ;;  %v9402_v59 = vadd.f32 %v3314_v47, %v3154_v23  ;;  %v10836_v47 = vld [vmem:[#allocation6_spill] sm:$0xff] }
 0x451   : > { %5256 = vmatmul.msk.f32.gmra.mxu1 %vm407_vm4, %v10280_v38  ;;  %v2949_v27 = vadd.f32 %v10836_v47, %v2732_v30 }
 0x452   : > { %3952 = vmatmul.f32.gmra.mxu2 %v8434_v34  ;;  %5223 = vmatmul.msk.f32.gmra.mxu0 %vm404_vm8, %v10280_v38  ;;  %v3322_v26 = vpop.f32.mrf.mxu3  ;;  %v10840_v34 = vld [vmem:[#allocation94_spill] sm:$0xff] }
 0x453   : > { %v2737_v50 = vadd.f32 %v10841_v51, %v10840_v34  ;;  %v10846_v34 = vand.u32 4294901760, %v8527_v4 }
 0x455   : > { %v3157_v2 = vpop.f32.mrf.mxu2 }
 0x456   : > { %v3158_v21 = vadd.f32 %v3157_v2, %v2949_v27  ;;  %v9418_v23 = vpop.f32.mrf.mxu1 }
 0x457   : > { %10837 = vst [vmem:[#allocation14_spill] sm:$0xff] %v9418_v23  ;;  %v9420_v24 = vpop.f32.mrf.mxu0  ;;  %4165 = vmatmul.f32.gmra.mxu3 %v10839_v33  ;;  %v10848_v23 = vld [vmem:[#allocation93_spill] sm:$0xff] }
 0x458   : > { %10838 = vst [vmem:[#allocation49_spill] sm:$0xff] %v9420_v24  ;;  %v9422_v55 = vadd.f32 %v3318_v18, %v3158_v21  ;;  %v10843_v18 = vld [vmem:[#allocation59_spill] sm:$0xff] }
 0x459   : > { %5257 = vmatmul.msk.f32.gmra.mxu1 %vm410_vm9, %v10280_v38  ;;  %v2955_v47 = vadd.f32 %v10843_v18, %v2737_v50 }
 0x45a   : > { %3957 = vmatmul.f32.gmra.mxu2 %v8465_v57  ;;  %5224 = vmatmul.msk.f32.gmra.mxu0 %vm407_vm4, %v10280_v38  ;;  %v3326_v30 = vpop.f32.mrf.mxu3  ;;  %v10847_v57 = vld [vmem:[#allocation97_spill] sm:$0xff]  ;;  %vm10896_vm4 = vcmp.eq.s32.totalorder %v5931_v61, %v8177_v13  ;;  %v10908_v61 = vld [vmem:[#allocation12_spill] sm:$0xff] }
 0x45b   : > { %v2742_v24 = vadd.f32 %v10848_v23, %v10847_v57  ;;  %v10853_v57 = vand.u32 4294901760, %v8558_v48 }
 0x45d   : > { %v3161_v27 = vpop.f32.mrf.mxu2 }
 0x45e   : > { %v3162_v2 = vadd.f32 %v3161_v27, %v2955_v47  ;;  %v9438_v21 = vpop.f32.mrf.mxu1 }
 0x45f   : > { %10844 = vst [vmem:[#allocation7_spill] sm:$0xff] %v9438_v21  ;;  %v9440_v51 = vpop.f32.mrf.mxu0  ;;  %4171 = vmatmul.f32.gmra.mxu3 %v10846_v34  ;;  %v10855_v21 = vld [vmem:[#allocation96_spill] sm:$0xff] }
 0x460   : > { %10845 = vst [vmem:[#allocation45_spill] sm:$0xff] %v9440_v51  ;;  %v9442_v33 = vadd.f32 %v3322_v26, %v3162_v2  ;;  %v10850_v26 = vld [vmem:[#allocation80_spill] sm:$0xff] }
 0x461   : > { %5258 = vmatmul.msk.f32.gmra.mxu1 %vm413_vm10, %v10280_v38  ;;  %v2961_v18 = vadd.f32 %v10850_v26, %v2742_v24 }
 0x462   : > { %3962 = vmatmul.f32.gmra.mxu2 %v8496_v7  ;;  %5225 = vmatmul.msk.f32.gmra.mxu0 %vm410_vm9, %v10280_v38  ;;  %v3330_v50 = vpop.f32.mrf.mxu3  ;;  %v10854_v7 = vld [vmem:[#allocation100_spill] sm:$0xff]  ;;  %vm10897_vm9 = vmmov %vm10891_vm1 }
 0x463   : > { %v2747_v51 = vadd.f32 %v10855_v21, %v10854_v7  ;;  %v10859_v7 = vand.u32 4294901760, %v8589_v44 }
 0x465   : > { %v3165_v47 = vpop.f32.mrf.mxu2 }
 0x466   : > { %v3166_v27 = vadd.f32 %v3165_v47, %v2961_v18  ;;  %v9458_v2 = vpop.f32.mrf.mxu1 }
 0x467   : > { %10851 = vst [vmem:[#allocation9_spill] sm:$0xff] %v9458_v2  ;;  %v9460_v23 = vpop.f32.mrf.mxu0  ;;  %4177 = vmatmul.f32.gmra.mxu3 %v10853_v57  ;;  %v10861_v2 = vld [vmem:[#allocation99_spill] sm:$0xff] }
 0x468   : > { %10852 = vst [vmem:[#allocation16_spill] sm:$0xff] %v9460_v23  ;;  %v9462_v34 = vadd.f32 %v3326_v30, %v3166_v27  ;;  %v10857_v30 = vld [vmem:[#allocation74_spill] sm:$0xff] }
 0x469   : > { %5259 = vmatmul.msk.f32.gmra.mxu1 %vm416_vm11, %v10280_v38  ;;  %v2967_v26 = vadd.f32 %v10857_v30, %v2747_v51 }
 0x46a   : > { %3967 = vmatmul.f32.gmra.mxu2 %v8527_v4  ;;  %5226 = vmatmul.msk.f32.gmra.mxu0 %vm413_vm10, %v10280_v38  ;;  %v3334_v24 = vpop.f32.mrf.mxu3  ;;  %v10860_v4 = vld [vmem:[#allocation103_spill] sm:$0xff]  ;;  %vm10901_vm10 = vcmp.eq.s32.totalorder %v5912_v49, %v8177_v13  ;;  %v10916_v49 = vld [vmem:[#allocation13_spill] sm:$0xff] }
 0x46b   : > { %v2752_v23 = vadd.f32 %v10861_v2, %v10860_v4  ;;  %v10865_v4 = vand.u32 4294901760, %v8620_v11 }
 0x46d   : > { %v3169_v18 = vpop.f32.mrf.mxu2 }
 0x46e   : > { %v3170_v47 = vadd.f32 %v3169_v18, %v2967_v26  ;;  %v9478_v27 = vpop.f32.mrf.mxu1 }
 0x46f   : > { %10858 = vst [vmem:[#allocation57_spill] sm:$0xff] %v9478_v27  ;;  %v9480_v21 = vpop.f32.mrf.mxu0  ;;  %4183 = vmatmul.f32.gmra.mxu3 %v10859_v7 }
 0x470   : > { %v9482_v57 = vadd.f32 %v3330_v50, %v3170_v47  ;;  %v10863_v50 = vld [vmem:[#allocation95_spill] sm:$0xff] }
 0x471   : > { %5260 = vmatmul.msk.f32.gmra.mxu1 %vm419_vm12, %v10280_v38  ;;  %v2973_v30 = vadd.f32 %v10863_v50, %v2752_v23 }
 0x472   : > { %3972 = vmatmul.f32.gmra.mxu2 %v8558_v48  ;;  %5227 = vmatmul.msk.f32.gmra.mxu0 %vm416_vm11, %v10280_v38  ;;  %v3338_v51 = vpop.f32.mrf.mxu3  ;;  %v10866_v48 = vld [vmem:[#allocation102_spill] sm:$0xff]  ;;  %vm10902_vm11 = vmmov %vm10896_vm4 }
 0x473   : > { %v2757_v27 = vadd.f32 %v10866_v48, %v8663_v0  ;;  %v10871_v48 = vand.u32 4294901760, %v8651_v31 }
 0x475   : > { %v3173_v26 = vpop.f32.mrf.mxu2 }
 0x476   : > { %v3174_v18 = vadd.f32 %v3173_v26, %v2973_v30  ;;  %v9498_v47 = vpop.f32.mrf.mxu1 }
 0x477   : > { %10864 = vst [vmem:[#allocation43_spill] sm:$0xff] %v9498_v47  ;;  %v9500_v2 = vpop.f32.mrf.mxu0  ;;  %4189 = vmatmul.f32.gmra.mxu3 %v10865_v4 }
 0x478   : > { %v9502_v7 = vadd.f32 %v3334_v24, %v3174_v18  ;;  %v10868_v24 = vld [vmem:[#allocation98_spill] sm:$0xff] }
 0x479   : > { %5261 = vmatmul.msk.f32.gmra.mxu1 %vm422_vm13, %v10280_v38  ;;  %v2979_v50 = vadd.f32 %v10868_v24, %v2757_v27 }
 0x47a   : > { %3977 = vmatmul.f32.gmra.mxu2 %v8589_v44  ;;  %5228 = vmatmul.msk.f32.gmra.mxu0 %vm419_vm12, %v10280_v38  ;;  %v3342_v23 = vpop.f32.mrf.mxu3  ;;  %v10872_v44 = vld [vmem:[#allocation105_spill] sm:$0xff]  ;;  %vm10909_vm12 = vcmp.eq.s32.totalorder %v10908_v61, %v8177_v13  ;;  %v10924_v61 = vld [vmem:[#allocation15_spill] sm:$0xff] }
 0x47b   : > { %v2762_v47 = vadd.f32 %v10872_v44, %v8694_v17  ;;  %v10878_v44 = vand.u32 4294901760, %v8682_v22  ;;  %vm10918_vm0 = vmmov %vm10909_vm12  ;;  %vm10925_vm14 = vcmp.eq.s32.totalorder %v10924_v61, %v8177_v13  ;;  %v10940_v61 = vld [vmem:[#allocation19_spill] sm:$0xff] }
 0x47d   : > { %v3177_v30 = vpop.f32.mrf.mxu2 }
 0x47e   : > { %v3178_v26 = vadd.f32 %v3177_v30, %v2979_v50  ;;  %v9518_v18 = vpop.f32.mrf.mxu1 }
 0x47f   : > { %10869 = vst [vmem:[#allocation11_spill] sm:$0xff] %v9518_v18  ;;  %v9520_v0 = vpop.f32.mrf.mxu0  ;;  %4195 = vmatmul.f32.gmra.mxu3 %v10871_v48  ;;  %v10880_v18 = vld [vmem:[#allocation107_spill] sm:$0xff] }
 0x480   : > { %10870 = vst [vmem:[#allocation72_spill] sm:$0xff] %v9520_v0  ;;  %v9522_v4 = vadd.f32 %v3338_v51, %v3178_v26  ;;  %v10875_v51 = vld [vmem:[#allocation101_spill] sm:$0xff] }
 0x481   : > { %5262 = vmatmul.msk.f32.gmra.mxu1 %vm10874_vm6, %v10280_v38  ;;  %v2985_v24 = vadd.f32 %v10875_v51, %v2762_v47 }
 0x482   : > { %3982 = vmatmul.f32.gmra.mxu2 %v8620_v11  ;;  %5229 = vmatmul.msk.f32.gmra.mxu0 %vm422_vm13, %v10280_v38  ;;  %v3346_v27 = vpop.f32.mrf.mxu3  ;;  %v10879_v11 = vld [vmem:[#allocation110_spill] sm:$0xff]  ;;  %vm10910_vm13 = vmmov %vm10901_vm10 }
 0x483   : > { %v2767_v0 = vadd.f32 %v10880_v18, %v10879_v11  ;;  %v10884_v11 = vand.u32 4294901760, %v8713_v14 }
 0x485   : > { %v3181_v50 = vpop.f32.mrf.mxu2 }
 0x486   : > { %v3182_v30 = vadd.f32 %v3181_v50, %v2985_v24  ;;  %v9538_v26 = vpop.f32.mrf.mxu1 }
 0x487   : > { %10876 = vst [vmem:[#allocation18_spill] sm:$0xff] %v9538_v26  ;;  %v9540_v17 = vpop.f32.mrf.mxu0  ;;  %4201 = vmatmul.f32.gmra.mxu3 %v10878_v44 }
 0x488   : > { %10877 = vst [vmem:[#allocation68_spill] sm:$0xff] %v9540_v17  ;;  %v9542_v48 = vadd.f32 %v3342_v23, %v3182_v30  ;;  %v10883_v23 = vld [vmem:[#allocation104_spill] sm:$0xff] }
 0x489   : > { %5263 = vmatmul.msk.f32.gmra.mxu1 %vm428_vm15, %v10280_v38  ;;  %v2991_v51 = vadd.f32 %v10883_v23, %v2767_v0  ;;  %v10886_v17 = vld [vmem:[#allocation8_spill] sm:$0xff] }
 0x48a   : > { %3987 = vmatmul.f32.gmra.mxu2 %v8651_v31  ;;  %5230 = vmatmul.msk.f32.gmra.mxu0 %vm10882_vm3, %v10280_v38  ;;  %v3350_v47 = vpop.f32.mrf.mxu3  ;;  %v10885_v31 = vld [vmem:[#allocation109_spill] sm:$0xff]  ;;  %vm10887_vm5 = vcmp.eq.s32.totalorder %v10886_v17, %v8177_v13  ;;  %vm10934_vm3 = vmmov %vm10925_vm14 }
 0x48b   : > { %v2772_v26 = vadd.f32 %v10885_v31, %v8758_v9  ;;  %vm10892_vm8 = vmmov %vm10887_vm5 }
 0x48d   : > { %v3185_v24 = vpop.f32.mrf.mxu2 }
 0x48e   : > { %v3186_v50 = vadd.f32 %v3185_v24, %v2991_v51  ;;  %v4528_v30 = vpop.f32.mrf.mxu1 }
 0x48f   : > { %v9558_v44 = vpop.f32.mrf.mxu0  ;;  %4207 = vmatmul.f32.gmra.mxu3 %v10884_v11  ;;  %v10889_v11 = vand.u32 4294901760, %v8747_v32 }
 0x490   : > { %v9560_v18 = vadd.f32 %v3346_v27, %v3186_v50  ;;  %v2997_v27 = vadd.f32 %v10888_v62, %v2772_v26 }
 0x491   : > { %5264 = vmatmul.msk.f32.gmra.mxu1 %vm10887_vm5, %v10280_v38  ;;  %vm10941_vm5 = vcmp.eq.s32.totalorder %v10940_v61, %v8177_v13  ;;  %v10956_v61 = vld [vmem:[#allocation23_spill] sm:$0xff] }
 0x492   : > { %3992 = vmatmul.f32.gmra.mxu2 %v8682_v22  ;;  %5231 = vmatmul.msk.f32.gmra.mxu0 %vm428_vm15, %v10280_v38  ;;  %v4112_v0 = vpop.f32.mrf.mxu3  ;;  %v10890_v22 = vld [vmem:[#allocation111_spill] sm:$0xff]  ;;  %vm10917_vm15 = vcmp.eq.s32.totalorder %v10916_v49, %v8177_v13  ;;  %v10932_v49 = vld [vmem:[#allocation17_spill] sm:$0xff] }
 0x493   : > { %v3392_v31 = vadd.f32 %v10890_v22, %v8791_v10  ;;  %vm10926_vm7 = vmmov %vm10917_vm15  ;;  %vm10933_vm6 = vcmp.eq.s32.totalorder %v10932_v49, %v8177_v13  ;;  %v10948_v49 = vld [vmem:[#allocation21_spill] sm:$0xff] }
 0x495   : > { %v3189_v23 = vpop.f32.mrf.mxu2 }
 0x496   : > { %v3190_v51 = vadd.f32 %v3189_v23, %v2997_v27  ;;  %v4532_v9 = vpop.f32.mrf.mxu1 }
 0x497   : > { %v4367_v24 = vpop.f32.mrf.mxu0  ;;  %4213 = vmatmul.f32.gmra.mxu3 %v10889_v11  ;;  %v10894_v11 = vand.u32 4294901760, %v8780_v52 }
 0x498   : > { %v9576_v50 = vadd.f32 %v3350_v47, %v3190_v51  ;;  %v3741_v47 = vadd.f32 %v10893_v12, %v3392_v31  ;;  %v10898_v12 = vld [vmem:[#allocation48_spill] sm:$0xff] }
 0x499   : > { %5265 = vmatmul.msk.f32.gmra.mxu1 %vm10891_vm1, %v10280_v38  ;;  %vm10942_vm1 = vmmov %vm10933_vm6 }
 0x49a   : > { %3997 = vmatmul.f32.gmra.mxu2 %v8713_v14  ;;  %5232 = vmatmul.msk.f32.gmra.mxu0 %vm10892_vm8, %v10280_v38  ;;  %v4118_v26 = vpop.f32.mrf.mxu3  ;;  %v10895_v14 = vld [vmem:[#allocation50_spill] sm:$0xff]  ;;  %vm10949_vm8 = vcmp.eq.s32.totalorder %v10948_v49, %v8177_v13 }
 0x49b   : > { %v3400_v22 = vadd.f32 %v10895_v14, %v8824_v15  ;;  %v10963_v49 = vld [vmem:[#allocation26_spill] sm:$0xff] }
 0x49d   : > { %v3918_v62 = vpop.f32.mrf.mxu2 }
 0x49e   : > { %v3919_v27 = vadd.f32 %v3918_v62, %v3741_v47  ;;  %v4536_v23 = vpop.f32.mrf.mxu1  ;;  %v3745_v47 = vadd.f32 %v10898_v12, %v3400_v22  ;;  %v10903_v22 = vld [vmem:[#allocation54_spill] sm:$0xff] }
 0x49f   : > { %v4371_v10 = vpop.f32.mrf.mxu0  ;;  %4219 = vmatmul.f32.gmra.mxu3 %v10894_v11  ;;  %v3408_v11 = vadd.f32 %v10900_v56, %v8857_v19 }
 0x4a0   : > { %v4113_v51 = vadd.f32 %v4112_v0, %v3919_v27 }
 0x4a1   : > { %5266 = vmatmul.msk.f32.gmra.mxu1 %vm10896_vm4, %v10280_v38  ;;  %vm10950_vm4 = vmmov %vm10941_vm5 }
 0x4a2   : > { %v4368_v17 = vadd.f32 %v4367_v24, %v4113_v51  ;;  %4002 = vmatmul.f32.gmra.mxu2 %v8747_v32  ;;  %5233 = vmatmul.msk.f32.gmra.mxu0 %vm10897_vm9, %v10280_v38  ;;  %v4124_v0 = vpop.f32.mrf.mxu3  ;;  %v10899_v32 = vand.u32 4294901760, %v8813_v20  ;;  %vm10957_vm9 = vcmp.eq.s32.totalorder %v10956_v61, %v8177_v13  ;;  %v10970_v61 = vld [vmem:[#allocation29_spill] sm:$0xff] }
 0x4a4   : > { %v4529_v31 = vadd.f32 %v4528_v30, %v4368_v17  ;;  %v3749_v17 = vadd.f32 %v10903_v22, %v3408_v11  ;;  %v10911_v11 = vld [vmem:[#allocation52_spill] sm:$0xff] }
 0x4a5   : > { %v3923_v62 = vpop.f32.mrf.mxu2 }
 0x4a6   : > { %4754 = vst [vmem:[%s9609_s15] sm:$0xff] %v4529_v31  ;;  %v3924_v15 = vadd.f32 %v3923_v62, %v3745_v47  ;;  %v4540_v27 = vpop.f32.mrf.mxu1 }
 0x4a7   : > { %v4375_v24 = vpop.f32.mrf.mxu0  ;;  %4225 = vmatmul.f32.gmra.mxu3 %v10899_v32 }
 0x4a8   : > { %v4119_v51 = vadd.f32 %v4118_v26, %v3924_v15  ;;  %v10904_v15 = vld [vmem:[#allocation56_spill] sm:$0xff] }
 0x4a9   : > { %5267 = vmatmul.msk.f32.gmra.mxu1 %vm10901_vm10, %v10280_v38  ;;  %vm10958_vm10 = vmmov %vm10949_vm8 }
 0x4aa   : > { %v4372_v30 = vadd.f32 %v4371_v10, %v4119_v51  ;;  %4007 = vmatmul.f32.gmra.mxu2 %v8780_v52  ;;  %5234 = vmatmul.msk.f32.gmra.mxu0 %vm10902_vm11, %v10280_v38  ;;  %v4130_v26 = vpop.f32.mrf.mxu3  ;;  %v10905_v10 = vand.u32 4294901760, %v10904_v15  ;;  %v10906_v52 = vld [vmem:[#allocation117_spill] sm:$0xff]  ;;  %v10907_v51 = vld [vmem:[#allocation114_spill] sm:$0xff]  ;;  %vm10964_vm11 = vcmp.eq.s32.totalorder %v10963_v49, %v8177_v13 }
 0x4ab   : > { %v3416_v32 = vadd.f32 %v10907_v51, %v10906_v52 }
 0x4ac   : > { %v4533_v14 = vadd.f32 %v4532_v9, %v4372_v30 }
 0x4ad   : > { %v3928_v31 = vpop.f32.mrf.mxu2  ;;  %v3753_v30 = vadd.f32 %v10911_v11, %v3416_v32  ;;  %v10919_v32 = vld [vmem:[#allocation113_spill] sm:$0xff] }
 0x4ae   : > { %4755 = vst [vmem:[%s9609_s15 + $0x8] sm:$0xff] %v4533_v14  ;;  %v3929_v19 = vadd.f32 %v3928_v31, %v3749_v17  ;;  %v4544_v12 = vpop.f32.mrf.mxu1 }
 0x4af   : > { %v4379_v47 = vpop.f32.mrf.mxu0  ;;  %4231 = vmatmul.f32.gmra.mxu3 %v10905_v10  ;;  %v10912_v10 = vld [vmem:[#allocation58_spill] sm:$0xff] }
 0x4b0   : > { %v4125_v62 = vadd.f32 %v4124_v0, %v3929_v19 }
 0x4b1   : > { %5268 = vmatmul.msk.f32.gmra.mxu1 %vm10909_vm12, %v10280_v38  ;;  %vm10965_vm12 = vmmov %vm10957_vm9 }
 0x4b2   : > { %v4376_v9 = vadd.f32 %v4375_v24, %v4125_v62  ;;  %4012 = vmatmul.f32.gmra.mxu2 %v8813_v20  ;;  %5235 = vmatmul.msk.f32.gmra.mxu0 %vm10910_vm13, %v10280_v38  ;;  %v4136_v0 = vpop.f32.mrf.mxu3  ;;  %v10913_v24 = vand.u32 4294901760, %v10912_v10  ;;  %v10914_v20 = vld [vmem:[#allocation118_spill] sm:$0xff]  ;;  %v10915_v62 = vld [vmem:[#allocation116_spill] sm:$0xff]  ;;  %vm10971_vm13 = vcmp.eq.s32.totalorder %v10970_v61, %v8177_v13 }
 0x4b3   : > { %v3424_v52 = vadd.f32 %v10915_v62, %v10914_v20 }
 0x4b4   : > { %v4537_v56 = vadd.f32 %v4536_v23, %v4376_v9 }
 0x4b5   : > { %v3933_v14 = vpop.f32.mrf.mxu2  ;;  %v3757_v9 = vadd.f32 %v10919_v32, %v3424_v52  ;;  %v10927_v52 = vld [vmem:[#allocation115_spill] sm:$0xff] }
 0x4b6   : > { %4756 = vst [vmem:[%s9609_s15 + $0x10] sm:$0xff] %v4537_v56  ;;  %v3934_v22 = vadd.f32 %v3933_v14, %v3753_v30  ;;  %v4548_v17 = vpop.f32.mrf.mxu1 }
 0x4b7   : > { %v4383_v31 = vpop.f32.mrf.mxu0  ;;  %4237 = vmatmul.f32.gmra.mxu3 %v10913_v24  ;;  %v10920_v24 = vld [vmem:[#allocation69_spill] sm:$0xff] }
 0x4b8   : > { %v4131_v19 = vadd.f32 %v4130_v26, %v3934_v22 }
 0x4b9   : > { %5269 = vmatmul.msk.f32.gmra.mxu1 %vm10917_vm15, %v10280_v38  ;;  %vm10972_vm15 = vmmov %vm10964_vm11 }
 0x4ba   : > { %v4380_v23 = vadd.f32 %v4379_v47, %v4131_v19  ;;  %4017 = vmatmul.f32.gmra.mxu2 %v10904_v15  ;;  %5236 = vmatmul.msk.f32.gmra.mxu0 %vm10918_vm0, %v10280_v38  ;;  %v4142_v26 = vpop.f32.mrf.mxu3  ;;  %v10921_v47 = vand.u32 4294901760, %v10920_v24  ;;  %v10922_v15 = vld [vmem:[#allocation119_spill] sm:$0xff]  ;;  %v10923_v19 = vld [vmem:[#allocation60_spill] sm:$0xff]  ;;  %vm10976_vm0 = vcmp.eq.s32.totalorder %v10757_v6, %v8177_v13 }
 0x4bb   : > { %v3432_v20 = vadd.f32 %v10923_v19, %v10922_v15 }
 0x4bc   : > { %v4541_v51 = vadd.f32 %v4540_v27, %v4380_v23 }
 0x4bd   : > { %v3938_v56 = vpop.f32.mrf.mxu2  ;;  %v3761_v23 = vadd.f32 %v10927_v52, %v3432_v20  ;;  %v10935_v20 = vld [vmem:[#allocation64_spill] sm:$0xff] }
 0x4be   : > { %4757 = vst [vmem:[%s9609_s15 + $0x18] sm:$0xff] %v4541_v51  ;;  %v3939_v11 = vadd.f32 %v3938_v56, %v3757_v9  ;;  %v4552_v30 = vpop.f32.mrf.mxu1 }
 0x4bf   : > { %v4387_v14 = vpop.f32.mrf.mxu0  ;;  %4243 = vmatmul.f32.gmra.mxu3 %v10921_v47  ;;  %v10928_v47 = vld [vmem:[#allocation77_spill] sm:$0xff] }
 0x4c0   : > { %v4137_v22 = vadd.f32 %v4136_v0, %v3939_v11 }
 0x4c1   : > { %5270 = vmatmul.msk.f32.gmra.mxu1 %vm10925_vm14, %v10280_v38  ;;  %vm10977_vm14 = vmmov %vm10971_vm13 }
 0x4c2   : > { %v4384_v27 = vadd.f32 %v4383_v31, %v4137_v22  ;;  %4022 = vmatmul.f32.gmra.mxu2 %v10912_v10  ;;  %5237 = vmatmul.msk.f32.gmra.mxu0 %vm10926_vm7, %v10280_v38  ;;  %v4148_v0 = vpop.f32.mrf.mxu3  ;;  %v10929_v31 = vand.u32 4294901760, %v10928_v47  ;;  %v10930_v10 = vld [vmem:[#allocation120_spill] sm:$0xff]  ;;  %v10931_v22 = vld [vmem:[#allocation62_spill] sm:$0xff]  ;;  %vm10981_vm7 = vcmp.eq.s32.totalorder %v10549_v25, %v8177_v13 }
 0x4c3   : > { %v3440_v15 = vadd.f32 %v10931_v22, %v10930_v10 }
 0x4c4   : > { %v4545_v62 = vadd.f32 %v4544_v12, %v4384_v27 }
 0x4c5   : > { %v3943_v51 = vpop.f32.mrf.mxu2  ;;  %v3765_v27 = vadd.f32 %v10935_v20, %v3440_v15  ;;  %v10943_v15 = vld [vmem:[#allocation67_spill] sm:$0xff] }
 0x4c6   : > { %4758 = vst [vmem:[%s9609_s15 + $0x20] sm:$0xff] %v4545_v62  ;;  %v3944_v32 = vadd.f32 %v3943_v51, %v3761_v23  ;;  %v4556_v9 = vpop.f32.mrf.mxu1 }
 0x4c7   : > { %v4391_v56 = vpop.f32.mrf.mxu0  ;;  %4249 = vmatmul.f32.gmra.mxu3 %v10929_v31  ;;  %v10936_v31 = vld [vmem:[#allocation81_spill] sm:$0xff] }
 0x4c8   : > { %v4143_v11 = vadd.f32 %v4142_v26, %v3944_v32 }
 0x4c9   : > { %5271 = vmatmul.msk.f32.gmra.mxu1 %vm10933_vm6, %v10280_v38  ;;  %vm10982_vm6 = vmmov %vm10976_vm0 }
 0x4ca   : > { %v4388_v12 = vadd.f32 %v4387_v14, %v4143_v11  ;;  %4027 = vmatmul.f32.gmra.mxu2 %v10920_v24  ;;  %5238 = vmatmul.msk.f32.gmra.mxu0 %vm10934_vm3, %v10280_v38  ;;  %v4154_v26 = vpop.f32.mrf.mxu3  ;;  %v10937_v14 = vand.u32 4294901760, %v10936_v31  ;;  %v10938_v24 = vld [vmem:[#allocation121_spill] sm:$0xff]  ;;  %vm10986_vm3 = vmmov %vm10981_vm7 }
 0x4cb   : > { %v10939_v11 = vld [vmem:[#allocation65_spill] sm:$0xff] }
 0x4cc   : > { %v4549_v19 = vadd.f32 %v4548_v17, %v4388_v12  ;;  %v3448_v10 = vadd.f32 %v10939_v11, %v10938_v24 }
 0x4cd   : > { %v3948_v62 = vpop.f32.mrf.mxu2 }
 0x4ce   : > { %4759 = vst [vmem:[%s9609_s15 + $0x28] sm:$0xff] %v4549_v19  ;;  %v3949_v52 = vadd.f32 %v3948_v62, %v3765_v27  ;;  %v4560_v23 = vpop.f32.mrf.mxu1  ;;  %v3769_v12 = vadd.f32 %v10943_v15, %v3448_v10  ;;  %v10951_v10 = vld [vmem:[#allocation73_spill] sm:$0xff] }
 0x4cf   : > { %v4395_v51 = vpop.f32.mrf.mxu0  ;;  %4255 = vmatmul.f32.gmra.mxu3 %v10937_v14  ;;  %v10944_v14 = vld [vmem:[#allocation83_spill] sm:$0xff] }
 0x4d0   : > { %v4149_v32 = vadd.f32 %v4148_v0, %v3949_v52 }
 0x4d1   : > { %5272 = vmatmul.msk.f32.gmra.mxu1 %vm10941_vm5, %v10280_v38 }
 0x4d2   : > { %v4392_v17 = vadd.f32 %v4391_v56, %v4149_v32  ;;  %4032 = vmatmul.f32.gmra.mxu2 %v10928_v47  ;;  %5239 = vmatmul.msk.f32.gmra.mxu0 %vm10942_vm1, %v10280_v38  ;;  %v4160_v0 = vpop.f32.mrf.mxu3  ;;  %v10945_v56 = vand.u32 4294901760, %v10944_v14  ;;  %v10946_v47 = vld [vmem:[#allocation122_spill] sm:$0xff]  ;;  %v10947_v32 = vld [vmem:[#allocation71_spill] sm:$0xff] }
 0x4d3   : > { %v3456_v24 = vadd.f32 %v10947_v32, %v10946_v47 }
 0x4d4   : > { %v4553_v22 = vadd.f32 %v4552_v30, %v4392_v17 }
 0x4d5   : > { %v3953_v19 = vpop.f32.mrf.mxu2  ;;  %v3773_v17 = vadd.f32 %v10951_v10, %v3456_v24  ;;  %v10959_v24 = vld [vmem:[#allocation25_spill] sm:$0xff] }
 0x4d6   : > { %4760 = vst [vmem:[%s9609_s15 + $0x30] sm:$0xff] %v4553_v22  ;;  %v3954_v20 = vadd.f32 %v3953_v19, %v3769_v12  ;;  %v4564_v27 = vpop.f32.mrf.mxu1 }
 0x4d7   : > { %v4399_v62 = vpop.f32.mrf.mxu0  ;;  %4261 = vmatmul.f32.gmra.mxu3 %v10945_v56  ;;  %v10952_v56 = vld [vmem:[#allocation86_spill] sm:$0xff] }
 0x4d8   : > { %v4155_v52 = vadd.f32 %v4154_v26, %v3954_v20 }
 0x4d9   : > { %5273 = vmatmul.msk.f32.gmra.mxu1 %vm10949_vm8, %v10280_v38 }
 0x4da   : > { %v4396_v30 = vadd.f32 %v4395_v51, %v4155_v52  ;;  %4037 = vmatmul.f32.gmra.mxu2 %v10936_v31  ;;  %5240 = vmatmul.msk.f32.gmra.mxu0 %vm10950_vm4, %v10280_v38  ;;  %v4166_v26 = vpop.f32.mrf.mxu3  ;;  %v10953_v51 = vand.u32 4294901760, %v10952_v56  ;;  %v10954_v31 = vld [vmem:[#allocation28_spill] sm:$0xff]  ;;  %v10955_v52 = vld [vmem:[#allocation79_spill] sm:$0xff] }
 0x4db   : > { %v3464_v47 = vadd.f32 %v10955_v52, %v10954_v31  ;;  %v10966_v52 = vld [vmem:[#allocation82_spill] sm:$0xff] }
 0x4dc   : > { %v4557_v11 = vadd.f32 %v4556_v9, %v4396_v30 }
 0x4dd   : > { %v3958_v22 = vpop.f32.mrf.mxu2  ;;  %v3777_v30 = vadd.f32 %v10959_v24, %v3464_v47 }
 0x4de   : > { %4761 = vst [vmem:[%s9609_s15 + $0x38] sm:$0xff] %v4557_v11  ;;  %v3959_v15 = vadd.f32 %v3958_v22, %v3773_v17  ;;  %v4568_v12 = vpop.f32.mrf.mxu1 }
 0x4df   : > { %v4403_v19 = vpop.f32.mrf.mxu0  ;;  %4267 = vmatmul.f32.gmra.mxu3 %v10953_v51 }
 0x4e0   : > { %v4161_v20 = vadd.f32 %v4160_v0, %v3959_v15 }
 0x4e1   : > { %5274 = vmatmul.msk.f32.gmra.mxu1 %vm10957_vm9, %v10280_v38 }
 0x4e2   : > { %v4400_v9 = vadd.f32 %v4399_v62, %v4161_v20  ;;  %4042 = vmatmul.f32.gmra.mxu2 %v10944_v14  ;;  %5241 = vmatmul.msk.f32.gmra.mxu0 %vm10958_vm10, %v10280_v38  ;;  %v4172_v0 = vpop.f32.mrf.mxu3  ;;  %v10960_v62 = vand.u32 4294901760, %v9077_v45  ;;  %v10961_v14 = vld [vmem:[#allocation84_spill] sm:$0xff]  ;;  %v10962_v20 = vld [vmem:[#allocation85_spill] sm:$0xff] }
 0x4e3   : > { %v3472_v51 = vadd.f32 %v10962_v20, %v10961_v14  ;;  %v10973_v14 = vld [vmem:[#allocation89_spill] sm:$0xff] }
 0x4e4   : > { %v4561_v32 = vadd.f32 %v4560_v23, %v4400_v9 }
 0x4e5   : > { %v3963_v11 = vpop.f32.mrf.mxu2  ;;  %v3781_v47 = vadd.f32 %v10966_v52, %v3472_v51 }
 0x4e6   : > { %4762 = vst [vmem:[%s9609_s15 + $0x40] sm:$0xff] %v4561_v32  ;;  %v3964_v10 = vadd.f32 %v3963_v11, %v3777_v30  ;;  %v4572_v17 = vpop.f32.mrf.mxu1 }
 0x4e7   : > { %v4407_v22 = vpop.f32.mrf.mxu0  ;;  %4273 = vmatmul.f32.gmra.mxu3 %v10960_v62 }
 0x4e8   : > { %v4167_v15 = vadd.f32 %v4166_v26, %v3964_v10  ;;  %v10969_v10 = vld [vmem:[#allocation88_spill] sm:$0xff] }
 0x4e9   : > { %5275 = vmatmul.msk.f32.gmra.mxu1 %vm10964_vm11, %v10280_v38 }
 0x4ea   : > { %v4404_v23 = vadd.f32 %v4403_v19, %v4167_v15  ;;  %4047 = vmatmul.f32.gmra.mxu2 %v10952_v56  ;;  %5242 = vmatmul.msk.f32.gmra.mxu0 %vm10965_vm12, %v10280_v38  ;;  %v4178_v26 = vpop.f32.mrf.mxu3  ;;  %v10967_v19 = vand.u32 4294901760, %v9110_v54  ;;  %v10968_v56 = vld [vmem:[#allocation91_spill] sm:$0xff] }
 0x4eb   : > { %v3480_v15 = vadd.f32 %v10969_v10, %v10968_v56 }
 0x4ec   : > { %v4565_v31 = vadd.f32 %v4564_v27, %v4404_v23 }
 0x4ed   : > { %v3968_v9 = vpop.f32.mrf.mxu2  ;;  %v3785_v20 = vadd.f32 %v10973_v14, %v3480_v15 }
 0x4ee   : > { %4763 = vst [vmem:[%s9609_s15 + $0x48] sm:$0xff] %v4565_v31  ;;  %v3969_v32 = vadd.f32 %v3968_v9, %v3781_v47  ;;  %v4576_v24 = vpop.f32.mrf.mxu1 }
 0x4ef   : > { %v4411_v30 = vpop.f32.mrf.mxu0  ;;  %4279 = vmatmul.f32.gmra.mxu3 %v10967_v19 }
 0x4f0   : > { %v4173_v11 = vadd.f32 %v4172_v0, %v3969_v32  ;;  %v10978_v32 = vld [vmem:[#allocation92_spill] sm:$0xff] }
 0x4f1   : > { %5276 = vmatmul.msk.f32.gmra.mxu1 %vm10971_vm13, %v10280_v38 }
 0x4f2   : > { %v4408_v27 = vadd.f32 %v4407_v22, %v4173_v11  ;;  %4052 = vmatmul.f32.gmra.mxu2 %v9077_v45  ;;  %5243 = vmatmul.msk.f32.gmra.mxu0 %vm10972_vm15, %v10280_v38  ;;  %v4184_v0 = vpop.f32.mrf.mxu3  ;;  %v10974_v22 = vand.u32 4294901760, %v9143_v41  ;;  %v10975_v45 = vld [vmem:[#allocation46_spill] sm:$0xff] }
 0x4f3   : > { %v3488_v9 = vadd.f32 %v10975_v45, %v9187_v36 }
 0x4f4   : > { %v4569_v62 = vadd.f32 %v4568_v12, %v4408_v27 }
 0x4f5   : > { %v3973_v51 = vpop.f32.mrf.mxu2  ;;  %v3789_v11 = vadd.f32 %v10978_v32, %v3488_v9  ;;  %v10987_v9 = vld [vmem:[#allocation87_spill] sm:$0xff] }
 0x4f6   : > { %4764 = vst [vmem:[%s9609_s15 + $0x50] sm:$0xff] %v4569_v62  ;;  %v3974_v23 = vadd.f32 %v3973_v51, %v3785_v20  ;;  %v4580_v31 = vpop.f32.mrf.mxu1  ;;  %v10983_v62 = vld [vmem:[#allocation32_spill] sm:$0xff] }
 0x4f7   : > { %v4415_v52 = vpop.f32.mrf.mxu0  ;;  %4285 = vmatmul.f32.gmra.mxu3 %v10974_v22 }
 0x4f8   : > { %v4179_v47 = vadd.f32 %v4178_v26, %v3974_v23 }
 0x4f9   : > { %5277 = vmatmul.msk.f32.gmra.mxu1 %vm10976_vm0, %v10280_v38 }
 0x4fa   : > { %v4412_v12 = vadd.f32 %v4411_v30, %v4179_v47  ;;  %4057 = vmatmul.f32.gmra.mxu2 %v9110_v54  ;;  %5244 = vmatmul.msk.f32.gmra.mxu0 %vm10977_vm14, %v10280_v38  ;;  %v4190_v49 = vpop.f32.mrf.mxu3  ;;  %v10979_v30 = vand.u32 4294901760, %v9176_v58  ;;  %v10980_v54 = vld [vmem:[#allocation51_spill] sm:$0xff] }
 0x4fb   : > { %v3496_v27 = vadd.f32 %v10980_v54, %v9218_v53 }
 0x4fc   : > { %v4573_v26 = vadd.f32 %v4572_v17, %v4412_v12 }
 0x4fd   : > { %v3978_v19 = vpop.f32.mrf.mxu2  ;;  %v3793_v14 = vadd.f32 %v10983_v62, %v3496_v27 }
 0x4fe   : > { %4765 = vst [vmem:[%s9609_s15 + $0x58] sm:$0xff] %v4573_v26  ;;  %v3979_v36 = vadd.f32 %v3978_v19, %v3789_v11  ;;  %v4584_v56 = vpop.f32.mrf.mxu1  ;;  %v3512_v19 = vadd.f32 %v9241_v1, %v9262_v28  ;;  %v3520_v1 = vadd.f32 %v9260_v39, %v9282_v35 }
 0x4ff   : > { %v4419_v10 = vpop.f32.mrf.mxu0  ;;  %4291 = vmatmul.f32.gmra.mxu3 %v10979_v30 }
 0x500   : > { %v4185_v15 = vadd.f32 %v4184_v0, %v3979_v36  ;;  %v10988_v36 = vld [vmem:[#allocation35_spill] sm:$0xff] }
 0x501   : > { %5278 = vmatmul.msk.f32.gmra.mxu1 %vm10981_vm7, %v10280_v38 }
 0x502   : > { %v4416_v17 = vadd.f32 %v4415_v52, %v4185_v15  ;;  %4062 = vmatmul.f32.gmra.mxu2 %v9143_v41  ;;  %5245 = vmatmul.msk.f32.gmra.mxu0 %vm10982_vm6, %v10280_v38  ;;  %v4196_v61 = vpop.f32.mrf.mxu3  ;;  %v10984_v52 = vand.u32 4294901760, %v9208_v16  ;;  %v10985_v41 = vld [vmem:[#allocation90_spill] sm:$0xff] }
 0x503   : > { %v3504_v22 = vadd.f32 %v10985_v41, %v9243_v42  ;;  %v3536_v41 = vadd.f32 %v9300_v63, %v9322_v5  ;;  %v10991_v63 = vld [vmem:[#allocation61_spill] sm:$0xff] }
 0x504   : > { %v4577_v0 = vadd.f32 %v4576_v24, %v4416_v17 }
 0x505   : > { %v3983_v20 = vpop.f32.mrf.mxu2  ;;  %v3797_v12 = vadd.f32 %v10987_v9, %v3504_v22 }
 0x506   : > { %4766 = vst [vmem:[%s9609_s15 + $0x60] sm:$0xff] %v4577_v0  ;;  %v3984_v53 = vadd.f32 %v3983_v20, %v3793_v14  ;;  %v4588_v51 = vpop.f32.mrf.mxu1  ;;  %v3528_v14 = vadd.f32 %v9280_v43, %v9302_v3  ;;  %v3813_v43 = vadd.f32 %v9278_v40, %v3536_v41 }
 0x507   : > { %v4423_v23 = vpop.f32.mrf.mxu0  ;;  %4297 = vmatmul.f32.gmra.mxu3 %v10984_v52 }
 0x508   : > { %v4191_v47 = vadd.f32 %v4190_v49, %v3984_v53  ;;  %v3809_v39 = vadd.f32 %v9258_v29, %v3528_v14 }
 0x509   : > { %5279 = vmatmul.msk.f32.gmra.mxu1 %vm476_vm2, %v10280_v38 }
 0x50a   : > { %v4420_v6 = vadd.f32 %v4419_v10, %v4191_v47  ;;  %4067 = vmatmul.f32.gmra.mxu2 %v9176_v58  ;;  %5246 = vmatmul.msk.f32.gmra.mxu0 %vm10986_vm3, %v10280_v38  ;;  %v4202_v24 = vpop.f32.mrf.mxu3  ;;  %v3801_v10 = vadd.f32 %v10988_v36, %v3512_v19 }
 0x50c   : > { %v4581_v45 = vadd.f32 %v4580_v31, %v4420_v6 }
 0x50d   : > { %v3988_v49 = vpop.f32.mrf.mxu2 }
 0x50e   : > { %4767 = vst [vmem:[%s9609_s15 + $0x68] sm:$0xff] %v4581_v45  ;;  %v3989_v42 = vadd.f32 %v3988_v49, %v3797_v12  ;;  %v4592_v26 = vpop.f32.mrf.mxu1  ;;  %v10989_v49 = vld [vmem:[#allocation47_spill] sm:$0xff] }
 0x50f   : > { %v4427_v32 = vpop.f32.mrf.mxu0 }
 0x510   : > { %v4197_v11 = vadd.f32 %v4196_v61, %v3989_v42  ;;  %v10990_v42 = vld [vmem:[#allocation53_spill] sm:$0xff] }
 0x512   : > { %v4424_v58 = vadd.f32 %v4423_v23, %v4197_v11  ;;  %4072 = vmatmul.f32.gmra.mxu2 %v9208_v16  ;;  %5247 = vmatmul.msk.f32.gmra.mxu0 %vm476_vm2, %v10280_v38  ;;  %v4208_v25 = vpop.f32.mrf.mxu3  ;;  %v3805_v38 = vadd.f32 %v9239_v60, %v3520_v1 }
 0x514   : > { %v4585_v31 = vadd.f32 %v4584_v56, %v4424_v58 }
 0x515   : > { %v3993_v15 = vpop.f32.mrf.mxu2 }
 0x516   : > { %4768 = vst [vmem:[%s9609_s15 + $0x70] sm:$0xff] %v4585_v31  ;;  %v3994_v30 = vadd.f32 %v3993_v15, %v3801_v10  ;;  %v4596_v54 = vpop.f32.mrf.mxu1  ;;  %v10992_v10 = vld [vmem:[#allocation55_spill] sm:$0xff] }
 0x517   : > { %v4431_v27 = vpop.f32.mrf.mxu0  ;;  %v3552_v15 = vadd.f32 %v10992_v10, %v9362_v46  ;;  %v10995_v46 = vld [vmem:[#allocation31_spill] sm:$0xff] }
 0x518   : > { %v4203_v17 = vadd.f32 %v4202_v24, %v3994_v30 }
 0x51a   : > { %v4428_v16 = vadd.f32 %v4427_v32, %v4203_v17  ;;  %v4214_v28 = vpop.f32.mrf.mxu3  ;;  %v10993_v17 = vld [vmem:[#allocation34_spill] sm:$0xff] }
 0x51b   : > { %v3821_v1 = vadd.f32 %v10993_v17, %v3552_v15 }
 0x51c   : > { %v4589_v61 = vadd.f32 %v4588_v51, %v4428_v16 }
 0x51d   : > { %v3998_v8 = vpop.f32.mrf.mxu2 }
 0x51e   : > { %4769 = vst [vmem:[%s9609_s15 + $0x78] sm:$0xff] %v4589_v61  ;;  %v3999_v13 = vadd.f32 %v3998_v8, %v3805_v38  ;;  %v4600_v56 = vpop.f32.mrf.mxu1  ;;  %v10994_v8 = vld [vmem:[#allocation10_spill] sm:$0xff] }
 0x51f   : > { %v4435_v0 = vpop.f32.mrf.mxu0 }
 0x520   : > { %v4209_v62 = vadd.f32 %v4208_v25, %v3999_v13  ;;  %v3560_v13 = vadd.f32 %v10994_v8, %v9382_v37 }
 0x522   : > { %v4432_v20 = vadd.f32 %v4431_v27, %v4209_v62  ;;  %v4220_v53 = vpop.f32.mrf.mxu3 }
 0x524   : > { %v4593_v23 = vadd.f32 %v4592_v26, %v4432_v20  ;;  %v3544_v26 = vadd.f32 %v10990_v42, %v10989_v49  ;;  %v3825_v20 = vadd.f32 %v10995_v46, %v3560_v13 }
 0x525   : > { %v4003_v35 = vpop.f32.mrf.mxu2 }
 0x526   : > { %4770 = vst [vmem:[%s9609_s15 + $0x80] sm:$0xff] %v4593_v23  ;;  %v4004_v51 = vadd.f32 %v4003_v35, %v3809_v39  ;;  %v4604_v47 = vpop.f32.mrf.mxu1  ;;  %v3817_v5 = vadd.f32 %v10991_v63, %v3544_v26 }
 0x527   : > { %v4439_v60 = vpop.f32.mrf.mxu0 }
 0x528   : > { %v4215_v52 = vadd.f32 %v4214_v28, %v4004_v51  ;;  %v10996_v51 = vld [vmem:[#allocation66_spill] sm:$0xff] }
 0x52a   : > { %v4436_v22 = vadd.f32 %v4435_v0, %v4215_v52  ;;  %v4226_v6 = vpop.f32.mrf.mxu3 }
 0x52c   : > { %v4597_v24 = vadd.f32 %v4596_v54, %v4436_v22  ;;  %v10997_v22 = vld [vmem:[#allocation37_spill] sm:$0xff] }
 0x52d   : > { %v4008_v3 = vpop.f32.mrf.mxu2 }
 0x52e   : > { %4771 = vst [vmem:[%s9609_s15 + $0x88] sm:$0xff] %v4597_v24  ;;  %v4009_v45 = vadd.f32 %v4008_v3, %v3813_v43  ;;  %v4608_v9 = vpop.f32.mrf.mxu1 }
 0x52f   : > { %v4443_v29 = vpop.f32.mrf.mxu0 }
 0x530   : > { %v4221_v12 = vadd.f32 %v4220_v53, %v4009_v45 }
 0x532   : > { %v4440_v32 = vadd.f32 %v4439_v60, %v4221_v12  ;;  %v4232_v11 = vpop.f32.mrf.mxu3 }
 0x534   : > { %v4601_v19 = vadd.f32 %v4600_v56, %v4440_v32 }
 0x535   : > { %v4013_v58 = vpop.f32.mrf.mxu2 }
 0x536   : > { %4772 = vst [vmem:[%s9609_s15 + $0x90] sm:$0xff] %v4601_v19  ;;  %v4014_v25 = vadd.f32 %v4013_v58, %v3817_v5  ;;  %v4612_v31 = vpop.f32.mrf.mxu1  ;;  %v11000_v58 = vld [vmem:[#allocation49_spill] sm:$0xff] }
 0x537   : > { %v4447_v40 = vpop.f32.mrf.mxu0 }
 0x538   : > { %v4227_v36 = vadd.f32 %v4226_v6, %v4014_v25  ;;  %v3584_v25 = vadd.f32 %v11000_v58, %v9442_v33 }
 0x53a   : > { %v4444_v30 = vadd.f32 %v4443_v29, %v4227_v36  ;;  %v4238_v54 = vpop.f32.mrf.mxu3 }
 0x53c   : > { %v4605_v27 = vadd.f32 %v4604_v47, %v4444_v30  ;;  %v3568_v47 = vadd.f32 %v10996_v51, %v9402_v59  ;;  %v10999_v59 = vld [vmem:[#allocation40_spill] sm:$0xff] }
 0x53d   : > { %v4018_v16 = vpop.f32.mrf.mxu2 }
 0x53e   : > { %4773 = vst [vmem:[%s9609_s15 + $0x98] sm:$0xff] %v4605_v27  ;;  %v4019_v28 = vadd.f32 %v4018_v16, %v3821_v1  ;;  %v4616_v56 = vpop.f32.mrf.mxu1  ;;  %v3829_v6 = vadd.f32 %v10997_v22, %v3568_v47  ;;  %v11002_v1 = vld [vmem:[#allocation45_spill] sm:$0xff] }
 0x53f   : > { %v4451_v61 = vpop.f32.mrf.mxu0  ;;  %v3592_v16 = vadd.f32 %v11002_v1, %v9462_v34 }
 0x540   : > { %v4233_v38 = vadd.f32 %v4232_v11, %v4019_v28 }
 0x542   : > { %v4448_v0 = vadd.f32 %v4447_v40, %v4233_v38  ;;  %v4244_v62 = vpop.f32.mrf.mxu3  ;;  %v11003_v38 = vld [vmem:[#allocation14_spill] sm:$0xff] }
 0x543   : > { %v3841_v33 = vadd.f32 %v11003_v38, %v3592_v16 }
 0x544   : > { %v4609_v14 = vadd.f32 %v4608_v9, %v4448_v0  ;;  %v10998_v9 = vld [vmem:[#allocation44_spill] sm:$0xff] }
 0x545   : > { %v4023_v53 = vpop.f32.mrf.mxu2  ;;  %v3576_v29 = vadd.f32 %v10998_v9, %v9422_v55  ;;  %v11001_v55 = vld [vmem:[#allocation42_spill] sm:$0xff]  ;;  %v3616_v9 = vadd.f32 %v9500_v2, %v9522_v4  ;;  %v11009_v2 = vld [vmem:[#allocation43_spill] sm:$0xff] }
 0x546   : > { %4774 = vst [vmem:[%s9609_s15 + $0xa0] sm:$0xff] %v4609_v14  ;;  %v4024_v23 = vadd.f32 %v4023_v53, %v3825_v20  ;;  %v4620_v52 = vpop.f32.mrf.mxu1  ;;  %v3837_v10 = vadd.f32 %v11001_v55, %v3584_v25  ;;  %v11004_v14 = vld [vmem:[#allocation16_spill] sm:$0xff] }
 0x547   : > { %v4455_v39 = vpop.f32.mrf.mxu0  ;;  %v3833_v26 = vadd.f32 %v10999_v59, %v3576_v29  ;;  %v3600_v46 = vadd.f32 %v11004_v14, %v9482_v57  ;;  %v11006_v57 = vld [vmem:[#allocation9_spill] sm:$0xff] }
 0x548   : > { %v4239_v35 = vadd.f32 %v4238_v54, %v4024_v23 }
 0x54a   : > { %v4452_v60 = vadd.f32 %v4451_v61, %v4239_v35  ;;  %v4250_v41 = vpop.f32.mrf.mxu3 }
 0x54c   : > { %v4613_v37 = vadd.f32 %v4612_v31, %v4452_v60 }
 0x54d   : > { %v4028_v24 = vpop.f32.mrf.mxu2 }
 0x54e   : > { %4775 = vst [vmem:[%s9609_s15 + $0xa8] sm:$0xff] %v4613_v37  ;;  %v4029_v43 = vadd.f32 %v4028_v24, %v3829_v6  ;;  %v4624_v32 = vpop.f32.mrf.mxu1 }
 0x54f   : > { %v4459_v3 = vpop.f32.mrf.mxu0 }
 0x550   : > { %v4245_v45 = vadd.f32 %v4244_v62, %v4029_v43 }
 0x552   : > { %v4456_v12 = vadd.f32 %v4455_v39, %v4245_v45  ;;  %v4256_v49 = vpop.f32.mrf.mxu3  ;;  %v11005_v39 = vld [vmem:[#allocation7_spill] sm:$0xff] }
 0x553   : > { %v3845_v34 = vadd.f32 %v11005_v39, %v3600_v46 }
 0x554   : > { %v4617_v42 = vadd.f32 %v4616_v56, %v4456_v12 }
 0x555   : > { %v4033_v11 = vpop.f32.mrf.mxu2 }
 0x556   : > { %4776 = vst [vmem:[%s9609_s15 + $0xb0] sm:$0xff] %v4617_v42  ;;  %v4034_v19 = vadd.f32 %v4033_v11, %v3833_v26  ;;  %v4628_v54 = vpop.f32.mrf.mxu1 }
 0x557   : > { %v4463_v63 = vpop.f32.mrf.mxu0 }
 0x558   : > { %v4251_v5 = vadd.f32 %v4250_v41, %v4034_v19  ;;  %v11008_v19 = vld [vmem:[#allocation72_spill] sm:$0xff] }
 0x55a   : > { %v4460_v31 = vadd.f32 %v4459_v3, %v4251_v5  ;;  %v4262_v40 = vpop.f32.mrf.mxu3 }
 0x55c   : > { %v4621_v36 = vadd.f32 %v4620_v52, %v4460_v31  ;;  %v3608_v52 = vadd.f32 %v9480_v21, %v9502_v7  ;;  %v11007_v21 = vld [vmem:[#allocation57_spill] sm:$0xff] }
 0x55d   : > { %v4038_v15 = vpop.f32.mrf.mxu2  ;;  %v3853_v7 = vadd.f32 %v11007_v21, %v3616_v9 }
 0x55e   : > { %4777 = vst [vmem:[%s9609_s15 + $0xb8] sm:$0xff] %v4621_v36  ;;  %v4039_v30 = vadd.f32 %v4038_v15, %v3837_v10  ;;  %v4632_v20 = vpop.f32.mrf.mxu1  ;;  %v3849_v24 = vadd.f32 %v11006_v57, %v3608_v52  ;;  %v11010_v15 = vld [vmem:[#allocation68_spill] sm:$0xff] }
 0x55f   : > { %v4467_v27 = vpop.f32.mrf.mxu0 }
 0x560   : > { %v4257_v17 = vadd.f32 %v4256_v49, %v4039_v30  ;;  %v3632_v30 = vadd.f32 %v11010_v15, %v9560_v18  ;;  %v11012_v18 = vld [vmem:[#allocation18_spill] sm:$0xff] }
 0x562   : > { %v4464_v28 = vadd.f32 %v4463_v63, %v4257_v17  ;;  %v4268_v8 = vpop.f32.mrf.mxu3  ;;  %v3624_v63 = vadd.f32 %v11008_v19, %v9542_v48  ;;  %v11011_v17 = vld [vmem:[#allocation11_spill] sm:$0xff] }
 0x563   : > { %v3861_v48 = vadd.f32 %v11011_v17, %v3632_v30 }
 0x564   : > { %v4625_v61 = vadd.f32 %v4624_v32, %v4464_v28  ;;  %v3857_v4 = vadd.f32 %v11009_v2, %v3624_v63 }
 0x565   : > { %v4043_v13 = vpop.f32.mrf.mxu2 }
 0x566   : > { %4778 = vst [vmem:[%s9609_s15 + $0xc0] sm:$0xff] %v4625_v61  ;;  %v4044_v56 = vadd.f32 %v4043_v13, %v3841_v33  ;;  %v4636_v22 = vpop.f32.mrf.mxu1  ;;  %v3640_v33 = vadd.f32 %v9558_v44, %v9576_v50 }
 0x567   : > { %v4471_v0 = vpop.f32.mrf.mxu0 }
 0x568   : > { %v4263_v62 = vadd.f32 %v4262_v40, %v4044_v56 }
 0x56a   : > { %v4468_v53 = vadd.f32 %v4467_v27, %v4263_v62  ;;  %v4274_v47 = vpop.f32.mrf.mxu3 }
 0x56c   : > { %v4629_v23 = vadd.f32 %v4628_v54, %v4468_v53 }
 0x56d   : > { %v4048_v35 = vpop.f32.mrf.mxu2 }
 0x56e   : > { %4779 = vst [vmem:[%s9609_s15 + $0xc8] sm:$0xff] %v4629_v23  ;;  %v4049_v51 = vadd.f32 %v4048_v35, %v3845_v34  ;;  %v4640_v59 = vpop.f32.mrf.mxu1 }
 0x56f   : > { %v4475_v41 = vpop.f32.mrf.mxu0 }
 0x570   : > { %v4269_v60 = vadd.f32 %v4268_v8, %v4049_v51 }
 0x572   : > { %v4472_v37 = vadd.f32 %v4471_v0, %v4269_v60  ;;  %v4280_v29 = vpop.f32.mrf.mxu3  ;;  %v3865_v0 = vadd.f32 %v11012_v18, %v3640_v33 }
 0x574   : > { %v4633_v6 = vadd.f32 %v4632_v20, %v4472_v37 }
 0x575   : > { %v4053_v43 = vpop.f32.mrf.mxu2 }
 0x576   : > { %4780 = vst [vmem:[%s9609_s15 + $0xd0] sm:$0xff] %v4633_v6  ;;  %v4054_v3 = vadd.f32 %v4053_v43, %v3849_v24  ;;  %v4644_v55 = vpop.f32.mrf.mxu1 }
 0x577   : > { %v4479_v49 = vpop.f32.mrf.mxu0 }
 0x578   : > { %v4275_v45 = vadd.f32 %v4274_v47, %v4054_v3 }
 0x57a   : > { %v4476_v12 = vadd.f32 %v4475_v41, %v4275_v45  ;;  %v4286_v58 = vpop.f32.mrf.mxu3 }
 0x57c   : > { %v4637_v42 = vadd.f32 %v4636_v22, %v4476_v12 }
 0x57d   : > { %v4058_v26 = vpop.f32.mrf.mxu2 }
 0x57e   : > { %4781 = vst [vmem:[%s9609_s15 + $0xd8] sm:$0xff] %v4637_v42  ;;  %v4059_v32 = vadd.f32 %v4058_v26, %v3853_v7  ;;  %v4648_v8 = vpop.f32.mrf.mxu1 }
 0x57f   : > { %v4483_v31 = vpop.f32.mrf.mxu0 }
 0x580   : > { %v4281_v11 = vadd.f32 %v4280_v29, %v4059_v32 }
 0x582   : > { %v4480_v5 = vadd.f32 %v4479_v49, %v4281_v11  ;;  %v4292_v1 = vpop.f32.mrf.mxu3 }
 0x584   : > { %v4641_v25 = vadd.f32 %v4640_v59, %v4480_v5 }
 0x585   : > { %v4063_v40 = vpop.f32.mrf.mxu2 }
 0x586   : > { %4782 = vst [vmem:[%s9609_s15 + $0xe0] sm:$0xff] %v4641_v25  ;;  %v4064_v36 = vadd.f32 %v4063_v40, %v3857_v4  ;;  %v4652_v53 = vpop.f32.mrf.mxu1 }
 0x587   : > { %v4487_v61 = vpop.f32.mrf.mxu0 }
 0x588   : > { %v4287_v10 = vadd.f32 %v4286_v58, %v4064_v36 }
 0x58a   : > { %v4484_v54 = vadd.f32 %v4483_v31, %v4287_v10  ;;  %v4298_v46 = vpop.f32.mrf.mxu3 }
 0x58c   : > { %v4645_v27 = vadd.f32 %v4644_v55, %v4484_v54 }
 0x58d   : > { %v4068_v16 = vpop.f32.mrf.mxu2 }
 0x58e   : > { %4783 = vst [vmem:[%s9609_s15 + $0xe8] sm:$0xff] %v4645_v27  ;;  %v4069_v28 = vadd.f32 %v4068_v16, %v3861_v48 }
 0x58f   : > { %v4491_v44 = vpop.f32.mrf.mxu0 }
 0x590   : > { %v4293_v38 = vadd.f32 %v4292_v1, %v4069_v28 }
 0x592   : > { %v4488_v13 = vadd.f32 %v4487_v61, %v4293_v38 }
 0x594   : > { %v4649_v56 = vadd.f32 %v4648_v8, %v4488_v13 }
 0x595   : > { %v4073_v62 = vpop.f32.mrf.mxu2 }
 0x596   : > { %4784 = vst [vmem:[%s9609_s15 + $0xf0] sm:$0xff] %v4649_v56  ;;  %v4074_v14 = vadd.f32 %v4073_v62, %v3865_v0 }
 0x598   : > { %v4299_v20 = vadd.f32 %v4298_v46, %v4074_v14 }
 0x59a   : > { %v4492_v50 = vadd.f32 %v4491_v44, %v4299_v20 }
 0x59c   : > { %v4653_v23 = vadd.f32 %v4652_v53, %v4492_v50 }
 0x59e   : > { %4785 = vst [vmem:[%s9609_s15 + $0xf8] sm:$0xff] %v4653_v23 }
 0x59f   : > { %5408 = shalt.err (!%p5405_p5)
}
 0x5a0   : > { %s5464_s5 = smov 128   ;;  %s5465_s6 = smov 8  }
 0x5a1   : > { %5318 = dma.vmem_to_hbm [thread:$0]  (%p5521_p4), %s4800_s24, 4096, %s4802_s27, %s4787_s12, %s5464_s5, %s5464_s5, %s5465_s6  }
 0x5a2 PF: > { %p5324_p6 = scmp.ge.s32.totalorder %s5459_s14, 2  ;;  %s4816_s7 = sand.u32 1, %s5439_s9  }
 0x5a3   : > { %s4817_s8 = scalar_lea.sflag [#allocation4], %s4816_s7 }
 0x5a4   : > { %p5321_p7 = pnand %p5324_p6, %p5528_p8 }
 0x5a6   : > { %p5322_p9 = pneg %p5321_p7 }
 0x5a8   : > { %5434 = dma.done.wait (%p5322_p9), %s4817_s8, 4096  }
 0x5a9   : > { %5436 = vsyncadd (%p5322_p9), %s4817_s8, 4294963200  ;;  %s15_s14 = sadd.s32 1, %s5459_s14   ;;  %s11013_s9 = smov %s5443_s10 }
 0x5aa   : > { %p12_p10 = scmp.ge.s32.totalorder %s15_s14, 4   ;;  %s11014_s10 = smov %s5447_s11 }
 0x5ab   : > { %s11015_s11 = smov %s5534_s22  ;;  %s11016_s12 = smov %s5455_s13 }
 0x5ac   : > { %s11017_s13 = smov %s11019_s17  ;;  %14 = sbr.rel (!%p12_p10) target bundleno = 4 (0x4), region = 74 }
 0x5b1   :  { %4823 = vsyncpa [#allocation4], 1 }
 0x5b2   :  { %4825 = vsyncpa [#allocation4 + $0x1], 1 }

</bundles_post_ra>
